<compile_context>
chip_gen: v7x
topology: tpu7x:2x2x1
jax: 0.10.0
libtpu: 0.0.40
codegen_flags: <defaults>
</compile_context>

<pallas_src>
import functools

import jax
import jax.numpy as jnp
from jax import lax
from jax.experimental import pallas as pl
from jax.experimental.pallas import tpu as pltpu


def _round_up(x, m):
    return (x + m - 1) // m * m


# ----------------------------------------------------------------------------
# Fused Pallas kernel: all LSTM layers + FC head for one batch block.
# ----------------------------------------------------------------------------
def _fused_lstm_fc_kernel(*refs, num_layers, hidden_pad, seq_len, batch_blk,
                          compute_dtype):
    """Ref layout (inputs, outputs, scratch):

      in : x2d, (wih_l, whh_l, b_l) * num_layers, fc_w, fc_b
      out: out2d
      scr: xw_sc, hseq_sc

      x2d     : (S*Bb, D_in)      time-major, batch-padded, flattened, cdt
      wih_l   : (D_l, 4*Hp)       gate-fused input weights  (x @ W.T), cdt
      whh_l   : (Hp, 4*Hp)        gate-fused recurrent weights        , cdt
      b_l     : (1, 4*Hp)         combined bias (b_ih + b_hh), f32
      fc_w    : (Hp, O_pad)       head weights, O zero-padded to 128 lanes
      fc_b    : (1, O_pad)        head bias, f32
      out2d   : (S*Bb, O_pad)     cdt (lane-dense store)
      xw_sc   : (S*Bb, 4*Hp) f32  hoisted x-projection (+ folded bias)
      hseq_sc : (S*Bb, Hp)   f32  hidden-state sequence of current layer
    """
    n_in = 1 + 3 * num_layers + 2
    x_ref = refs[0]
    layer_refs = refs[1:1 + 3 * num_layers]
    fc_w_ref = refs[1 + 3 * num_layers]
    fc_b_ref = refs[2 + 3 * num_layers]
    out_ref = refs[n_in]
    xw_sc = refs[n_in + 1]
    hseq_sc = refs[n_in + 2]

    S, Bb, Hp = seq_len, batch_blk, hidden_pad
    cdt = compute_dtype

    for l in range(num_layers):
        wih_ref = layer_refs[3 * l + 0]          # (D_l, 4*Hp)
        whh_ref = layer_refs[3 * l + 1]          # (Hp, 4*Hp)
        b_ref = layer_refs[3 * l + 2]            # (1, 4*Hp) f32

        # ---- hoisted, gate-fused input projection; bias folded in once ----
        x_in = (x_ref[...] if l == 0 else hseq_sc[...]).astype(cdt)
        xw_sc[...] = (jnp.dot(x_in, wih_ref[...],
                              preferred_element_type=jnp.float32)
                      + b_ref[...])

        def step(t, carry):
            h_prev, c_prev = carry               # (Bb, Hp) f32
            if isinstance(t, int):
                row = t * Bb                     # static (unrolled path)
            else:
                row = pl.multiple_of(t * Bb, Bb)  # dynamic, sublane-aligned
            # One fused (Bb, Hp) @ (Hp, 4*Hp) MXU matmul per step; W_hh is
            # streamed from its VMEM ref (not held live across the loop).
            pre = (xw_sc[pl.ds(row, Bb), :]
                   + jnp.dot(h_prev.astype(cdt), whh_ref[...],
                             preferred_element_type=jnp.float32))
            # Gate order i, f, g, o; slices are 128-lane aligned (Hp % 128 == 0).
            i_t = jax.nn.sigmoid(pre[:, 0 * Hp:1 * Hp])
            f_t = jax.nn.sigmoid(pre[:, 1 * Hp:2 * Hp])
            g_t = jnp.tanh(pre[:, 2 * Hp:3 * Hp])
            o_t = jax.nn.sigmoid(pre[:, 3 * Hp:4 * Hp])
            c_new = f_t * c_prev + i_t * g_t      # f32 cell state
            h_new = o_t * jnp.tanh(c_new)
            hseq_sc[pl.ds(row, Bb), :] = h_new
            return h_new, c_new

        h0 = jnp.zeros((Bb, Hp), jnp.float32)
        c0 = jnp.zeros((Bb, Hp), jnp.float32)
        if S <= 16:
            carry = (h0, c0)
            for t in range(S):                    # fully unrolled, static idx
                carry = step(t, carry)
        else:
            lax.fori_loop(0, S, step, (h0, c0), unroll=2)

    # ---- FC head over whole sequence: (S*Bb, Hp) @ (Hp, O_pad) ----
    hs = hseq_sc[...].astype(cdt)
    y = jnp.dot(hs, fc_w_ref[...], preferred_element_type=jnp.float32)
    out_ref[...] = (y + fc_b_ref[...]).astype(out_ref.dtype)   # lane-dense vst


# ----------------------------------------------------------------------------
# VMEM budget (explicit vmem_limit_bytes with headroom)
# ----------------------------------------------------------------------------
def _vmem_limit_bytes(params, seq_len, batch_blk, d_in, out_dtype):
    nbytes = lambda a: int(a.size) * a.dtype.itemsize
    wbytes = sum(nbytes(t) for layer in params["lstm_layers"] for t in layer)
    wbytes += nbytes(params["fc_w"]) + nbytes(params["fc_b"])
    Hp = params["hidden_pad"]
    o_pad = params["fc_w"].shape[1]
    cdt_b = jnp.dtype(params["compute_dtype"]).itemsize
    out_b = jnp.dtype(out_dtype).itemsize
    rows = seq_len * batch_blk
    io_bytes = rows * (d_in * cdt_b + o_pad * out_b)
    scratch_bytes = rows * (4 * Hp + Hp) * 4          # f32 scratch
    total = 2 * (wbytes + io_bytes) + scratch_bytes   # double-buffered in/out/weights
    return int(min(max(total * 3 // 2 + (8 << 20), 32 << 20), 128 << 20))


# ----------------------------------------------------------------------------
# Wrapper
# ----------------------------------------------------------------------------
def lstm_model_forward(x, params, *, batch_blk=None):
    """x: (batch, seq, input_dim) f32 -> (batch, seq, output_dim) f32.

    Eval-mode forward only (inter-layer dropout is a training-time op).
    """
    B, S, D_in = x.shape
    Hp = params["hidden_pad"]
    L = params["num_layers"]
    O = params["output_dim"]
    O_pad = params["fc_w"].shape[1]
    cdt = params["compute_dtype"]
    out_dtype = cdt

    # Adaptive batch block: as many rows per recurrent step as VMEM sensibly
    # allows (NOTE for v7x: pick batch_blk ~ Bp/2 so nb >= 2 and both TCs work).
    if batch_blk is None:
        batch_blk = min(_round_up(max(B, 1), 8), 128)
    batch_blk = max(8, _round_up(batch_blk, 8))
    Bp = _round_up(max(B, 1), batch_blk)
    nb = Bp // batch_blk

    # Batch-pad, go time-major and flatten per block (in compute dtype):
    #   x_blocks[i, s*Bb + b, :] = x[i*Bb + b, s, :]
    xp = jnp.pad(x, ((0, Bp - B), (0, 0), (0, 0))).astype(cdt)
    x_blocks = (xp.reshape(nb, batch_blk, S, D_in)
                  .transpose(0, 2, 1, 3)
                  .reshape(nb, S * batch_blk, D_in))

    flat_w, w_specs = [], []
    for (wih, whh, b) in params["lstm_layers"]:
        flat_w += [wih, whh, b]
        w_specs += [pl.BlockSpec(wih.shape, lambda i: (0, 0)),
                    pl.BlockSpec(whh.shape, lambda i: (0, 0)),
                    pl.BlockSpec(b.shape, lambda i: (0, 0))]

    kernel = functools.partial(
        _fused_lstm_fc_kernel,
        num_layers=L, hidden_pad=Hp, seq_len=S, batch_blk=batch_blk,
        compute_dtype=cdt)

    vmem_limit = _vmem_limit_bytes(params, S, batch_blk, D_in, out_dtype)

    out = pl.pallas_call(
        kernel,
        out_shape=jax.ShapeDtypeStruct((nb, S * batch_blk, O_pad), out_dtype),
        grid_spec=pltpu.PrefetchScalarGridSpec(
            num_scalar_prefetch=0,
            grid=(nb,),
            in_specs=([pl.BlockSpec((None, S * batch_blk, D_in),
                                    lambda i: (i, 0, 0))]
                      + w_specs
                      + [pl.BlockSpec(params["fc_w"].shape, lambda i: (0, 0)),
                         pl.BlockSpec(params["fc_b"].shape, lambda i: (0, 0))]),
            out_specs=pl.BlockSpec((None, S * batch_blk, O_pad),
                                   lambda i: (i, 0, 0)),
            scratch_shapes=[
                pltpu.VMEM((S * batch_blk, 4 * Hp), jnp.float32),  # xw (+bias)
                pltpu.VMEM((S * batch_blk, Hp), jnp.float32),      # h sequence
            ],
        ),
        compiler_params=pltpu.CompilerParams(
            dimension_semantics=("parallel",),       # batch blocks independent
            vmem_limit_bytes=vmem_limit),
    )(x_blocks, *flat_w, params["fc_w"], params["fc_b"])

    y = (out.reshape(nb, S, batch_blk, O_pad)
            .transpose(0, 2, 1, 3)
            .reshape(Bp, S, O_pad))
    return y[:B, :, :O].astype(jnp.float32)


# ----------------------------------------------------------------------------
# Deterministic parameter init (PyTorch-style uniform(-k, k), gate order ifgo),
# gate-fused + lane-padded layout.
# ----------------------------------------------------------------------------
def init_params(key, input_dim, hidden_dim, layer_dim, output_dim,
                compute_dtype=jnp.bfloat16):
    k = 1.0 / float(hidden_dim) ** 0.5
    H = hidden_dim
    Hp = _round_up(H, 128)                  # lane-aligned gate blocks
    layers = []
    for l in range(layer_dim):
        d_in = input_dim if l == 0 else H
        d_in_pad = input_dim if l == 0 else Hp
        key, k1, k2, k3, k4 = jax.random.split(key, 5)
        w_ih = jax.random.uniform(k1, (4 * H, d_in), jnp.float32, -k, k)
        w_hh = jax.random.uniform(k2, (4 * H, H), jnp.float32, -k, k)
        b_ih = jax.random.uniform(k3, (4 * H,), jnp.float32, -k, k)
        b_hh = jax.random.uniform(k4, (4 * H,), jnp.float32, -k, k)
        # Fused (D, 4*Hp) / (Hp, 4*Hp) slabs, PyTorch gate stacking i|f|g|o.
        wih_f = jnp.zeros((d_in_pad, 4 * Hp), jnp.float32)
        whh_f = jnp.zeros((Hp, 4 * Hp), jnp.float32)
        b_f = jnp.zeros((1, 4 * Hp), jnp.float32)
        for g in range(4):
            wih_f = wih_f.at[:d_in, g * Hp:g * Hp + H].set(
                w_ih[g * H:(g + 1) * H, :].T)
            whh_f = whh_f.at[:H, g * Hp:g * Hp + H].set(
                w_hh[g * H:(g + 1) * H, :].T)
            b_f = b_f.at[0, g * Hp:g * Hp + H].set(
                b_ih[g * H:(g + 1) * H] + b_hh[g * H:(g + 1) * H])
        layers.append((wih_f.astype(compute_dtype),
                       whh_f.astype(compute_dtype),
                       b_f))                               # bias stays f32
    key, k5, k6 = jax.random.split(key, 3)
    fc_w = jax.random.uniform(k5, (output_dim, H), jnp.float32, -k, k)
    fc_b = jax.random.uniform(k6, (output_dim,), jnp.float32, -k, k)
    o_pad = _round_up(output_dim, 128)       # lane-dense FC output slab
    fc_w_p = jnp.zeros((Hp, o_pad), jnp.float32).at[:H, :output_dim].set(fc_w.T)
    fc_b_p = jnp.zeros((1, o_pad), jnp.float32).at[0, :output_dim].set(fc_b)
    return {
        "lstm_layers": layers,
        "fc_w": fc_w_p.astype(compute_dtype),
        "fc_b": fc_b_p,                      # f32, added post-accumulation
        "hidden_dim": H,
        "hidden_pad": Hp,
        "num_layers": layer_dim,
        "output_dim": output_dim,
        "compute_dtype": compute_dtype,
    }


# ----------------------------------------------------------------------------
# Pure-JAX f32 reference (same padded/fused weights), for a sanity check
# ----------------------------------------------------------------------------
def lstm_model_reference(x, params):
    B, S, _ = x.shape
    Hp = params["hidden_pad"]
    O = params["output_dim"]
    h_seq = x.astype(jnp.float32)
    for (wih, whh, b) in params["lstm_layers"]:
        wih = wih.astype(jnp.float32)
        whh = whh.astype(jnp.float32)
        b = b.astype(jnp.float32)
        h = jnp.zeros((B, Hp), jnp.float32)
        c = jnp.zeros((B, Hp), jnp.float32)
        hs = []
        for t in range(S):
            pre = h_seq[:, t, :] @ wih + h @ whh + b
            i_t = jax.nn.sigmoid(pre[:, 0 * Hp:1 * Hp])
            f_t = jax.nn.sigmoid(pre[:, 1 * Hp:2 * Hp])
            g_t = jnp.tanh(pre[:, 2 * Hp:3 * Hp])
            o_t = jax.nn.sigmoid(pre[:, 3 * Hp:4 * Hp])
            c = f_t * c + i_t * g_t
            h = o_t * jnp.tanh(c)
            hs.append(h)
        h_seq = jnp.stack(hs, axis=1)
    y = h_seq @ params["fc_w"].astype(jnp.float32) + params["fc_b"]
    return y[..., :O]


if __name__ == "__main__":
    # x: (batch, seq, input_dim) -> out: (batch, seq, output_dim)
    batch, seq, input_dim = 2, 8, 8
    hidden_dim, layer_dim, output_dim = 32, 2, 4

    key = jax.random.PRNGKey(0)
    key, xk = jax.random.split(key)
    x = jax.random.normal(xk, (batch, seq, input_dim), jnp.float32)

    params = init_params(key, input_dim, hidden_dim, layer_dim, output_dim)

    out = lstm_model_forward(x, params)
    jax.block_until_ready(out)
    assert out.shape == (batch, seq, output_dim)

    # Sanity check vs. pure-JAX reference (bf16 MXU inputs / bf16 output store,
    # f32 accumulation and f32 cell state inside the kernel).
    ref = lstm_model_reference(x, params)
    err = float(jnp.max(jnp.abs(out - ref)))
    assert err < 1e-1, f"max abs error vs reference = {err}"

    print("KERNEL_OK")
</pallas_src>

<mosaic_0001>
module attributes {stable_mosaic.version = 11 : i64} {
  func.func @_fused_lstm_fc_kernel(%arg0: i32, %arg1: memref<1x64x8xbf16, #tpu.memory_space<vmem>>, %arg2: memref<8x512xbf16, #tpu.memory_space<vmem>>, %arg3: memref<128x512xbf16, #tpu.memory_space<vmem>>, %arg4: memref<1x512xf32, #tpu.memory_space<vmem>>, %arg5: memref<128x512xbf16, #tpu.memory_space<vmem>>, %arg6: memref<128x512xbf16, #tpu.memory_space<vmem>>, %arg7: memref<1x512xf32, #tpu.memory_space<vmem>>, %arg8: memref<128x128xbf16, #tpu.memory_space<vmem>>, %arg9: memref<1x128xf32, #tpu.memory_space<vmem>>, %arg10: memref<1x64x128xbf16, #tpu.memory_space<vmem>>, %arg11: memref<64x512xf32, #tpu.memory_space<vmem>>, %arg12: memref<64x128xf32, #tpu.memory_space<vmem>>) attributes {dimension_semantics = [#tpu.dimension_semantics<parallel>], iteration_bounds = array<i64: 1>, scalar_prefetch = 0 : i64, scratch_operands = 2 : i64, tpu.core_type = #tpu.core_type<tc>, window_params = [{transform_indices = @transform_0, window_bounds = array<i64: 1, 64, 8>}, {pipeline_mode = #tpu.pipeline_mode<synchronous>, transform_indices = @transform_1, window_bounds = array<i64: 8, 512>}, {pipeline_mode = #tpu.pipeline_mode<synchronous>, transform_indices = @transform_2, window_bounds = array<i64: 128, 512>}, {pipeline_mode = #tpu.pipeline_mode<synchronous>, transform_indices = @transform_3, window_bounds = array<i64: 1, 512>}, {pipeline_mode = #tpu.pipeline_mode<synchronous>, transform_indices = @transform_4, window_bounds = array<i64: 128, 512>}, {pipeline_mode = #tpu.pipeline_mode<synchronous>, transform_indices = @transform_5, window_bounds = array<i64: 128, 512>}, {pipeline_mode = #tpu.pipeline_mode<synchronous>, transform_indices = @transform_6, window_bounds = array<i64: 1, 512>}, {pipeline_mode = #tpu.pipeline_mode<synchronous>, transform_indices = @transform_7, window_bounds = array<i64: 128, 128>}, {pipeline_mode = #tpu.pipeline_mode<synchronous>, transform_indices = @transform_8, window_bounds = array<i64: 1, 128>}, {transform_indices = @transform_9, window_bounds = array<i64: 1, 64, 128>}]} {
    %c0 = arith.constant 0 : index
    %c0_0 = arith.constant 0 : index
    %c0_1 = arith.constant 0 : index
    %0 = vector.load %arg1[%c0, %c0_0, %c0_1] : memref<1x64x8xbf16, #tpu.memory_space<vmem>>, vector<1x64x8xbf16>
    %1 = vector.shape_cast %0 : vector<1x64x8xbf16> to vector<64x8xbf16>
    %c0_2 = arith.constant 0 : index
    %c0_3 = arith.constant 0 : index
    %2 = vector.load %arg2[%c0_2, %c0_3] : memref<8x512xbf16, #tpu.memory_space<vmem>>, vector<8x512xbf16>
    %cst = arith.constant dense<0.000000e+00> : vector<64x512xf32>
    %3 = tpu.matmul %1, %2, %cst {dimension_numbers = #tpu.dot_dimension_numbers<[1], [0], [0], [1], [0, 0, 1, 1], [], []>} : vector<64x8xbf16>, vector<8x512xbf16>, vector<64x512xf32> -> vector<64x512xf32>
    %c0_4 = arith.constant 0 : index
    %c0_5 = arith.constant 0 : index
    %4 = vector.load %arg4[%c0_4, %c0_5] : memref<1x512xf32, #tpu.memory_space<vmem>>, vector<1x512xf32>
    %5 = vector.broadcast %4 : vector<1x512xf32> to vector<64x512xf32>
    %6 = arith.addf %3, %5 : vector<64x512xf32>
    %c0_6 = arith.constant 0 : index
    %c0_7 = arith.constant 0 : index
    %7 = vector.load %arg11[%c0_6, %c0_7] : memref<64x512xf32, #tpu.memory_space<vmem>>, vector<64x512xf32>
    tpu.vector_store %arg11[%c0_6, %c0_7], %6 {strides = array<i32>} : memref<64x512xf32, #tpu.memory_space<vmem>>, vector<64x512xf32>,
    %cst_8 = arith.constant 0.000000e+00 : f32
    %8 = vector.broadcast %cst_8 : f32 to vector<8x128xf32>
    %cst_9 = arith.constant 0.000000e+00 : f32
    %9 = vector.broadcast %cst_9 : f32 to vector<8x128xf32>
    %c0_10 = arith.constant 0 : index
    %c0_11 = arith.constant 0 : index
    %10 = vector.load %arg11[%c0_10, %c0_11] : memref<64x512xf32, #tpu.memory_space<vmem>>, vector<8x512xf32>
    %11 = arith.truncf %8 : vector<8x128xf32> to vector<8x128xbf16>
    %c0_12 = arith.constant 0 : index
    %c0_13 = arith.constant 0 : index
    %12 = vector.load %arg3[%c0_12, %c0_13] : memref<128x512xbf16, #tpu.memory_space<vmem>>, vector<128x512xbf16>
    %cst_14 = arith.constant dense<0.000000e+00> : vector<8x512xf32>
    %13 = tpu.matmul %11, %12, %cst_14 {dimension_numbers = #tpu.dot_dimension_numbers<[1], [0], [0], [1], [0, 0, 1, 1], [], []>} : vector<8x128xbf16>, vector<128x512xbf16>, vector<8x512xf32> -> vector<8x512xf32>
    %14 = arith.addf %10, %13 : vector<8x512xf32>
    %15 = vector.extract_strided_slice %14 {offsets = [0, 0], sizes = [8, 128], strides = [1, 1]} : vector<8x512xf32> to vector<8x128xf32>
    %16 = arith.negf %15 : vector<8x128xf32>
    %17 = math.exp %16 : vector<8x128xf32>
    %cst_15 = arith.constant 1.000000e+00 : f32
    %18 = vector.broadcast %cst_15 : f32 to vector<8x128xf32>
    %19 = arith.addf %18, %17 : vector<8x128xf32>
    %20 = arith.divf %18, %19 : vector<8x128xf32>
    %21 = vector.extract_strided_slice %14 {offsets = [0, 128], sizes = [8, 128], strides = [1, 1]} : vector<8x512xf32> to vector<8x128xf32>
    %22 = arith.negf %21 : vector<8x128xf32>
    %23 = math.exp %22 : vector<8x128xf32>
    %cst_16 = arith.constant 1.000000e+00 : f32
    %24 = vector.broadcast %cst_16 : f32 to vector<8x128xf32>
    %25 = arith.addf %24, %23 : vector<8x128xf32>
    %26 = arith.divf %24, %25 : vector<8x128xf32>
    %27 = vector.extract_strided_slice %14 {offsets = [0, 256], sizes = [8, 128], strides = [1, 1]} : vector<8x512xf32> to vector<8x128xf32>
    %28 = math.tanh %27 : vector<8x128xf32>
    %29 = vector.extract_strided_slice %14 {offsets = [0, 384], sizes = [8, 128], strides = [1, 1]} : vector<8x512xf32> to vector<8x128xf32>
    %30 = arith.negf %29 : vector<8x128xf32>
    %31 = math.exp %30 : vector<8x128xf32>
    %cst_17 = arith.constant 1.000000e+00 : f32
    %32 = vector.broadcast %cst_17 : f32 to vector<8x128xf32>
    %33 = arith.addf %32, %31 : vector<8x128xf32>
    %34 = arith.divf %32, %33 : vector<8x128xf32>
    %35 = arith.mulf %26, %9 : vector<8x128xf32>
    %36 = arith.mulf %20, %28 : vector<8x128xf32>
    %37 = arith.addf %35, %36 : vector<8x128xf32>
    %38 = math.tanh %37 : vector<8x128xf32>
    %39 = arith.mulf %34, %38 : vector<8x128xf32>
    %c0_18 = arith.constant 0 : index
    %c0_19 = arith.constant 0 : index
    %40 = vector.load %arg12[%c0_18, %c0_19] : memref<64x128xf32, #tpu.memory_space<vmem>>, vector<8x128xf32>
    tpu.vector_store %arg12[%c0_18, %c0_19], %39 {strides = array<i32>} : memref<64x128xf32, #tpu.memory_space<vmem>>, vector<8x128xf32>,
    %c8 = arith.constant 8 : index
    %c0_20 = arith.constant 0 : index
    %41 = vector.load %arg11[%c8, %c0_20] : memref<64x512xf32, #tpu.memory_space<vmem>>, vector<8x512xf32>
    %42 = arith.truncf %39 : vector<8x128xf32> to vector<8x128xbf16>
    %c0_21 = arith.constant 0 : index
    %c0_22 = arith.constant 0 : index
    %43 = vector.load %arg3[%c0_21, %c0_22] : memref<128x512xbf16, #tpu.memory_space<vmem>>, vector<128x512xbf16>
    %cst_23 = arith.constant dense<0.000000e+00> : vector<8x512xf32>
    %44 = tpu.matmul %42, %43, %cst_23 {dimension_numbers = #tpu.dot_dimension_numbers<[1], [0], [0], [1], [0, 0, 1, 1], [], []>} : vector<8x128xbf16>, vector<128x512xbf16>, vector<8x512xf32> -> vector<8x512xf32>
    %45 = arith.addf %41, %44 : vector<8x512xf32>
    %46 = vector.extract_strided_slice %45 {offsets = [0, 0], sizes = [8, 128], strides = [1, 1]} : vector<8x512xf32> to vector<8x128xf32>
    %47 = arith.negf %46 : vector<8x128xf32>
    %48 = math.exp %47 : vector<8x128xf32>
    %cst_24 = arith.constant 1.000000e+00 : f32
    %49 = vector.broadcast %cst_24 : f32 to vector<8x128xf32>
    %50 = arith.addf %49, %48 : vector<8x128xf32>
    %51 = arith.divf %49, %50 : vector<8x128xf32>
    %52 = vector.extract_strided_slice %45 {offsets = [0, 128], sizes = [8, 128], strides = [1, 1]} : vector<8x512xf32> to vector<8x128xf32>
    %53 = arith.negf %52 : vector<8x128xf32>
    %54 = math.exp %53 : vector<8x128xf32>
    %cst_25 = arith.constant 1.000000e+00 : f32
    %55 = vector.broadcast %cst_25 : f32 to vector<8x128xf32>
    %56 = arith.addf %55, %54 : vector<8x128xf32>
    %57 = arith.divf %55, %56 : vector<8x128xf32>
    %58 = vector.extract_strided_slice %45 {offsets = [0, 256], sizes = [8, 128], strides = [1, 1]} : vector<8x512xf32> to vector<8x128xf32>
    %59 = math.tanh %58 : vector<8x128xf32>
    %60 = vector.extract_strided_slice %45 {offsets = [0, 384], sizes = [8, 128], strides = [1, 1]} : vector<8x512xf32> to vector<8x128xf32>
    %61 = arith.negf %60 : vector<8x128xf32>
    %62 = math.exp %61 : vector<8x128xf32>
    %cst_26 = arith.constant 1.000000e+00 : f32
    %63 = vector.broadcast %cst_26 : f32 to vector<8x128xf32>
    %64 = arith.addf %63, %62 : vector<8x128xf32>
    %65 = arith.divf %63, %64 : vector<8x128xf32>
    %66 = arith.mulf %57, %37 : vector<8x128xf32>
    %67 = arith.mulf %51, %59 : vector<8x128xf32>
    %68 = arith.addf %66, %67 : vector<8x128xf32>
    %69 = math.tanh %68 : vector<8x128xf32>
    %70 = arith.mulf %65, %69 : vector<8x128xf32>
    %c8_27 = arith.constant 8 : index
    %c0_28 = arith.constant 0 : index
    %71 = vector.load %arg12[%c8_27, %c0_28] : memref<64x128xf32, #tpu.memory_space<vmem>>, vector<8x128xf32>
    tpu.vector_store %arg12[%c8_27, %c0_28], %70 {strides = array<i32>} : memref<64x128xf32, #tpu.memory_space<vmem>>, vector<8x128xf32>,
    %c16 = arith.constant 16 : index
    %c0_29 = arith.constant 0 : index
    %72 = vector.load %arg11[%c16, %c0_29] : memref<64x512xf32, #tpu.memory_space<vmem>>, vector<8x512xf32>
    %73 = arith.truncf %70 : vector<8x128xf32> to vector<8x128xbf16>
    %c0_30 = arith.constant 0 : index
    %c0_31 = arith.constant 0 : index
    %74 = vector.load %arg3[%c0_30, %c0_31] : memref<128x512xbf16, #tpu.memory_space<vmem>>, vector<128x512xbf16>
    %cst_32 = arith.constant dense<0.000000e+00> : vector<8x512xf32>
    %75 = tpu.matmul %73, %74, %cst_32 {dimension_numbers = #tpu.dot_dimension_numbers<[1], [0], [0], [1], [0, 0, 1, 1], [], []>} : vector<8x128xbf16>, vector<128x512xbf16>, vector<8x512xf32> -> vector<8x512xf32>
    %76 = arith.addf %72, %75 : vector<8x512xf32>
    %77 = vector.extract_strided_slice %76 {offsets = [0, 0], sizes = [8, 128], strides = [1, 1]} : vector<8x512xf32> to vector<8x128xf32>
    %78 = arith.negf %77 : vector<8x128xf32>
    %79 = math.exp %78 : vector<8x128xf32>
    %cst_33 = arith.constant 1.000000e+00 : f32
    %80 = vector.broadcast %cst_33 : f32 to vector<8x128xf32>
    %81 = arith.addf %80, %79 : vector<8x128xf32>
    %82 = arith.divf %80, %81 : vector<8x128xf32>
    %83 = vector.extract_strided_slice %76 {offsets = [0, 128], sizes = [8, 128], strides = [1, 1]} : vector<8x512xf32> to vector<8x128xf32>
    %84 = arith.negf %83 : vector<8x128xf32>
    %85 = math.exp %84 : vector<8x128xf32>
    %cst_34 = arith.constant 1.000000e+00 : f32
    %86 = vector.broadcast %cst_34 : f32 to vector<8x128xf32>
    %87 = arith.addf %86, %85 : vector<8x128xf32>
    %88 = arith.divf %86, %87 : vector<8x128xf32>
    %89 = vector.extract_strided_slice %76 {offsets = [0, 256], sizes = [8, 128], strides = [1, 1]} : vector<8x512xf32> to vector<8x128xf32>
    %90 = math.tanh %89 : vector<8x128xf32>
    %91 = vector.extract_strided_slice %76 {offsets = [0, 384], sizes = [8, 128], strides = [1, 1]} : vector<8x512xf32> to vector<8x128xf32>
    %92 = arith.negf %91 : vector<8x128xf32>
    %93 = math.exp %92 : vector<8x128xf32>
    %cst_35 = arith.constant 1.000000e+00 : f32
    %94 = vector.broadcast %cst_35 : f32 to vector<8x128xf32>
    %95 = arith.addf %94, %93 : vector<8x128xf32>
    %96 = arith.divf %94, %95 : vector<8x128xf32>
    %97 = arith.mulf %88, %68 : vector<8x128xf32>
    %98 = arith.mulf %82, %90 : vector<8x128xf32>
    %99 = arith.addf %97, %98 : vector<8x128xf32>
    %100 = math.tanh %99 : vector<8x128xf32>
    %101 = arith.mulf %96, %100 : vector<8x128xf32>
    %c16_36 = arith.constant 16 : index
    %c0_37 = arith.constant 0 : index
    %102 = vector.load %arg12[%c16_36, %c0_37] : memref<64x128xf32, #tpu.memory_space<vmem>>, vector<8x128xf32>
    tpu.vector_store %arg12[%c16_36, %c0_37], %101 {strides = array<i32>} : memref<64x128xf32, #tpu.memory_space<vmem>>, vector<8x128xf32>,
    %c24 = arith.constant 24 : index
    %c0_38 = arith.constant 0 : index
    %103 = vector.load %arg11[%c24, %c0_38] : memref<64x512xf32, #tpu.memory_space<vmem>>, vector<8x512xf32>
    %104 = arith.truncf %101 : vector<8x128xf32> to vector<8x128xbf16>
    %c0_39 = arith.constant 0 : index
    %c0_40 = arith.constant 0 : index
    %105 = vector.load %arg3[%c0_39, %c0_40] : memref<128x512xbf16, #tpu.memory_space<vmem>>, vector<128x512xbf16>
    %cst_41 = arith.constant dense<0.000000e+00> : vector<8x512xf32>
    %106 = tpu.matmul %104, %105, %cst_41 {dimension_numbers = #tpu.dot_dimension_numbers<[1], [0], [0], [1], [0, 0, 1, 1], [], []>} : vector<8x128xbf16>, vector<128x512xbf16>, vector<8x512xf32> -> vector<8x512xf32>
    %107 = arith.addf %103, %106 : vector<8x512xf32>
    %108 = vector.extract_strided_slice %107 {offsets = [0, 0], sizes = [8, 128], strides = [1, 1]} : vector<8x512xf32> to vector<8x128xf32>
    %109 = arith.negf %108 : vector<8x128xf32>
    %110 = math.exp %109 : vector<8x128xf32>
    %cst_42 = arith.constant 1.000000e+00 : f32
    %111 = vector.broadcast %cst_42 : f32 to vector<8x128xf32>
    %112 = arith.addf %111, %110 : vector<8x128xf32>
    %113 = arith.divf %111, %112 : vector<8x128xf32>
    %114 = vector.extract_strided_slice %107 {offsets = [0, 128], sizes = [8, 128], strides = [1, 1]} : vector<8x512xf32> to vector<8x128xf32>
    %115 = arith.negf %114 : vector<8x128xf32>
    %116 = math.exp %115 : vector<8x128xf32>
    %cst_43 = arith.constant 1.000000e+00 : f32
    %117 = vector.broadcast %cst_43 : f32 to vector<8x128xf32>
    %118 = arith.addf %117, %116 : vector<8x128xf32>
    %119 = arith.divf %117, %118 : vector<8x128xf32>
    %120 = vector.extract_strided_slice %107 {offsets = [0, 256], sizes = [8, 128], strides = [1, 1]} : vector<8x512xf32> to vector<8x128xf32>
    %121 = math.tanh %120 : vector<8x128xf32>
    %122 = vector.extract_strided_slice %107 {offsets = [0, 384], sizes = [8, 128], strides = [1, 1]} : vector<8x512xf32> to vector<8x128xf32>
    %123 = arith.negf %122 : vector<8x128xf32>
    %124 = math.exp %123 : vector<8x128xf32>
    %cst_44 = arith.constant 1.000000e+00 : f32
    %125 = vector.broadcast %cst_44 : f32 to vector<8x128xf32>
    %126 = arith.addf %125, %124 : vector<8x128xf32>
    %127 = arith.divf %125, %126 : vector<8x128xf32>
    %128 = arith.mulf %119, %99 : vector<8x128xf32>
    %129 = arith.mulf %113, %121 : vector<8x128xf32>
    %130 = arith.addf %128, %129 : vector<8x128xf32>
    %131 = math.tanh %130 : vector<8x128xf32>
    %132 = arith.mulf %127, %131 : vector<8x128xf32>
    %c24_45 = arith.constant 24 : index
    %c0_46 = arith.constant 0 : index
    %133 = vector.load %arg12[%c24_45, %c0_46] : memref<64x128xf32, #tpu.memory_space<vmem>>, vector<8x128xf32>
    tpu.vector_store %arg12[%c24_45, %c0_46], %132 {strides = array<i32>} : memref<64x128xf32, #tpu.memory_space<vmem>>, vector<8x128xf32>,
    %c32 = arith.constant 32 : index
    %c0_47 = arith.constant 0 : index
    %134 = vector.load %arg11[%c32, %c0_47] : memref<64x512xf32, #tpu.memory_space<vmem>>, vector<8x512xf32>
    %135 = arith.truncf %132 : vector<8x128xf32> to vector<8x128xbf16>
    %c0_48 = arith.constant 0 : index
    %c0_49 = arith.constant 0 : index
    %136 = vector.load %arg3[%c0_48, %c0_49] : memref<128x512xbf16, #tpu.memory_space<vmem>>, vector<128x512xbf16>
    %cst_50 = arith.constant dense<0.000000e+00> : vector<8x512xf32>
    %137 = tpu.matmul %135, %136, %cst_50 {dimension_numbers = #tpu.dot_dimension_numbers<[1], [0], [0], [1], [0, 0, 1, 1], [], []>} : vector<8x128xbf16>, vector<128x512xbf16>, vector<8x512xf32> -> vector<8x512xf32>
    %138 = arith.addf %134, %137 : vector<8x512xf32>
    %139 = vector.extract_strided_slice %138 {offsets = [0, 0], sizes = [8, 128], strides = [1, 1]} : vector<8x512xf32> to vector<8x128xf32>
    %140 = arith.negf %139 : vector<8x128xf32>
    %141 = math.exp %140 : vector<8x128xf32>
    %cst_51 = arith.constant 1.000000e+00 : f32
    %142 = vector.broadcast %cst_51 : f32 to vector<8x128xf32>
    %143 = arith.addf %142, %141 : vector<8x128xf32>
    %144 = arith.divf %142, %143 : vector<8x128xf32>
    %145 = vector.extract_strided_slice %138 {offsets = [0, 128], sizes = [8, 128], strides = [1, 1]} : vector<8x512xf32> to vector<8x128xf32>
    %146 = arith.negf %145 : vector<8x128xf32>
    %147 = math.exp %146 : vector<8x128xf32>
    %cst_52 = arith.constant 1.000000e+00 : f32
    %148 = vector.broadcast %cst_52 : f32 to vector<8x128xf32>
    %149 = arith.addf %148, %147 : vector<8x128xf32>
    %150 = arith.divf %148, %149 : vector<8x128xf32>
    %151 = vector.extract_strided_slice %138 {offsets = [0, 256], sizes = [8, 128], strides = [1, 1]} : vector<8x512xf32> to vector<8x128xf32>
    %152 = math.tanh %151 : vector<8x128xf32>
    %153 = vector.extract_strided_slice %138 {offsets = [0, 384], sizes = [8, 128], strides = [1, 1]} : vector<8x512xf32> to vector<8x128xf32>
    %154 = arith.negf %153 : vector<8x128xf32>
    %155 = math.exp %154 : vector<8x128xf32>
    %cst_53 = arith.constant 1.000000e+00 : f32
    %156 = vector.broadcast %cst_53 : f32 to vector<8x128xf32>
    %157 = arith.addf %156, %155 : vector<8x128xf32>
    %158 = arith.divf %156, %157 : vector<8x128xf32>
    %159 = arith.mulf %150, %130 : vector<8x128xf32>
    %160 = arith.mulf %144, %152 : vector<8x128xf32>
    %161 = arith.addf %159, %160 : vector<8x128xf32>
    %162 = math.tanh %161 : vector<8x128xf32>
    %163 = arith.mulf %158, %162 : vector<8x128xf32>
    %c32_54 = arith.constant 32 : index
    %c0_55 = arith.constant 0 : index
    %164 = vector.load %arg12[%c32_54, %c0_55] : memref<64x128xf32, #tpu.memory_space<vmem>>, vector<8x128xf32>
    tpu.vector_store %arg12[%c32_54, %c0_55], %163 {strides = array<i32>} : memref<64x128xf32, #tpu.memory_space<vmem>>, vector<8x128xf32>,
    %c40 = arith.constant 40 : index
    %c0_56 = arith.constant 0 : index
    %165 = vector.load %arg11[%c40, %c0_56] : memref<64x512xf32, #tpu.memory_space<vmem>>, vector<8x512xf32>
    %166 = arith.truncf %163 : vector<8x128xf32> to vector<8x128xbf16>
    %c0_57 = arith.constant 0 : index
    %c0_58 = arith.constant 0 : index
    %167 = vector.load %arg3[%c0_57, %c0_58] : memref<128x512xbf16, #tpu.memory_space<vmem>>, vector<128x512xbf16>
    %cst_59 = arith.constant dense<0.000000e+00> : vector<8x512xf32>
    %168 = tpu.matmul %166, %167, %cst_59 {dimension_numbers = #tpu.dot_dimension_numbers<[1], [0], [0], [1], [0, 0, 1, 1], [], []>} : vector<8x128xbf16>, vector<128x512xbf16>, vector<8x512xf32> -> vector<8x512xf32>
    %169 = arith.addf %165, %168 : vector<8x512xf32>
    %170 = vector.extract_strided_slice %169 {offsets = [0, 0], sizes = [8, 128], strides = [1, 1]} : vector<8x512xf32> to vector<8x128xf32>
    %171 = arith.negf %170 : vector<8x128xf32>
    %172 = math.exp %171 : vector<8x128xf32>
    %cst_60 = arith.constant 1.000000e+00 : f32
    %173 = vector.broadcast %cst_60 : f32 to vector<8x128xf32>
    %174 = arith.addf %173, %172 : vector<8x128xf32>
    %175 = arith.divf %173, %174 : vector<8x128xf32>
    %176 = vector.extract_strided_slice %169 {offsets = [0, 128], sizes = [8, 128], strides = [1, 1]} : vector<8x512xf32> to vector<8x128xf32>
    %177 = arith.negf %176 : vector<8x128xf32>
    %178 = math.exp %177 : vector<8x128xf32>
    %cst_61 = arith.constant 1.000000e+00 : f32
    %179 = vector.broadcast %cst_61 : f32 to vector<8x128xf32>
    %180 = arith.addf %179, %178 : vector<8x128xf32>
    %181 = arith.divf %179, %180 : vector<8x128xf32>
    %182 = vector.extract_strided_slice %169 {offsets = [0, 256], sizes = [8, 128], strides = [1, 1]} : vector<8x512xf32> to vector<8x128xf32>
    %183 = math.tanh %182 : vector<8x128xf32>
    %184 = vector.extract_strided_slice %169 {offsets = [0, 384], sizes = [8, 128], strides = [1, 1]} : vector<8x512xf32> to vector<8x128xf32>
    %185 = arith.negf %184 : vector<8x128xf32>
    %186 = math.exp %185 : vector<8x128xf32>
    %cst_62 = arith.constant 1.000000e+00 : f32
    %187 = vector.broadcast %cst_62 : f32 to vector<8x128xf32>
    %188 = arith.addf %187, %186 : vector<8x128xf32>
    %189 = arith.divf %187, %188 : vector<8x128xf32>
    %190 = arith.mulf %181, %161 : vector<8x128xf32>
    %191 = arith.mulf %175, %183 : vector<8x128xf32>
    %192 = arith.addf %190, %191 : vector<8x128xf32>
    %193 = math.tanh %192 : vector<8x128xf32>
    %194 = arith.mulf %189, %193 : vector<8x128xf32>
    %c40_63 = arith.constant 40 : index
    %c0_64 = arith.constant 0 : index
    %195 = vector.load %arg12[%c40_63, %c0_64] : memref<64x128xf32, #tpu.memory_space<vmem>>, vector<8x128xf32>
    tpu.vector_store %arg12[%c40_63, %c0_64], %194 {strides = array<i32>} : memref<64x128xf32, #tpu.memory_space<vmem>>, vector<8x128xf32>,
    %c48 = arith.constant 48 : index
    %c0_65 = arith.constant 0 : index
    %196 = vector.load %arg11[%c48, %c0_65] : memref<64x512xf32, #tpu.memory_space<vmem>>, vector<8x512xf32>
    %197 = arith.truncf %194 : vector<8x128xf32> to vector<8x128xbf16>
    %c0_66 = arith.constant 0 : index
    %c0_67 = arith.constant 0 : index
    %198 = vector.load %arg3[%c0_66, %c0_67] : memref<128x512xbf16, #tpu.memory_space<vmem>>, vector<128x512xbf16>
    %cst_68 = arith.constant dense<0.000000e+00> : vector<8x512xf32>
    %199 = tpu.matmul %197, %198, %cst_68 {dimension_numbers = #tpu.dot_dimension_numbers<[1], [0], [0], [1], [0, 0, 1, 1], [], []>} : vector<8x128xbf16>, vector<128x512xbf16>, vector<8x512xf32> -> vector<8x512xf32>
    %200 = arith.addf %196, %199 : vector<8x512xf32>
    %201 = vector.extract_strided_slice %200 {offsets = [0, 0], sizes = [8, 128], strides = [1, 1]} : vector<8x512xf32> to vector<8x128xf32>
    %202 = arith.negf %201 : vector<8x128xf32>
    %203 = math.exp %202 : vector<8x128xf32>
    %cst_69 = arith.constant 1.000000e+00 : f32
    %204 = vector.broadcast %cst_69 : f32 to vector<8x128xf32>
    %205 = arith.addf %204, %203 : vector<8x128xf32>
    %206 = arith.divf %204, %205 : vector<8x128xf32>
    %207 = vector.extract_strided_slice %200 {offsets = [0, 128], sizes = [8, 128], strides = [1, 1]} : vector<8x512xf32> to vector<8x128xf32>
    %208 = arith.negf %207 : vector<8x128xf32>
    %209 = math.exp %208 : vector<8x128xf32>
    %cst_70 = arith.constant 1.000000e+00 : f32
    %210 = vector.broadcast %cst_70 : f32 to vector<8x128xf32>
    %211 = arith.addf %210, %209 : vector<8x128xf32>
    %212 = arith.divf %210, %211 : vector<8x128xf32>
    %213 = vector.extract_strided_slice %200 {offsets = [0, 256], sizes = [8, 128], strides = [1, 1]} : vector<8x512xf32> to vector<8x128xf32>
    %214 = math.tanh %213 : vector<8x128xf32>
    %215 = vector.extract_strided_slice %200 {offsets = [0, 384], sizes = [8, 128], strides = [1, 1]} : vector<8x512xf32> to vector<8x128xf32>
    %216 = arith.negf %215 : vector<8x128xf32>
    %217 = math.exp %216 : vector<8x128xf32>
    %cst_71 = arith.constant 1.000000e+00 : f32
    %218 = vector.broadcast %cst_71 : f32 to vector<8x128xf32>
    %219 = arith.addf %218, %217 : vector<8x128xf32>
    %220 = arith.divf %218, %219 : vector<8x128xf32>
    %221 = arith.mulf %212, %192 : vector<8x128xf32>
    %222 = arith.mulf %206, %214 : vector<8x128xf32>
    %223 = arith.addf %221, %222 : vector<8x128xf32>
    %224 = math.tanh %223 : vector<8x128xf32>
    %225 = arith.mulf %220, %224 : vector<8x128xf32>
    %c48_72 = arith.constant 48 : index
    %c0_73 = arith.constant 0 : index
    %226 = vector.load %arg12[%c48_72, %c0_73] : memref<64x128xf32, #tpu.memory_space<vmem>>, vector<8x128xf32>
    tpu.vector_store %arg12[%c48_72, %c0_73], %225 {strides = array<i32>} : memref<64x128xf32, #tpu.memory_space<vmem>>, vector<8x128xf32>,
    %c56 = arith.constant 56 : index
    %c0_74 = arith.constant 0 : index
    %227 = vector.load %arg11[%c56, %c0_74] : memref<64x512xf32, #tpu.memory_space<vmem>>, vector<8x512xf32>
    %228 = arith.truncf %225 : vector<8x128xf32> to vector<8x128xbf16>
    %c0_75 = arith.constant 0 : index
    %c0_76 = arith.constant 0 : index
    %229 = vector.load %arg3[%c0_75, %c0_76] : memref<128x512xbf16, #tpu.memory_space<vmem>>, vector<128x512xbf16>
    %cst_77 = arith.constant dense<0.000000e+00> : vector<8x512xf32>
    %230 = tpu.matmul %228, %229, %cst_77 {dimension_numbers = #tpu.dot_dimension_numbers<[1], [0], [0], [1], [0, 0, 1, 1], [], []>} : vector<8x128xbf16>, vector<128x512xbf16>, vector<8x512xf32> -> vector<8x512xf32>
    %231 = arith.addf %227, %230 : vector<8x512xf32>
    %232 = vector.extract_strided_slice %231 {offsets = [0, 0], sizes = [8, 128], strides = [1, 1]} : vector<8x512xf32> to vector<8x128xf32>
    %233 = arith.negf %232 : vector<8x128xf32>
    %234 = math.exp %233 : vector<8x128xf32>
    %cst_78 = arith.constant 1.000000e+00 : f32
    %235 = vector.broadcast %cst_78 : f32 to vector<8x128xf32>
    %236 = arith.addf %235, %234 : vector<8x128xf32>
    %237 = arith.divf %235, %236 : vector<8x128xf32>
    %238 = vector.extract_strided_slice %231 {offsets = [0, 128], sizes = [8, 128], strides = [1, 1]} : vector<8x512xf32> to vector<8x128xf32>
    %239 = arith.negf %238 : vector<8x128xf32>
    %240 = math.exp %239 : vector<8x128xf32>
    %cst_79 = arith.constant 1.000000e+00 : f32
    %241 = vector.broadcast %cst_79 : f32 to vector<8x128xf32>
    %242 = arith.addf %241, %240 : vector<8x128xf32>
    %243 = arith.divf %241, %242 : vector<8x128xf32>
    %244 = vector.extract_strided_slice %231 {offsets = [0, 256], sizes = [8, 128], strides = [1, 1]} : vector<8x512xf32> to vector<8x128xf32>
    %245 = math.tanh %244 : vector<8x128xf32>
    %246 = vector.extract_strided_slice %231 {offsets = [0, 384], sizes = [8, 128], strides = [1, 1]} : vector<8x512xf32> to vector<8x128xf32>
    %247 = arith.negf %246 : vector<8x128xf32>
    %248 = math.exp %247 : vector<8x128xf32>
    %cst_80 = arith.constant 1.000000e+00 : f32
    %249 = vector.broadcast %cst_80 : f32 to vector<8x128xf32>
    %250 = arith.addf %249, %248 : vector<8x128xf32>
    %251 = arith.divf %249, %250 : vector<8x128xf32>
    %252 = arith.mulf %243, %223 : vector<8x128xf32>
    %253 = arith.mulf %237, %245 : vector<8x128xf32>
    %254 = arith.addf %252, %253 : vector<8x128xf32>
    %255 = math.tanh %254 : vector<8x128xf32>
    %256 = arith.mulf %251, %255 : vector<8x128xf32>
    %c56_81 = arith.constant 56 : index
    %c0_82 = arith.constant 0 : index
    %257 = vector.load %arg12[%c56_81, %c0_82] : memref<64x128xf32, #tpu.memory_space<vmem>>, vector<8x128xf32>
    tpu.vector_store %arg12[%c56_81, %c0_82], %256 {strides = array<i32>} : memref<64x128xf32, #tpu.memory_space<vmem>>, vector<8x128xf32>,
    %c0_83 = arith.constant 0 : index
    %c0_84 = arith.constant 0 : index
    %258 = vector.load %arg12[%c0_83, %c0_84] : memref<64x128xf32, #tpu.memory_space<vmem>>, vector<64x128xf32>
    %259 = arith.truncf %258 : vector<64x128xf32> to vector<64x128xbf16>
    %c0_85 = arith.constant 0 : index
    %c0_86 = arith.constant 0 : index
    %260 = vector.load %arg5[%c0_85, %c0_86] : memref<128x512xbf16, #tpu.memory_space<vmem>>, vector<128x512xbf16>
    %cst_87 = arith.constant dense<0.000000e+00> : vector<64x512xf32>
    %261 = tpu.matmul %259, %260, %cst_87 {dimension_numbers = #tpu.dot_dimension_numbers<[1], [0], [0], [1], [0, 0, 1, 1], [], []>} : vector<64x128xbf16>, vector<128x512xbf16>, vector<64x512xf32> -> vector<64x512xf32>
    %c0_88 = arith.constant 0 : index
    %c0_89 = arith.constant 0 : index
    %262 = vector.load %arg7[%c0_88, %c0_89] : memref<1x512xf32, #tpu.memory_space<vmem>>, vector<1x512xf32>
    %263 = vector.broadcast %262 : vector<1x512xf32> to vector<64x512xf32>
    %264 = arith.addf %261, %263 : vector<64x512xf32>
    %c0_90 = arith.constant 0 : index
    %c0_91 = arith.constant 0 : index
    %265 = vector.load %arg11[%c0_90, %c0_91] : memref<64x512xf32, #tpu.memory_space<vmem>>, vector<64x512xf32>
    tpu.vector_store %arg11[%c0_90, %c0_91], %264 {strides = array<i32>} : memref<64x512xf32, #tpu.memory_space<vmem>>, vector<64x512xf32>,
    %cst_92 = arith.constant 0.000000e+00 : f32
    %266 = vector.broadcast %cst_92 : f32 to vector<8x128xf32>
    %cst_93 = arith.constant 0.000000e+00 : f32
    %267 = vector.broadcast %cst_93 : f32 to vector<8x128xf32>
    %c0_94 = arith.constant 0 : index
    %c0_95 = arith.constant 0 : index
    %268 = vector.load %arg11[%c0_94, %c0_95] : memref<64x512xf32, #tpu.memory_space<vmem>>, vector<8x512xf32>
    %269 = arith.truncf %266 : vector<8x128xf32> to vector<8x128xbf16>
    %c0_96 = arith.constant 0 : index
    %c0_97 = arith.constant 0 : index
    %270 = vector.load %arg6[%c0_96, %c0_97] : memref<128x512xbf16, #tpu.memory_space<vmem>>, vector<128x512xbf16>
    %cst_98 = arith.constant dense<0.000000e+00> : vector<8x512xf32>
    %271 = tpu.matmul %269, %270, %cst_98 {dimension_numbers = #tpu.dot_dimension_numbers<[1], [0], [0], [1], [0, 0, 1, 1], [], []>} : vector<8x128xbf16>, vector<128x512xbf16>, vector<8x512xf32> -> vector<8x512xf32>
    %272 = arith.addf %268, %271 : vector<8x512xf32>
    %273 = vector.extract_strided_slice %272 {offsets = [0, 0], sizes = [8, 128], strides = [1, 1]} : vector<8x512xf32> to vector<8x128xf32>
    %274 = arith.negf %273 : vector<8x128xf32>
    %275 = math.exp %274 : vector<8x128xf32>
    %cst_99 = arith.constant 1.000000e+00 : f32
    %276 = vector.broadcast %cst_99 : f32 to vector<8x128xf32>
    %277 = arith.addf %276, %275 : vector<8x128xf32>
    %278 = arith.divf %276, %277 : vector<8x128xf32>
    %279 = vector.extract_strided_slice %272 {offsets = [0, 128], sizes = [8, 128], strides = [1, 1]} : vector<8x512xf32> to vector<8x128xf32>
    %280 = arith.negf %279 : vector<8x128xf32>
    %281 = math.exp %280 : vector<8x128xf32>
    %cst_100 = arith.constant 1.000000e+00 : f32
    %282 = vector.broadcast %cst_100 : f32 to vector<8x128xf32>
    %283 = arith.addf %282, %281 : vector<8x128xf32>
    %284 = arith.divf %282, %283 : vector<8x128xf32>
    %285 = vector.extract_strided_slice %272 {offsets = [0, 256], sizes = [8, 128], strides = [1, 1]} : vector<8x512xf32> to vector<8x128xf32>
    %286 = math.tanh %285 : vector<8x128xf32>
    %287 = vector.extract_strided_slice %272 {offsets = [0, 384], sizes = [8, 128], strides = [1, 1]} : vector<8x512xf32> to vector<8x128xf32>
    %288 = arith.negf %287 : vector<8x128xf32>
    %289 = math.exp %288 : vector<8x128xf32>
    %cst_101 = arith.constant 1.000000e+00 : f32
    %290 = vector.broadcast %cst_101 : f32 to vector<8x128xf32>
    %291 = arith.addf %290, %289 : vector<8x128xf32>
    %292 = arith.divf %290, %291 : vector<8x128xf32>
    %293 = arith.mulf %284, %267 : vector<8x128xf32>
    %294 = arith.mulf %278, %286 : vector<8x128xf32>
    %295 = arith.addf %293, %294 : vector<8x128xf32>
    %296 = math.tanh %295 : vector<8x128xf32>
    %297 = arith.mulf %292, %296 : vector<8x128xf32>
    %c0_102 = arith.constant 0 : index
    %c0_103 = arith.constant 0 : index
    %298 = vector.load %arg12[%c0_102, %c0_103] : memref<64x128xf32, #tpu.memory_space<vmem>>, vector<8x128xf32>
    tpu.vector_store %arg12[%c0_102, %c0_103], %297 {strides = array<i32>} : memref<64x128xf32, #tpu.memory_space<vmem>>, vector<8x128xf32>,
    %c8_104 = arith.constant 8 : index
    %c0_105 = arith.constant 0 : index
    %299 = vector.load %arg11[%c8_104, %c0_105] : memref<64x512xf32, #tpu.memory_space<vmem>>, vector<8x512xf32>
    %300 = arith.truncf %297 : vector<8x128xf32> to vector<8x128xbf16>
    %c0_106 = arith.constant 0 : index
    %c0_107 = arith.constant 0 : index
    %301 = vector.load %arg6[%c0_106, %c0_107] : memref<128x512xbf16, #tpu.memory_space<vmem>>, vector<128x512xbf16>
    %cst_108 = arith.constant dense<0.000000e+00> : vector<8x512xf32>
    %302 = tpu.matmul %300, %301, %cst_108 {dimension_numbers = #tpu.dot_dimension_numbers<[1], [0], [0], [1], [0, 0, 1, 1], [], []>} : vector<8x128xbf16>, vector<128x512xbf16>, vector<8x512xf32> -> vector<8x512xf32>
    %303 = arith.addf %299, %302 : vector<8x512xf32>
    %304 = vector.extract_strided_slice %303 {offsets = [0, 0], sizes = [8, 128], strides = [1, 1]} : vector<8x512xf32> to vector<8x128xf32>
    %305 = arith.negf %304 : vector<8x128xf32>
    %306 = math.exp %305 : vector<8x128xf32>
    %cst_109 = arith.constant 1.000000e+00 : f32
    %307 = vector.broadcast %cst_109 : f32 to vector<8x128xf32>
    %308 = arith.addf %307, %306 : vector<8x128xf32>
    %309 = arith.divf %307, %308 : vector<8x128xf32>
    %310 = vector.extract_strided_slice %303 {offsets = [0, 128], sizes = [8, 128], strides = [1, 1]} : vector<8x512xf32> to vector<8x128xf32>
    %311 = arith.negf %310 : vector<8x128xf32>
    %312 = math.exp %311 : vector<8x128xf32>
    %cst_110 = arith.constant 1.000000e+00 : f32
    %313 = vector.broadcast %cst_110 : f32 to vector<8x128xf32>
    %314 = arith.addf %313, %312 : vector<8x128xf32>
    %315 = arith.divf %313, %314 : vector<8x128xf32>
    %316 = vector.extract_strided_slice %303 {offsets = [0, 256], sizes = [8, 128], strides = [1, 1]} : vector<8x512xf32> to vector<8x128xf32>
    %317 = math.tanh %316 : vector<8x128xf32>
    %318 = vector.extract_strided_slice %303 {offsets = [0, 384], sizes = [8, 128], strides = [1, 1]} : vector<8x512xf32> to vector<8x128xf32>
    %319 = arith.negf %318 : vector<8x128xf32>
    %320 = math.exp %319 : vector<8x128xf32>
    %cst_111 = arith.constant 1.000000e+00 : f32
    %321 = vector.broadcast %cst_111 : f32 to vector<8x128xf32>
    %322 = arith.addf %321, %320 : vector<8x128xf32>
    %323 = arith.divf %321, %322 : vector<8x128xf32>
    %324 = arith.mulf %315, %295 : vector<8x128xf32>
    %325 = arith.mulf %309, %317 : vector<8x128xf32>
    %326 = arith.addf %324, %325 : vector<8x128xf32>
    %327 = math.tanh %326 : vector<8x128xf32>
    %328 = arith.mulf %323, %327 : vector<8x128xf32>
    %c8_112 = arith.constant 8 : index
    %c0_113 = arith.constant 0 : index
    %329 = vector.load %arg12[%c8_112, %c0_113] : memref<64x128xf32, #tpu.memory_space<vmem>>, vector<8x128xf32>
    tpu.vector_store %arg12[%c8_112, %c0_113], %328 {strides = array<i32>} : memref<64x128xf32, #tpu.memory_space<vmem>>, vector<8x128xf32>,
    %c16_114 = arith.constant 16 : index
    %c0_115 = arith.constant 0 : index
    %330 = vector.load %arg11[%c16_114, %c0_115] : memref<64x512xf32, #tpu.memory_space<vmem>>, vector<8x512xf32>
    %331 = arith.truncf %328 : vector<8x128xf32> to vector<8x128xbf16>
    %c0_116 = arith.constant 0 : index
    %c0_117 = arith.constant 0 : index
    %332 = vector.load %arg6[%c0_116, %c0_117] : memref<128x512xbf16, #tpu.memory_space<vmem>>, vector<128x512xbf16>
    %cst_118 = arith.constant dense<0.000000e+00> : vector<8x512xf32>
    %333 = tpu.matmul %331, %332, %cst_118 {dimension_numbers = #tpu.dot_dimension_numbers<[1], [0], [0], [1], [0, 0, 1, 1], [], []>} : vector<8x128xbf16>, vector<128x512xbf16>, vector<8x512xf32> -> vector<8x512xf32>
    %334 = arith.addf %330, %333 : vector<8x512xf32>
    %335 = vector.extract_strided_slice %334 {offsets = [0, 0], sizes = [8, 128], strides = [1, 1]} : vector<8x512xf32> to vector<8x128xf32>
    %336 = arith.negf %335 : vector<8x128xf32>
    %337 = math.exp %336 : vector<8x128xf32>
    %cst_119 = arith.constant 1.000000e+00 : f32
    %338 = vector.broadcast %cst_119 : f32 to vector<8x128xf32>
    %339 = arith.addf %338, %337 : vector<8x128xf32>
    %340 = arith.divf %338, %339 : vector<8x128xf32>
    %341 = vector.extract_strided_slice %334 {offsets = [0, 128], sizes = [8, 128], strides = [1, 1]} : vector<8x512xf32> to vector<8x128xf32>
    %342 = arith.negf %341 : vector<8x128xf32>
    %343 = math.exp %342 : vector<8x128xf32>
    %cst_120 = arith.constant 1.000000e+00 : f32
    %344 = vector.broadcast %cst_120 : f32 to vector<8x128xf32>
    %345 = arith.addf %344, %343 : vector<8x128xf32>
    %346 = arith.divf %344, %345 : vector<8x128xf32>
    %347 = vector.extract_strided_slice %334 {offsets = [0, 256], sizes = [8, 128], strides = [1, 1]} : vector<8x512xf32> to vector<8x128xf32>
    %348 = math.tanh %347 : vector<8x128xf32>
    %349 = vector.extract_strided_slice %334 {offsets = [0, 384], sizes = [8, 128], strides = [1, 1]} : vector<8x512xf32> to vector<8x128xf32>
    %350 = arith.negf %349 : vector<8x128xf32>
    %351 = math.exp %350 : vector<8x128xf32>
    %cst_121 = arith.constant 1.000000e+00 : f32
    %352 = vector.broadcast %cst_121 : f32 to vector<8x128xf32>
    %353 = arith.addf %352, %351 : vector<8x128xf32>
    %354 = arith.divf %352, %353 : vector<8x128xf32>
    %355 = arith.mulf %346, %326 : vector<8x128xf32>
    %356 = arith.mulf %340, %348 : vector<8x128xf32>
    %357 = arith.addf %355, %356 : vector<8x128xf32>
    %358 = math.tanh %357 : vector<8x128xf32>
    %359 = arith.mulf %354, %358 : vector<8x128xf32>
    %c16_122 = arith.constant 16 : index
    %c0_123 = arith.constant 0 : index
    %360 = vector.load %arg12[%c16_122, %c0_123] : memref<64x128xf32, #tpu.memory_space<vmem>>, vector<8x128xf32>
    tpu.vector_store %arg12[%c16_122, %c0_123], %359 {strides = array<i32>} : memref<64x128xf32, #tpu.memory_space<vmem>>, vector<8x128xf32>,
    %c24_124 = arith.constant 24 : index
    %c0_125 = arith.constant 0 : index
    %361 = vector.load %arg11[%c24_124, %c0_125] : memref<64x512xf32, #tpu.memory_space<vmem>>, vector<8x512xf32>
    %362 = arith.truncf %359 : vector<8x128xf32> to vector<8x128xbf16>
    %c0_126 = arith.constant 0 : index
    %c0_127 = arith.constant 0 : index
    %363 = vector.load %arg6[%c0_126, %c0_127] : memref<128x512xbf16, #tpu.memory_space<vmem>>, vector<128x512xbf16>
    %cst_128 = arith.constant dense<0.000000e+00> : vector<8x512xf32>
    %364 = tpu.matmul %362, %363, %cst_128 {dimension_numbers = #tpu.dot_dimension_numbers<[1], [0], [0], [1], [0, 0, 1, 1], [], []>} : vector<8x128xbf16>, vector<128x512xbf16>, vector<8x512xf32> -> vector<8x512xf32>
    %365 = arith.addf %361, %364 : vector<8x512xf32>
    %366 = vector.extract_strided_slice %365 {offsets = [0, 0], sizes = [8, 128], strides = [1, 1]} : vector<8x512xf32> to vector<8x128xf32>
    %367 = arith.negf %366 : vector<8x128xf32>
    %368 = math.exp %367 : vector<8x128xf32>
    %cst_129 = arith.constant 1.000000e+00 : f32
    %369 = vector.broadcast %cst_129 : f32 to vector<8x128xf32>
    %370 = arith.addf %369, %368 : vector<8x128xf32>
    %371 = arith.divf %369, %370 : vector<8x128xf32>
    %372 = vector.extract_strided_slice %365 {offsets = [0, 128], sizes = [8, 128], strides = [1, 1]} : vector<8x512xf32> to vector<8x128xf32>
    %373 = arith.negf %372 : vector<8x128xf32>
    %374 = math.exp %373 : vector<8x128xf32>
    %cst_130 = arith.constant 1.000000e+00 : f32
    %375 = vector.broadcast %cst_130 : f32 to vector<8x128xf32>
    %376 = arith.addf %375, %374 : vector<8x128xf32>
    %377 = arith.divf %375, %376 : vector<8x128xf32>
    %378 = vector.extract_strided_slice %365 {offsets = [0, 256], sizes = [8, 128], strides = [1, 1]} : vector<8x512xf32> to vector<8x128xf32>
    %379 = math.tanh %378 : vector<8x128xf32>
    %380 = vector.extract_strided_slice %365 {offsets = [0, 384], sizes = [8, 128], strides = [1, 1]} : vector<8x512xf32> to vector<8x128xf32>
    %381 = arith.negf %380 : vector<8x128xf32>
    %382 = math.exp %381 : vector<8x128xf32>
    %cst_131 = arith.constant 1.000000e+00 : f32
    %383 = vector.broadcast %cst_131 : f32 to vector<8x128xf32>
    %384 = arith.addf %383, %382 : vector<8x128xf32>
    %385 = arith.divf %383, %384 : vector<8x128xf32>
    %386 = arith.mulf %377, %357 : vector<8x128xf32>
    %387 = arith.mulf %371, %379 : vector<8x128xf32>
    %388 = arith.addf %386, %387 : vector<8x128xf32>
    %389 = math.tanh %388 : vector<8x128xf32>
    %390 = arith.mulf %385, %389 : vector<8x128xf32>
    %c24_132 = arith.constant 24 : index
    %c0_133 = arith.constant 0 : index
    %391 = vector.load %arg12[%c24_132, %c0_133] : memref<64x128xf32, #tpu.memory_space<vmem>>, vector<8x128xf32>
    tpu.vector_store %arg12[%c24_132, %c0_133], %390 {strides = array<i32>} : memref<64x128xf32, #tpu.memory_space<vmem>>, vector<8x128xf32>,
    %c32_134 = arith.constant 32 : index
    %c0_135 = arith.constant 0 : index
    %392 = vector.load %arg11[%c32_134, %c0_135] : memref<64x512xf32, #tpu.memory_space<vmem>>, vector<8x512xf32>
    %393 = arith.truncf %390 : vector<8x128xf32> to vector<8x128xbf16>
    %c0_136 = arith.constant 0 : index
    %c0_137 = arith.constant 0 : index
    %394 = vector.load %arg6[%c0_136, %c0_137] : memref<128x512xbf16, #tpu.memory_space<vmem>>, vector<128x512xbf16>
    %cst_138 = arith.constant dense<0.000000e+00> : vector<8x512xf32>
    %395 = tpu.matmul %393, %394, %cst_138 {dimension_numbers = #tpu.dot_dimension_numbers<[1], [0], [0], [1], [0, 0, 1, 1], [], []>} : vector<8x128xbf16>, vector<128x512xbf16>, vector<8x512xf32> -> vector<8x512xf32>
    %396 = arith.addf %392, %395 : vector<8x512xf32>
    %397 = vector.extract_strided_slice %396 {offsets = [0, 0], sizes = [8, 128], strides = [1, 1]} : vector<8x512xf32> to vector<8x128xf32>
    %398 = arith.negf %397 : vector<8x128xf32>
    %399 = math.exp %398 : vector<8x128xf32>
    %cst_139 = arith.constant 1.000000e+00 : f32
    %400 = vector.broadcast %cst_139 : f32 to vector<8x128xf32>
    %401 = arith.addf %400, %399 : vector<8x128xf32>
    %402 = arith.divf %400, %401 : vector<8x128xf32>
    %403 = vector.extract_strided_slice %396 {offsets = [0, 128], sizes = [8, 128], strides = [1, 1]} : vector<8x512xf32> to vector<8x128xf32>
    %404 = arith.negf %403 : vector<8x128xf32>
    %405 = math.exp %404 : vector<8x128xf32>
    %cst_140 = arith.constant 1.000000e+00 : f32
    %406 = vector.broadcast %cst_140 : f32 to vector<8x128xf32>
    %407 = arith.addf %406, %405 : vector<8x128xf32>
    %408 = arith.divf %406, %407 : vector<8x128xf32>
    %409 = vector.extract_strided_slice %396 {offsets = [0, 256], sizes = [8, 128], strides = [1, 1]} : vector<8x512xf32> to vector<8x128xf32>
    %410 = math.tanh %409 : vector<8x128xf32>
    %411 = vector.extract_strided_slice %396 {offsets = [0, 384], sizes = [8, 128], strides = [1, 1]} : vector<8x512xf32> to vector<8x128xf32>
    %412 = arith.negf %411 : vector<8x128xf32>
    %413 = math.exp %412 : vector<8x128xf32>
    %cst_141 = arith.constant 1.000000e+00 : f32
    %414 = vector.broadcast %cst_141 : f32 to vector<8x128xf32>
    %415 = arith.addf %414, %413 : vector<8x128xf32>
    %416 = arith.divf %414, %415 : vector<8x128xf32>
    %417 = arith.mulf %408, %388 : vector<8x128xf32>
    %418 = arith.mulf %402, %410 : vector<8x128xf32>
    %419 = arith.addf %417, %418 : vector<8x128xf32>
    %420 = math.tanh %419 : vector<8x128xf32>
    %421 = arith.mulf %416, %420 : vector<8x128xf32>
    %c32_142 = arith.constant 32 : index
    %c0_143 = arith.constant 0 : index
    %422 = vector.load %arg12[%c32_142, %c0_143] : memref<64x128xf32, #tpu.memory_space<vmem>>, vector<8x128xf32>
    tpu.vector_store %arg12[%c32_142, %c0_143], %421 {strides = array<i32>} : memref<64x128xf32, #tpu.memory_space<vmem>>, vector<8x128xf32>,
    %c40_144 = arith.constant 40 : index
    %c0_145 = arith.constant 0 : index
    %423 = vector.load %arg11[%c40_144, %c0_145] : memref<64x512xf32, #tpu.memory_space<vmem>>, vector<8x512xf32>
    %424 = arith.truncf %421 : vector<8x128xf32> to vector<8x128xbf16>
    %c0_146 = arith.constant 0 : index
    %c0_147 = arith.constant 0 : index
    %425 = vector.load %arg6[%c0_146, %c0_147] : memref<128x512xbf16, #tpu.memory_space<vmem>>, vector<128x512xbf16>
    %cst_148 = arith.constant dense<0.000000e+00> : vector<8x512xf32>
    %426 = tpu.matmul %424, %425, %cst_148 {dimension_numbers = #tpu.dot_dimension_numbers<[1], [0], [0], [1], [0, 0, 1, 1], [], []>} : vector<8x128xbf16>, vector<128x512xbf16>, vector<8x512xf32> -> vector<8x512xf32>
    %427 = arith.addf %423, %426 : vector<8x512xf32>
    %428 = vector.extract_strided_slice %427 {offsets = [0, 0], sizes = [8, 128], strides = [1, 1]} : vector<8x512xf32> to vector<8x128xf32>
    %429 = arith.negf %428 : vector<8x128xf32>
    %430 = math.exp %429 : vector<8x128xf32>
    %cst_149 = arith.constant 1.000000e+00 : f32
    %431 = vector.broadcast %cst_149 : f32 to vector<8x128xf32>
    %432 = arith.addf %431, %430 : vector<8x128xf32>
    %433 = arith.divf %431, %432 : vector<8x128xf32>
    %434 = vector.extract_strided_slice %427 {offsets = [0, 128], sizes = [8, 128], strides = [1, 1]} : vector<8x512xf32> to vector<8x128xf32>
    %435 = arith.negf %434 : vector<8x128xf32>
    %436 = math.exp %435 : vector<8x128xf32>
    %cst_150 = arith.constant 1.000000e+00 : f32
    %437 = vector.broadcast %cst_150 : f32 to vector<8x128xf32>
    %438 = arith.addf %437, %436 : vector<8x128xf32>
    %439 = arith.divf %437, %438 : vector<8x128xf32>
    %440 = vector.extract_strided_slice %427 {offsets = [0, 256], sizes = [8, 128], strides = [1, 1]} : vector<8x512xf32> to vector<8x128xf32>
    %441 = math.tanh %440 : vector<8x128xf32>
    %442 = vector.extract_strided_slice %427 {offsets = [0, 384], sizes = [8, 128], strides = [1, 1]} : vector<8x512xf32> to vector<8x128xf32>
    %443 = arith.negf %442 : vector<8x128xf32>
    %444 = math.exp %443 : vector<8x128xf32>
    %cst_151 = arith.constant 1.000000e+00 : f32
    %445 = vector.broadcast %cst_151 : f32 to vector<8x128xf32>
    %446 = arith.addf %445, %444 : vector<8x128xf32>
    %447 = arith.divf %445, %446 : vector<8x128xf32>
    %448 = arith.mulf %439, %419 : vector<8x128xf32>
    %449 = arith.mulf %433, %441 : vector<8x128xf32>
    %450 = arith.addf %448, %449 : vector<8x128xf32>
    %451 = math.tanh %450 : vector<8x128xf32>
    %452 = arith.mulf %447, %451 : vector<8x128xf32>
    %c40_152 = arith.constant 40 : index
    %c0_153 = arith.constant 0 : index
    %453 = vector.load %arg12[%c40_152, %c0_153] : memref<64x128xf32, #tpu.memory_space<vmem>>, vector<8x128xf32>
    tpu.vector_store %arg12[%c40_152, %c0_153], %452 {strides = array<i32>} : memref<64x128xf32, #tpu.memory_space<vmem>>, vector<8x128xf32>,
    %c48_154 = arith.constant 48 : index
    %c0_155 = arith.constant 0 : index
    %454 = vector.load %arg11[%c48_154, %c0_155] : memref<64x512xf32, #tpu.memory_space<vmem>>, vector<8x512xf32>
    %455 = arith.truncf %452 : vector<8x128xf32> to vector<8x128xbf16>
    %c0_156 = arith.constant 0 : index
    %c0_157 = arith.constant 0 : index
    %456 = vector.load %arg6[%c0_156, %c0_157] : memref<128x512xbf16, #tpu.memory_space<vmem>>, vector<128x512xbf16>
    %cst_158 = arith.constant dense<0.000000e+00> : vector<8x512xf32>
    %457 = tpu.matmul %455, %456, %cst_158 {dimension_numbers = #tpu.dot_dimension_numbers<[1], [0], [0], [1], [0, 0, 1, 1], [], []>} : vector<8x128xbf16>, vector<128x512xbf16>, vector<8x512xf32> -> vector<8x512xf32>
    %458 = arith.addf %454, %457 : vector<8x512xf32>
    %459 = vector.extract_strided_slice %458 {offsets = [0, 0], sizes = [8, 128], strides = [1, 1]} : vector<8x512xf32> to vector<8x128xf32>
    %460 = arith.negf %459 : vector<8x128xf32>
    %461 = math.exp %460 : vector<8x128xf32>
    %cst_159 = arith.constant 1.000000e+00 : f32
    %462 = vector.broadcast %cst_159 : f32 to vector<8x128xf32>
    %463 = arith.addf %462, %461 : vector<8x128xf32>
    %464 = arith.divf %462, %463 : vector<8x128xf32>
    %465 = vector.extract_strided_slice %458 {offsets = [0, 128], sizes = [8, 128], strides = [1, 1]} : vector<8x512xf32> to vector<8x128xf32>
    %466 = arith.negf %465 : vector<8x128xf32>
    %467 = math.exp %466 : vector<8x128xf32>
    %cst_160 = arith.constant 1.000000e+00 : f32
    %468 = vector.broadcast %cst_160 : f32 to vector<8x128xf32>
    %469 = arith.addf %468, %467 : vector<8x128xf32>
    %470 = arith.divf %468, %469 : vector<8x128xf32>
    %471 = vector.extract_strided_slice %458 {offsets = [0, 256], sizes = [8, 128], strides = [1, 1]} : vector<8x512xf32> to vector<8x128xf32>
    %472 = math.tanh %471 : vector<8x128xf32>
    %473 = vector.extract_strided_slice %458 {offsets = [0, 384], sizes = [8, 128], strides = [1, 1]} : vector<8x512xf32> to vector<8x128xf32>
    %474 = arith.negf %473 : vector<8x128xf32>
    %475 = math.exp %474 : vector<8x128xf32>
    %cst_161 = arith.constant 1.000000e+00 : f32
    %476 = vector.broadcast %cst_161 : f32 to vector<8x128xf32>
    %477 = arith.addf %476, %475 : vector<8x128xf32>
    %478 = arith.divf %476, %477 : vector<8x128xf32>
    %479 = arith.mulf %470, %450 : vector<8x128xf32>
    %480 = arith.mulf %464, %472 : vector<8x128xf32>
    %481 = arith.addf %479, %480 : vector<8x128xf32>
    %482 = math.tanh %481 : vector<8x128xf32>
    %483 = arith.mulf %478, %482 : vector<8x128xf32>
    %c48_162 = arith.constant 48 : index
    %c0_163 = arith.constant 0 : index
    %484 = vector.load %arg12[%c48_162, %c0_163] : memref<64x128xf32, #tpu.memory_space<vmem>>, vector<8x128xf32>
    tpu.vector_store %arg12[%c48_162, %c0_163], %483 {strides = array<i32>} : memref<64x128xf32, #tpu.memory_space<vmem>>, vector<8x128xf32>,
    %c56_164 = arith.constant 56 : index
    %c0_165 = arith.constant 0 : index
    %485 = vector.load %arg11[%c56_164, %c0_165] : memref<64x512xf32, #tpu.memory_space<vmem>>, vector<8x512xf32>
    %486 = arith.truncf %483 : vector<8x128xf32> to vector<8x128xbf16>
    %c0_166 = arith.constant 0 : index
    %c0_167 = arith.constant 0 : index
    %487 = vector.load %arg6[%c0_166, %c0_167] : memref<128x512xbf16, #tpu.memory_space<vmem>>, vector<128x512xbf16>
    %cst_168 = arith.constant dense<0.000000e+00> : vector<8x512xf32>
    %488 = tpu.matmul %486, %487, %cst_168 {dimension_numbers = #tpu.dot_dimension_numbers<[1], [0], [0], [1], [0, 0, 1, 1], [], []>} : vector<8x128xbf16>, vector<128x512xbf16>, vector<8x512xf32> -> vector<8x512xf32>
    %489 = arith.addf %485, %488 : vector<8x512xf32>
    %490 = vector.extract_strided_slice %489 {offsets = [0, 0], sizes = [8, 128], strides = [1, 1]} : vector<8x512xf32> to vector<8x128xf32>
    %491 = arith.negf %490 : vector<8x128xf32>
    %492 = math.exp %491 : vector<8x128xf32>
    %cst_169 = arith.constant 1.000000e+00 : f32
    %493 = vector.broadcast %cst_169 : f32 to vector<8x128xf32>
    %494 = arith.addf %493, %492 : vector<8x128xf32>
    %495 = arith.divf %493, %494 : vector<8x128xf32>
    %496 = vector.extract_strided_slice %489 {offsets = [0, 128], sizes = [8, 128], strides = [1, 1]} : vector<8x512xf32> to vector<8x128xf32>
    %497 = arith.negf %496 : vector<8x128xf32>
    %498 = math.exp %497 : vector<8x128xf32>
    %cst_170 = arith.constant 1.000000e+00 : f32
    %499 = vector.broadcast %cst_170 : f32 to vector<8x128xf32>
    %500 = arith.addf %499, %498 : vector<8x128xf32>
    %501 = arith.divf %499, %500 : vector<8x128xf32>
    %502 = vector.extract_strided_slice %489 {offsets = [0, 256], sizes = [8, 128], strides = [1, 1]} : vector<8x512xf32> to vector<8x128xf32>
    %503 = math.tanh %502 : vector<8x128xf32>
    %504 = vector.extract_strided_slice %489 {offsets = [0, 384], sizes = [8, 128], strides = [1, 1]} : vector<8x512xf32> to vector<8x128xf32>
    %505 = arith.negf %504 : vector<8x128xf32>
    %506 = math.exp %505 : vector<8x128xf32>
    %cst_171 = arith.constant 1.000000e+00 : f32
    %507 = vector.broadcast %cst_171 : f32 to vector<8x128xf32>
    %508 = arith.addf %507, %506 : vector<8x128xf32>
    %509 = arith.divf %507, %508 : vector<8x128xf32>
    %510 = arith.mulf %501, %481 : vector<8x128xf32>
    %511 = arith.mulf %495, %503 : vector<8x128xf32>
    %512 = arith.addf %510, %511 : vector<8x128xf32>
    %513 = math.tanh %512 : vector<8x128xf32>
    %514 = arith.mulf %509, %513 : vector<8x128xf32>
    %c56_172 = arith.constant 56 : index
    %c0_173 = arith.constant 0 : index
    %515 = vector.load %arg12[%c56_172, %c0_173] : memref<64x128xf32, #tpu.memory_space<vmem>>, vector<8x128xf32>
    tpu.vector_store %arg12[%c56_172, %c0_173], %514 {strides = array<i32>} : memref<64x128xf32, #tpu.memory_space<vmem>>, vector<8x128xf32>,
    %c0_174 = arith.constant 0 : index
    %c0_175 = arith.constant 0 : index
    %516 = vector.load %arg12[%c0_174, %c0_175] : memref<64x128xf32, #tpu.memory_space<vmem>>, vector<64x128xf32>
    %517 = arith.truncf %516 : vector<64x128xf32> to vector<64x128xbf16>
    %c0_176 = arith.constant 0 : index
    %c0_177 = arith.constant 0 : index
    %518 = vector.load %arg8[%c0_176, %c0_177] : memref<128x128xbf16, #tpu.memory_space<vmem>>, vector<128x128xbf16>
    %cst_178 = arith.constant dense<0.000000e+00> : vector<64x128xf32>
    %519 = tpu.matmul %517, %518, %cst_178 {dimension_numbers = #tpu.dot_dimension_numbers<[1], [0], [0], [1], [0, 0, 1, 1], [], []>} : vector<64x128xbf16>, vector<128x128xbf16>, vector<64x128xf32> -> vector<64x128xf32>
    %c0_179 = arith.constant 0 : index
    %c0_180 = arith.constant 0 : index
    %520 = vector.load %arg9[%c0_179, %c0_180] : memref<1x128xf32, #tpu.memory_space<vmem>>, vector<1x128xf32>
    %521 = vector.broadcast %520 : vector<1x128xf32> to vector<64x128xf32>
    %522 = arith.addf %519, %521 : vector<64x128xf32>
    %523 = arith.truncf %522 : vector<64x128xf32> to vector<64x128xbf16>
    %c0_181 = arith.constant 0 : index
    %c0_182 = arith.constant 0 : index
    %c0_183 = arith.constant 0 : index
    %524 = vector.load %arg10[%c0_181, %c0_182, %c0_183] : memref<1x64x128xbf16, #tpu.memory_space<vmem>>, vector<1x64x128xbf16>
    %525 = vector.shape_cast %524 : vector<1x64x128xbf16> to vector<64x128xbf16>
    %526 = vector.shape_cast %523 : vector<64x128xbf16> to vector<1x64x128xbf16>
    tpu.vector_store %arg10[%c0_181, %c0_182, %c0_183], %526 {strides = array<i32>} : memref<1x64x128xbf16, #tpu.memory_space<vmem>>, vector<1x64x128xbf16>,
    return
  }
  func.func @transform_0(%arg0: i32) -> (i32, i32, i32) {
    %c0_i32 = arith.constant 0 : i32
    %c0_i32_0 = arith.constant 0 : i32
    %c0_i32_1 = arith.constant 0 : i32
    return %arg0, %c0_i32, %c0_i32_0 : i32, i32, i32
  }
  func.func @transform_1(%arg0: i32) -> (i32, i32) {
    %c0_i32 = arith.constant 0 : i32
    %c0_i32_0 = arith.constant 0 : i32
    %c0_i32_1 = arith.constant 0 : i32
    return %c0_i32, %c0_i32_0 : i32, i32
  }
  func.func @transform_2(%arg0: i32) -> (i32, i32) {
    %c0_i32 = arith.constant 0 : i32
    %c0_i32_0 = arith.constant 0 : i32
    %c0_i32_1 = arith.constant 0 : i32
    return %c0_i32, %c0_i32_0 : i32, i32
  }
  func.func @transform_3(%arg0: i32) -> (i32, i32) {
    %c0_i32 = arith.constant 0 : i32
    %c0_i32_0 = arith.constant 0 : i32
    %c0_i32_1 = arith.constant 0 : i32
    return %c0_i32, %c0_i32_0 : i32, i32
  }
  func.func @transform_4(%arg0: i32) -> (i32, i32) {
    %c0_i32 = arith.constant 0 : i32
    %c0_i32_0 = arith.constant 0 : i32
    %c0_i32_1 = arith.constant 0 : i32
    return %c0_i32, %c0_i32_0 : i32, i32
  }
  func.func @transform_5(%arg0: i32) -> (i32, i32) {
    %c0_i32 = arith.constant 0 : i32
    %c0_i32_0 = arith.constant 0 : i32
    %c0_i32_1 = arith.constant 0 : i32
    return %c0_i32, %c0_i32_0 : i32, i32
  }
  func.func @transform_6(%arg0: i32) -> (i32, i32) {
    %c0_i32 = arith.constant 0 : i32
    %c0_i32_0 = arith.constant 0 : i32
    %c0_i32_1 = arith.constant 0 : i32
    return %c0_i32, %c0_i32_0 : i32, i32
  }
  func.func @transform_7(%arg0: i32) -> (i32, i32) {
    %c0_i32 = arith.constant 0 : i32
    %c0_i32_0 = arith.constant 0 : i32
    %c0_i32_1 = arith.constant 0 : i32
    return %c0_i32, %c0_i32_0 : i32, i32
  }
  func.func @transform_8(%arg0: i32) -> (i32, i32) {
    %c0_i32 = arith.constant 0 : i32
    %c0_i32_0 = arith.constant 0 : i32
    %c0_i32_1 = arith.constant 0 : i32
    return %c0_i32, %c0_i32_0 : i32, i32
  }
  func.func @transform_9(%arg0: i32) -> (i32, i32, i32) {
    %c0_i32 = arith.constant 0 : i32
    %c0_i32_0 = arith.constant 0 : i32
    %c0_i32_1 = arith.constant 0 : i32
    return %arg0, %c0_i32, %c0_i32_0 : i32, i32, i32
  }
}

</mosaic_0001>

<bundles_post_ra>
// kernel: tpu_custom_call.1
= control target key start
LH: loop header
LB: loop body
LE: loop exit
PB: predicated region body
PF: predicated region fallthrough
CT: control target
= control target key end

     0   :  { %14 = vsyncpa [#allocation5], 0  ;;  %s8631_s0 = inlined_call_operand.vmem [shape: bf16[1,64,8], index: 0, kind: input, shape index: {}]   ;;  %s8632_s1 = inlined_call_operand.vmem [shape: bf16[8,512], index: 1, kind: input, shape index: {}]   ;;  %s8633_s2 = inlined_call_operand.hbm [shape: bf16[128,512], index: 2, kind: input, shape index: {}]   ;;  %s8634_s3 = inlined_call_operand.vmem [shape: f32[1,512], index: 3, kind: input, shape index: {}]   ;;  %s8635_s4 = inlined_call_operand.hbm [shape: bf16[128,512], index: 4, kind: input, shape index: {}]   ;;  %s8636_s5 = inlined_call_operand.hbm [shape: bf16[128,512], index: 5, kind: input, shape index: {}]   ;;  %s8637_s6 = inlined_call_operand.vmem [shape: f32[1,512], index: 6, kind: input, shape index: {}]   ;;  %s8638_s7 = inlined_call_operand.hbm [shape: bf16[128,128], index: 7, kind: input, shape index: {}]   ;;  %s8639_s8 = inlined_call_operand.vmem [shape: f32[1,128], index: 8, kind: input, shape index: {}]   ;;  %s8640_s9 = inlined_call_operand.hbm [shape: bf16[1,64,128], index: 9, kind: output, shape index: {}]  }
   0x1   :  { %15 = vsyncpa [#allocation8], 0 }
   0x2   :  { %16 = vsyncpa [#allocation11], 0 }
   0x3   :  { %17 = vsyncpa [#allocation6], 0  ;;  %s7235_s30 = smov [#allocation7]   ;;  %s7236_s11 = smov [#allocation4]  }
   0x4   :  { %s41_s10 = sshll.u32 %s7235_s30, 4  ;;  %s27_s12 = sshll.u32 %s7236_s11, 4  ;;  %s42_s10 = int_to_ptr.vmem [resolvable:$true] %s41_s10  ;;  %s7295_s12 = int_to_ptr.vmem [resolvable:$true] %s27_s12 }
   0x5   :  { %s7117_s15 = scalar_lea.hbm %s8635_s4, 4096 }
   0x6   :  { %p7118_p0 = scmp.ne.s32.totalorder %s8635_s4, %s7117_s15  ;;  %p7121_p1 = scmp.lt.u32.totalorder %s7117_s15, %s8635_s4 }
   0x8   :  { %p7123_p2 = pnand %p7121_p1, %p7118_p0 }
   0xa   :  { %7126 = shalt.err (!%p7123_p2)
}
   0xb   :  { %s7127_s20 = scalar_lea.vmem %s42_s10, 4096  ;;  %p7132_p4 = scmp.lt.s32.totalorder %s42_s10, %s42_s10 }
   0xc   :  { %p7128_p3 = scmp.ne.s32.totalorder %s42_s10, %s7127_s20  ;;  %p7133_p5 = scmp.lt.s32.totalorder %s7127_s20, %s7127_s20 }
   0xe   :  { %p7134_p6 = por %p7133_p5, %p7132_p4 }
  0x10   :  { %p7135_p7 = pnand %p7134_p6, %p7128_p3 }
  0x12   :  { %7138 = shalt.err (!%p7135_p7)
}
  0x13   :  { %s7237_s21 = smov 256   ;;  %s7238_s22 = smov 16  }
  0x14   :  { %47 = dma.hbm_to_vmem [thread:$0]  %s8635_s4, 4096, %s42_s10, [#allocation8], %s7237_s21, %s7237_s21, %s7238_s22  }
  0x15   :  { %s7139_s27 = scalar_lea.hbm %s8633_s2, 4096 }
  0x16   :  { %p7140_p8 = scmp.ne.s32.totalorder %s8633_s2, %s7139_s27  ;;  %p7143_p9 = scmp.lt.u32.totalorder %s7139_s27, %s8633_s2 }
  0x18   :  { %p7145_p10 = pnand %p7143_p9, %p7140_p8 }
  0x1a   :  { %7148 = shalt.err (!%p7145_p10)
}
  0x1b   :  { %s7149_s13 = scalar_lea.vmem %s7295_s12, 4096  ;;  %p7154_p12 = scmp.lt.s32.totalorder %s7295_s12, %s7295_s12 }
  0x1c   :  { %p7150_p11 = scmp.ne.s32.totalorder %s7295_s12, %s7149_s13  ;;  %p7155_p13 = scmp.lt.s32.totalorder %s7149_s13, %s7149_s13 }
  0x1e   :  { %p7156_p0 = por %p7155_p13, %p7154_p12 }
  0x20   :  { %p7157_p1 = pnand %p7156_p0, %p7150_p11 }
  0x22   :  { %7160 = shalt.err (!%p7157_p1)
}
  0x23   :  { %33 = dma.hbm_to_vmem [thread:$0]  %s8633_s2, 4096, %s7295_s12, [#allocation5], %s7237_s21, %s7237_s21, %s7238_s22  }
  0x24   :  { %s7239_s14 = smov [#allocation9]   ;;  %s7240_s16 = smov [#allocation10]  }
  0x25   :  { %s53_s15 = sshll.u32 %s7239_s14, 4  ;;  %s67_s17 = sshll.u32 %s7240_s16, 4  ;;  %s54_s15 = int_to_ptr.vmem [resolvable:$true] %s53_s15  ;;  %s7332_s17 = int_to_ptr.vmem [resolvable:$true] %s67_s17 }
  0x26   :  { %s7161_s20 = scalar_lea.hbm %s8636_s5, 4096 }
  0x27   :  { %p7162_p2 = scmp.ne.s32.totalorder %s8636_s5, %s7161_s20  ;;  %p7165_p3 = scmp.lt.u32.totalorder %s7161_s20, %s8636_s5 }
  0x29   :  { %p7167_p4 = pnand %p7165_p3, %p7162_p2 }
  0x2b   :  { %7170 = shalt.err (!%p7167_p4)
}
  0x2c   :  { %s7171_s2 = scalar_lea.vmem %s54_s15, 4096  ;;  %p7176_p6 = scmp.lt.s32.totalorder %s54_s15, %s54_s15 }
  0x2d   :  { %p7172_p5 = scmp.ne.s32.totalorder %s54_s15, %s7171_s2  ;;  %p7177_p7 = scmp.lt.s32.totalorder %s7171_s2, %s7171_s2 }
  0x2f   :  { %p7178_p8 = por %p7177_p7, %p7176_p6 }
  0x31   :  { %p7179_p9 = pnand %p7178_p8, %p7172_p5 }
  0x33   :  { %7182 = shalt.err (!%p7179_p9)
}
  0x34   :  { %59 = dma.hbm_to_vmem [thread:$0]  %s8636_s5, 4096, %s54_s15, [#allocation8], %s7237_s21, %s7237_s21, %s7238_s22  }
  0x35   :  { %s7183_s30 = scalar_lea.hbm %s8638_s7, 1024 }
  0x36   :  { %p7184_p10 = scmp.ne.s32.totalorder %s8638_s7, %s7183_s30  ;;  %p7187_p11 = scmp.lt.u32.totalorder %s7183_s30, %s8638_s7 }
  0x38   :  { %p7189_p12 = pnand %p7187_p11, %p7184_p10 }
  0x3a   :  { %7192 = shalt.err (!%p7189_p12)
}
  0x3b   :  { %s7193_s14 = scalar_lea.vmem %s7332_s17, 1024  ;;  %p7198_p0 = scmp.lt.s32.totalorder %s7332_s17, %s7332_s17 }
  0x3c   :  { %p7194_p13 = scmp.ne.s32.totalorder %s7332_s17, %s7193_s14  ;;  %p7199_p1 = scmp.lt.s32.totalorder %s7193_s14, %s7193_s14 }
  0x3e   :  { %p7200_p2 = por %p7199_p1, %p7198_p0 }
  0x40   :  { %p7201_p3 = pnand %p7200_p2, %p7194_p13 }
  0x42   :  { %7204 = shalt.err (!%p7201_p3)
}
  0x43   :  { %s7241_s5 = smov 64   ;;  %s7242_s21 = smov 4  }
  0x44   :  { %73 = dma.hbm_to_vmem [thread:$0]  %s8638_s7, 1024, %s7332_s17, [#allocation11], %s7241_s5, %s7241_s5, %s7242_s21  }
  0x45   :  { %7227 = dma.done.wait [#allocation5], 4096  }
  0x46   :  { %7228 = vsyncadd [#allocation5], 4294963200 }
  0x47   :  { %7229 = dma.done.wait [#allocation8], 8192  }
  0x48   :  { %7230 = vsyncadd [#allocation8], 4294959104 }
  0x49   :  { %7231 = dma.done.wait [#allocation11], 1024  }
  0x4a   :  { %7232 = vsyncadd [#allocation11], 4294966272  ;;  %v8645_v0 = vmov 0   ;;  %v98_v1 = vld [vmem:[%s8632_s1 + $0x8] sm:$0xff]  ;;  %vm164_vm0 = vcmask 1043456   ;;  %v6598_v6 = vld [vmem:[%s8631_s0] sm:$0xff]   ;;  %v101_v45 = vlaneseq }
  0x4b   :  { %282 = vmatprep.mubr.bf16.mxu1 %v8645_v0  ;;  %209 = vmatprep.mubr.bf16.mxu0 %v8645_v0  ;;  %v5899_v2 = vcombine.high %v98_v1, %v98_v1  ;;  %v5898_v3 = vcombine.low %v98_v1, %v98_v1  ;;  %v7374_v4 = vld [vmem:[#allocation4 + $0x4] ss:$16 sps:$4 sm:$0xff]   ;;  %vm151_vm1 = vcmask 64512   ;;  %v7381_v7 = vld [vmem:[#allocation4] ss:$16 sps:$4 sm:$0xff]   ;;  %v6605_v11 = vld [vmem:[%s8631_s0 + $0x8] sm:$0xff]  }
  0x4c   :  { %v7384_v8 = vld [vmem:[#allocation4 + $0x24] ss:$16 sps:$4 sm:$0xff]   ;;  %v7388_v9 = vld [vmem:[#allocation4 + $0x20] ss:$16 sps:$4 sm:$0xff]   ;;  %v6619_v24 = vld [vmem:[%s8631_s0 + $0x18] sm:$0xff]   ;;  %v7543_v46 = vshrl.u32 %v101_v45, 7 }
  0x4d   :  { %5905 = vmatprep.subr.msk.bf16.mxu1 %vm164_vm0, %v5899_v2  ;;  %v172_v5 = vsel %vm164_vm0, %v5898_v3, 0  ;;  %v7392_v10 = vld [vmem:[#allocation4 + $0x44] ss:$16 sps:$4 sm:$0xff]   ;;  %v7398_v12 = vld [vmem:[#allocation4 + $0x40] ss:$16 sps:$4 sm:$0xff]  }
  0x4e   :  { %251 = vmatpush1.bf16.msra.mxu1 %v172_v5  ;;  %v7401_v13 = vld [vmem:[#allocation4 + $0x64] ss:$16 sps:$4 sm:$0xff]   ;;  %v7408_v17 = vld [vmem:[#allocation4 + $0x60] ss:$16 sps:$4 sm:$0xff]   ;;  %v7455_v29 = vld [vmem:[#allocation4 + $0xc] ss:$16 sps:$4 sm:$0xff]  }
  0x4f   :  { %551 = vmatprep.subr.bf16.mxu1 %v7374_v4  ;;  %v97_v14 = vld [vmem:[%s8632_s1] sm:$0xff]  ;;  %v6612_v20 = vld [vmem:[%s8631_s0 + $0x10] sm:$0xff]   ;;  %v7461_v30 = vld [vmem:[#allocation4 + $0x8] ss:$16 sps:$4 sm:$0xff]   ;;  %8649 = vst [vmem:[#allocation17_spill] sm:$0xff] %v7543_v46  ;;  %v8643_v47 = vsub.s32 2, %v7543_v46 }
  0x50   :  { %v5897_v15 = vcombine.high %v97_v14, %v97_v14  ;;  %v5896_v16 = vcombine.low %v97_v14, %v97_v14  ;;  %v7413_v19 = vld [vmem:[#allocation4 + $0x84] ss:$16 sps:$4 sm:$0xff]   ;;  %v7421_v21 = vld [vmem:[#allocation4 + $0x80] ss:$16 sps:$4 sm:$0xff]   ;;  %v7464_v31 = vld [vmem:[#allocation4 + $0x2c] ss:$16 sps:$4 sm:$0xff]  }
  0x51   :  { %5906 = vmatmul.mubr.msk.bf16.vlgmr.msra.gmra.mrb[0].mxu1 %vm151_vm1, %v6598_v6  ;;  %v7424_v22 = vld [vmem:[#allocation4 + $0xa4] ss:$16 sps:$4 sm:$0xff]   ;;  %v7432_v23 = vld [vmem:[#allocation4 + $0xa0] ss:$16 sps:$4 sm:$0xff]   ;;  %v7470_v32 = vld [vmem:[#allocation4 + $0x28] ss:$16 sps:$4 sm:$0xff]  }
  0x52   :  { %552 = vmatpush1.bf16.msra.mxu1 %v7381_v7  ;;  %292 = vmatprep.mubr.bf16.mxu1 %v8645_v0  ;;  %v166_v18 = vsel %vm164_vm0, %v5896_v16, 0  ;;  %v7439_v25 = vld [vmem:[#allocation4 + $0xc4] ss:$16 sps:$4 sm:$0xff]   ;;  %v7441_v26 = vld [vmem:[#allocation4 + $0xc0] ss:$16 sps:$4 sm:$0xff]   ;;  %v8641_v49 = vsub.s32 3, %v7543_v46 }
  0x53   :  { %553 = vmatprep.subr.bf16.mxu1 %v7384_v8  ;;  %5900 = vmatprep.subr.msk.bf16.mxu0 %vm164_vm0, %v5897_v15  ;;  %v7444_v27 = vld [vmem:[#allocation4 + $0xe4] ss:$16 sps:$4 sm:$0xff]   ;;  %v7450_v28 = vld [vmem:[#allocation4 + $0xe0] ss:$16 sps:$4 sm:$0xff]   ;;  %v7475_v33 = vld [vmem:[#allocation4 + $0x4c] ss:$16 sps:$4 sm:$0xff]  }
  0x54   :  { %178 = vmatpush1.bf16.msra.mxu0 %v166_v18  ;;  %v7481_v34 = vld [vmem:[#allocation4 + $0x48] ss:$16 sps:$4 sm:$0xff]   ;;  %v7484_v35 = vld [vmem:[#allocation4 + $0x6c] ss:$16 sps:$4 sm:$0xff]   ;;  %v99_v48 = vld [vmem:[%s8634_s3] sm:$0xf] }
  0x55   :  { %859 = vmatprep.subr.bf16.mxu0 %v7374_v4  ;;  %v7490_v36 = vld [vmem:[#allocation4 + $0x68] ss:$16 sps:$4 sm:$0xff]   ;;  %v7494_v37 = vld [vmem:[#allocation4 + $0x8c] ss:$16 sps:$4 sm:$0xff]   ;;  %v7552_v50 = vrot.slane %v99_v48, %v8643_v47  ;;  %v7560_v53 = vrot.slane %v99_v48, %v8641_v49  ;;  %v8644_v2 = vsub.s32 0, %v7543_v46  ;;  %v8642_v5 = vsub.s32 1, %v7543_v46 }
  0x56   :  { %554 = vmatpush1.bf16.msra.mxu1 %v7388_v9  ;;  %v7499_v38 = vld [vmem:[#allocation4 + $0x88] ss:$16 sps:$4 sm:$0xff]   ;;  %v7502_v39 = vld [vmem:[#allocation4 + $0xac] ss:$16 sps:$4 sm:$0xff]  }
  0x57   :  { %555 = vmatprep.subr.bf16.mxu1 %v7392_v10  ;;  %5901 = vmatmul.mubr.msk.bf16.vlgmr.msra.gmra.mrb[0].mxu0 %vm151_vm1, %v6598_v6  ;;  %v7507_v40 = vld [vmem:[#allocation4 + $0xa8] ss:$16 sps:$4 sm:$0xff]   ;;  %v7509_v41 = vld [vmem:[#allocation4 + $0xcc] ss:$16 sps:$4 sm:$0xff]   ;;  %v108_v16 = vrot.slane %v99_v48, %v8642_v5 }
  0x58   :  { %860 = vmatpush1.bf16.msra.mxu0 %v7381_v7  ;;  %219 = vmatprep.mubr.bf16.mxu0 %v8645_v0  ;;  %v7513_v42 = vld [vmem:[#allocation4 + $0xc8] ss:$16 sps:$4 sm:$0xff]   ;;  %v7515_v43 = vld [vmem:[#allocation4 + $0xec] ss:$16 sps:$4 sm:$0xff]  }
  0x59   :  { %5907 = vmatmul.mubr.msk.bf16.gmra.mrb[4].mxu1 %vm151_vm1, %v6605_v11  ;;  %861 = vmatprep.subr.bf16.mxu0 %v7384_v8  ;;  %v7519_v44 = vld [vmem:[#allocation4 + $0xe8] ss:$16 sps:$4 sm:$0xff]  }
  0x5a   :  { %556 = vmatpush1.bf16.msra.mxu1 %v7398_v12  ;;  %302 = vmatprep.mubr.bf16.mxu1 %v8645_v0 }
  0x5b   :  { %557 = vmatprep.subr.bf16.mxu1 %v7401_v13 }
  0x5c   :  { %862 = vmatpush1.bf16.msra.mxu0 %v7388_v9 }
  0x5d   :  { %863 = vmatprep.subr.bf16.mxu0 %v7392_v10 }
  0x5e   :  { %558 = vmatpush1.bf16.msra.mxu1 %v7408_v17 }
  0x5f   :  { %559 = vmatprep.subr.bf16.mxu1 %v7413_v19  ;;  %5902 = vmatmul.mubr.msk.bf16.gmra.mrb[4].mxu0 %vm151_vm1, %v6605_v11  ;;  %v104_v11 = vrot.slane %v99_v48, %v8644_v2 }
  0x60   :  { %864 = vmatpush1.bf16.msra.mxu0 %v7398_v12  ;;  %229 = vmatprep.mubr.bf16.mxu0 %v8645_v0 }
  0x61   :  { %5908 = vmatmul.mubr.msk.bf16.gmra.mrb[8].mxu1 %vm151_vm1, %v6612_v20  ;;  %865 = vmatprep.subr.bf16.mxu0 %v7401_v13 }
  0x62   :  { %560 = vmatpush1.bf16.msra.mxu1 %v7421_v21  ;;  %312 = vmatprep.mubr.bf16.mxu1 %v8645_v0 }
  0x63   :  { %561 = vmatprep.subr.bf16.mxu1 %v7424_v22 }
  0x64   :  { %866 = vmatpush1.bf16.msra.mxu0 %v7408_v17 }
  0x65   :  { %867 = vmatprep.subr.bf16.mxu0 %v7413_v19 }
  0x66   :  { %562 = vmatpush1.bf16.msra.mxu1 %v7432_v23 }
  0x67   :  { %563 = vmatprep.subr.bf16.mxu1 %v7439_v25  ;;  %5903 = vmatmul.mubr.msk.bf16.gmra.mrb[8].mxu0 %vm151_vm1, %v6612_v20 }
  0x68   :  { %868 = vmatpush1.bf16.msra.mxu0 %v7421_v21  ;;  %239 = vmatprep.mubr.bf16.mxu0 %v8645_v0 }
  0x69   :  { %5909 = vmatmul.mubr.msk.bf16.gmra.mrb[12].mxu1 %vm151_vm1, %v6619_v24  ;;  %869 = vmatprep.subr.bf16.mxu0 %v7424_v22 }
  0x6a   :  { %564 = vmatpush1.bf16.msra.mxu1 %v7441_v26  ;;  %583 = vmatprep.mubr.bf16.mxu1 %v8645_v0 }
  0x6b   :  { %565 = vmatprep.subr.bf16.mxu1 %v7444_v27 }
  0x6c   :  { %870 = vmatpush1.bf16.msra.mxu0 %v7432_v23 }
  0x6d   :  { %871 = vmatprep.subr.bf16.mxu0 %v7439_v25 }
  0x6e   :  { %566 = vmatpush1.bf16.msra.mxu1 %v7450_v28 }
  0x6f   :  { %592 = vmatprep.subr.bf16.mxu1 %v7455_v29  ;;  %5904 = vmatmul.mubr.msk.bf16.gmra.mrb[12].mxu0 %vm151_vm1, %v6619_v24 }
  0x70   :  { %872 = vmatpush1.bf16.msra.mxu0 %v7441_v26  ;;  %891 = vmatprep.mubr.bf16.mxu0 %v8645_v0 }
  0x71   :  { %584 = vmatmul.mubr.bf16.vlgmr.msra.gmra.mrb[16].mxu1 %v8645_v0  ;;  %873 = vmatprep.subr.bf16.mxu0 %v7444_v27 }
  0x72   :  { %593 = vmatpush1.bf16.msra.mxu1 %v7461_v30  ;;  %624 = vmatprep.mubr.bf16.mxu1 %v8645_v0 }
  0x73   :  { %594 = vmatprep.subr.bf16.mxu1 %v7464_v31 }
  0x74   :  { %874 = vmatpush1.bf16.msra.mxu0 %v7450_v28 }
  0x75   :  { %1167 = vmatprep.subr.bf16.mxu0 %v7374_v4 }
  0x76   :  { %595 = vmatpush1.bf16.msra.mxu1 %v7470_v32 }
  0x77   :  { %596 = vmatprep.subr.bf16.mxu1 %v7475_v33 }
  0x7a   :  { %597 = vmatpush1.bf16.msra.mxu1 %v7481_v34 }
  0x7b   :  { %598 = vmatprep.subr.bf16.mxu1 %v7484_v35 }
  0x7e   :  { %599 = vmatpush1.bf16.msra.mxu1 %v7490_v36 }
  0x7f   :  { %600 = vmatprep.subr.bf16.mxu1 %v7494_v37 }
  0x82   :  { %601 = vmatpush1.bf16.msra.mxu1 %v7499_v38 }
  0x83   :  { %602 = vmatprep.subr.bf16.mxu1 %v7502_v39 }
  0x86   :  { %603 = vmatpush1.bf16.msra.mxu1 %v7507_v40 }
  0x87   :  { %604 = vmatprep.subr.bf16.mxu1 %v7509_v41 }
  0x8a   :  { %605 = vmatpush1.bf16.msra.mxu1 %v7513_v42 }
  0x8b   :  { %606 = vmatprep.subr.bf16.mxu1 %v7515_v43 }
  0x8e   :  { %607 = vmatpush1.bf16.msra.mxu1 %v7519_v44 }
  0x8f   :  { %900 = vmatprep.subr.bf16.mxu1 %v7455_v29 }
  0x91   :  { %625 = vmatmul.mubr.bf16.vlgmr.msra.gmra.mrb[20].mxu1 %v8645_v0 }
  0x92   :  { %901 = vmatpush1.bf16.msra.mxu1 %v7461_v30  ;;  %932 = vmatprep.mubr.bf16.mxu1 %v8645_v0 }
  0x93   :  { %902 = vmatprep.subr.bf16.mxu1 %v7464_v31 }
  0x96   :  { %903 = vmatpush1.bf16.msra.mxu1 %v7470_v32 }
  0x97   :  { %904 = vmatprep.subr.bf16.mxu1 %v7475_v33 }
  0x9a   :  { %905 = vmatpush1.bf16.msra.mxu1 %v7481_v34 }
  0x9b   :  { %906 = vmatprep.subr.bf16.mxu1 %v7484_v35 }
  0x9e   :  { %907 = vmatpush1.bf16.msra.mxu1 %v7490_v36 }
  0x9f   :  { %908 = vmatprep.subr.bf16.mxu1 %v7494_v37 }
  0xa2   :  { %909 = vmatpush1.bf16.msra.mxu1 %v7499_v38 }
  0xa3   :  { %910 = vmatprep.subr.bf16.mxu1 %v7502_v39 }
  0xa6   :  { %911 = vmatpush1.bf16.msra.mxu1 %v7507_v40 }
  0xa7   :  { %912 = vmatprep.subr.bf16.mxu1 %v7509_v41 }
  0xaa   :  { %913 = vmatpush1.bf16.msra.mxu1 %v7513_v42 }
  0xab   :  { %914 = vmatprep.subr.bf16.mxu1 %v7515_v43 }
  0xae   :  { %915 = vmatpush1.bf16.msra.mxu1 %v7519_v44 }
  0xaf   :  { %1208 = vmatprep.subr.bf16.mxu1 %v7455_v29 }
 0x124   :  { %v7554_v51 = vpop.f32.mrb[0].mxu1 }
 0x125   :  { %v7556_v52 = vpop.f32.mrb[1].mxu1 }
 0x126   :  { %v288_v54 = vpop.f32.mrb[2].mxu1 }
 0x127   :  { %v7563_v55 = vadd.f32 %v288_v54, %v7552_v50  ;;  %v290_v56 = vpop.f32.mrb[3].mxu1 }
 0x128   :  { %v7566_v57 = vadd.f32 %v290_v56, %v7560_v53 }
 0x12a   :  { %v211_v6 = vpop.f32.mrb[0].mxu0 }
 0x12b   :  { %v213_v14 = vpop.f32.mrb[1].mxu0 }
 0x12c   :  { %v294_v58 = vpop.f32.mrb[4].mxu1  ;;  %v215_v18 = vpop.f32.mrb[2].mxu0 }
 0x12d   :  { %v7569_v59 = vadd.f32 %v294_v58, %v7552_v50  ;;  %v296_v60 = vpop.f32.mrb[5].mxu1  ;;  %v7589_v45 = vadd.f32 %v215_v18, %v104_v11  ;;  %v217_v54 = vpop.f32.mrb[3].mxu0 }
 0x12e   :  { %v7572_v61 = vadd.f32 %v296_v60, %v7560_v53  ;;  %v298_v62 = vpop.f32.mrb[6].mxu1  ;;  %v7594_v60 = vadd.f32 %v217_v54, %v108_v16 }
 0x12f   :  { %v7575_v63 = vadd.f32 %v298_v62, %v7552_v50  ;;  %v300_v1 = vpop.f32.mrb[7].mxu1 }
 0x130   :  { %8650 = vst [vmem:[#allocation18_spill] sm:$0xff] %v7572_v61  ;;  %v7579_v3 = vadd.f32 %v300_v1, %v7560_v53 }
 0x131   :  { %8651 = vst [vmem:[#allocation19_spill] sm:$0xff] %v7575_v63 }
 0x132   :  { %8652 = vst [vmem:[#allocation20_spill] sm:$0xff] %v7579_v3  ;;  %v221_v49 = vpop.f32.mrb[4].mxu0 }
 0x133   :  { %v223_v5 = vpop.f32.mrb[5].mxu0 }
 0x134   :  { %v304_v15 = vpop.f32.mrb[8].mxu1  ;;  %v7604_v47 = vadd.f32 %v223_v5, %v108_v16  ;;  %v225_v2 = vpop.f32.mrb[6].mxu0 }
 0x135   :  { %v7587_v20 = vadd.f32 %v304_v15, %v7552_v50  ;;  %v306_v24 = vpop.f32.mrb[9].mxu1  ;;  %v7602_v15 = vadd.f32 %v221_v49, %v104_v11  ;;  %v7609_v0 = vadd.f32 %v225_v2, %v104_v11 }
 0x136   :  { %v7592_v56 = vadd.f32 %v306_v24, %v7560_v53  ;;  %v308_v58 = vpop.f32.mrb[10].mxu1 }
 0x137   :  { %8653 = vst [vmem:[#allocation21_spill] sm:$0xff] %v7587_v20  ;;  %v7597_v62 = vadd.f32 %v308_v58, %v7552_v50  ;;  %v310_v1 = vpop.f32.mrb[11].mxu1  ;;  %8658 = vst [vmem:[#allocation26_spill] sm:$0xff] %v7609_v0  ;;  %v227_v58 = vpop.f32.mrb[7].mxu0 }
 0x138   :  { %8654 = vst [vmem:[#allocation22_spill] sm:$0xff] %v7592_v56  ;;  %v7600_v48 = vadd.f32 %v310_v1, %v7560_v53  ;;  %v212_v56 = vadd.f32 %v211_v6, %v104_v11 }
 0x139   :  { %8655 = vst [vmem:[#allocation23_spill] sm:$0xff] %v7597_v62 }
 0x13a   :  { %8656 = vst [vmem:[#allocation24_spill] sm:$0xff] %v7600_v48  ;;  %v7614_v48 = vadd.f32 %v227_v58, %v108_v16 }
 0x13c   :  { %v314_v18 = vpop.f32.mrb[12].mxu1  ;;  %8660 = vst [vmem:[#allocation28_spill] sm:$0xff] %v7614_v48 }
 0x13d   :  { %v7607_v24 = vadd.f32 %v314_v18, %v7552_v50  ;;  %v316_v54 = vpop.f32.mrb[13].mxu1  ;;  %v214_v18 = vadd.f32 %v213_v14, %v108_v16 }
 0x13e   :  { %v7612_v46 = vadd.f32 %v316_v54, %v7560_v53  ;;  %v318_v1 = vpop.f32.mrb[14].mxu1 }
 0x13f   :  { %8657 = vst [vmem:[#allocation25_spill] sm:$0xff] %v7607_v24  ;;  %v7617_v49 = vadd.f32 %v318_v1, %v7552_v50  ;;  %v320_v62 = vpop.f32.mrb[15].mxu1  ;;  %v231_v24 = vpop.f32.mrb[8].mxu0 }
 0x140   :  { %8659 = vst [vmem:[#allocation27_spill] sm:$0xff] %v7612_v46  ;;  %v7620_v5 = vadd.f32 %v320_v62, %v7560_v53  ;;  %v7622_v20 = vadd.f32 %v231_v24, %v104_v11  ;;  %v233_v2 = vpop.f32.mrb[9].mxu0 }
 0x141   :  { %8661 = vst [vmem:[#allocation29_spill] sm:$0xff] %v7617_v49  ;;  %v7624_v63 = vadd.f32 %v233_v2, %v108_v16  ;;  %v235_v54 = vpop.f32.mrb[10].mxu0 }
 0x142   :  { %8662 = vst [vmem:[#allocation30_spill] sm:$0xff] %v7620_v5  ;;  %8663 = vst [vmem:[#allocation31_spill] sm:$0xff] %v7622_v20  ;;  %v7626_v48 = vadd.f32 %v235_v54, %v104_v11  ;;  %v237_v1 = vpop.f32.mrb[11].mxu0 }
 0x143   :  { %8664 = vst [vmem:[#allocation32_spill] sm:$0xff] %v7624_v63  ;;  %v7628_v61 = vadd.f32 %v237_v1, %v108_v16  ;;  %v241_v6 = vpop.f32.mrb[12].mxu0 }
 0x144   :  { %v585_v3 = vpop.f32.mrb[16].mxu1  ;;  %v7630_v14 = vadd.f32 %v241_v6, %v104_v11  ;;  %v243_v24 = vpop.f32.mrb[13].mxu0  ;;  %v287_v6 = vadd.f32 %v7556_v52, %v7560_v53 }
 0x145   :  { %v633_v46 = vadd.f32 %v585_v3, %v212_v56  ;;  %v587_v58 = vpop.f32.mrb[17].mxu1  ;;  %v7632_v5 = vadd.f32 %v243_v24, %v108_v16  ;;  %v245_v20 = vpop.f32.mrb[14].mxu0 }
 0x146   :  { %v634_v49 = vadd.f32 %v587_v58, %v214_v18  ;;  %v589_v0 = vpop.f32.mrb[18].mxu1  ;;  %v7634_v2 = vadd.f32 %v245_v20, %v104_v11  ;;  %v247_v63 = vpop.f32.mrb[15].mxu0 }
 0x147   :  { %v590_v62 = vpop.f32.mrb[19].mxu1  ;;  %v7636_v3 = vadd.f32 %v247_v63, %v108_v16  ;;  %v5942_v54 = vmul.f32 -1.442695, %v633_v46 }
 0x148   :  { %v5943_v56 = vmul.f32 -1.442695, %v634_v49  ;;  %v285_v62 = vadd.f32 %v7554_v51, %v7552_v50 }
 0x149   :  { %8665 = vst [vmem:[#allocation33_spill] sm:$0xff] %v7636_v3 }
 0x14a   :  { %6861 = vpow2.f32 %v5943_v56 }
 0x14b   :  { %6863 = vpow2.f32 %v5942_v54 }
 0x154   :  { %v6862_v0 = vpop.eup %6861 }
 0x155   :  { %v6864_v18 = vpop.eup %6863  ;;  %v646_v58 = vadd.f32 1.0, %v6862_v0 }
 0x156   :  { %v640_v1 = vadd.f32 1.0, %v6864_v18 }
 0x157   :  { %6865 = vrcp.f32 %v646_v58 }
 0x158   :  { %6867 = vrcp.f32 %v640_v1 }
 0x161   :  { %v6866_v56 = vpop.eup %6865 }
 0x162   :  { %v6868_v54 = vpop.eup %6867  ;;  %v656_v18 = vmul.f32 0.0, %v6866_v56 }
 0x164   :  { %v626_v24 = vpop.f32.mrb[20].mxu1 }
 0x165   :  { %v635_v11 = vadd.f32 %v626_v24, %v285_v62  ;;  %v628_v20 = vpop.f32.mrb[21].mxu1 }
 0x166   :  { %v636_v63 = vadd.f32 %v628_v20, %v287_v6  ;;  %v630_v16 = vpop.f32.mrb[22].mxu1 }
 0x167   :  { %6869 = vtanh.f32 %v635_v11  ;;  %v631_v46 = vpop.f32.mrb[23].mxu1 }
 0x168   :  { %v5944_v49 = vmul.f32 -1.442695, %v636_v63 }
 0x16a   :  { %6871 = vpow2.f32 %v5944_v49 }
 0x171   :  { %v6870_v0 = vpop.eup %6869 }
 0x172   :  { %v657_v3 = vmul.f32 %v6870_v0, %v6868_v54 }
 0x174   :  { %v6872_v50 = vpop.eup %6871  ;;  %v7642_v51 = vadd.f32 %v657_v3, %v656_v18  ;;  %v8666_v3 = vmov 0  }
 0x175   :  { %v653_v52 = vadd.f32 1.0, %v6872_v50 }
 0x176   :  { %6873 = vtanh.f32 %v7642_v51 }
 0x177   :  { %6875 = vrcp.f32 %v653_v52 }
 0x180   :  { %v6874_v53 = vpop.eup %6873 }
 0x181   :  { %v6876_v58 = vpop.eup %6875 }
 0x182   :  { %v7645_v1 = vmul.f32 %v6876_v58, %v6874_v53 }
 0x184   :  { %v666_v62 = vpack.c.bf16 %v7645_v1, %v7645_v1 }
 0x186   :  { %892 = vmatmul.mubr.bf16.vlgmr.msra.gmra.mrb[16].mxu0 %v666_v62  ;;  %933 = vmatmul.mubr.bf16.vlgmr.msra.gmra.mrb[24].mxu1 %v666_v62 }
 0x187   :  { %1168 = vmatpush1.bf16.msra.mxu0 %v7381_v7  ;;  %1209 = vmatpush1.bf16.msra.mxu1 %v7461_v30 }
 0x188   :  { %1169 = vmatprep.subr.bf16.mxu0 %v7384_v8  ;;  %1210 = vmatprep.subr.bf16.mxu1 %v7464_v31 }
 0x189   :  { %1199 = vmatprep.mubr.bf16.mxu0 %v8666_v3  ;;  %1240 = vmatprep.mubr.bf16.mxu1 %v8666_v3 }
 0x18b   :  { %1170 = vmatpush1.bf16.msra.mxu0 %v7388_v9  ;;  %1211 = vmatpush1.bf16.msra.mxu1 %v7470_v32 }
 0x18c   :  { %1171 = vmatprep.subr.bf16.mxu0 %v7392_v10  ;;  %1212 = vmatprep.subr.bf16.mxu1 %v7475_v33 }
 0x18f   :  { %1172 = vmatpush1.bf16.msra.mxu0 %v7398_v12  ;;  %1213 = vmatpush1.bf16.msra.mxu1 %v7481_v34 }
 0x190   :  { %1173 = vmatprep.subr.bf16.mxu0 %v7401_v13  ;;  %1214 = vmatprep.subr.bf16.mxu1 %v7484_v35 }
 0x193   :  { %1174 = vmatpush1.bf16.msra.mxu0 %v7408_v17  ;;  %1215 = vmatpush1.bf16.msra.mxu1 %v7490_v36 }
 0x194   :  { %1175 = vmatprep.subr.bf16.mxu0 %v7413_v19  ;;  %1216 = vmatprep.subr.bf16.mxu1 %v7494_v37 }
 0x197   :  { %1176 = vmatpush1.bf16.msra.mxu0 %v7421_v21  ;;  %1217 = vmatpush1.bf16.msra.mxu1 %v7499_v38 }
 0x198   :  { %1177 = vmatprep.subr.bf16.mxu0 %v7424_v22  ;;  %1218 = vmatprep.subr.bf16.mxu1 %v7502_v39 }
 0x19b   :  { %1178 = vmatpush1.bf16.msra.mxu0 %v7432_v23  ;;  %1219 = vmatpush1.bf16.msra.mxu1 %v7507_v40 }
 0x19c   :  { %1179 = vmatprep.subr.bf16.mxu0 %v7439_v25  ;;  %1220 = vmatprep.subr.bf16.mxu1 %v7509_v41 }
 0x19f   :  { %1180 = vmatpush1.bf16.msra.mxu0 %v7441_v26  ;;  %1221 = vmatpush1.bf16.msra.mxu1 %v7513_v42 }
 0x1a0   :  { %1181 = vmatprep.subr.bf16.mxu0 %v7444_v27  ;;  %1222 = vmatprep.subr.bf16.mxu1 %v7515_v43 }
 0x1a3   :  { %1182 = vmatpush1.bf16.msra.mxu0 %v7450_v28  ;;  %1223 = vmatpush1.bf16.msra.mxu1 %v7519_v44 }
 0x1a4   :  { %1475 = vmatprep.subr.bf16.mxu0 %v7374_v4  ;;  %1516 = vmatprep.subr.bf16.mxu1 %v7455_v29 }
 0x259   :  { %v893_v22 = vpop.f32.mrb[16].mxu0  ;;  %v934_v23 = vpop.f32.mrb[24].mxu1 }
 0x25a   :  { %v941_v25 = vadd.f32 %v893_v22, %v7589_v45  ;;  %v943_v26 = vadd.f32 %v934_v23, %v7563_v55  ;;  %v895_v6 = vpop.f32.mrb[17].mxu0  ;;  %v936_v24 = vpop.f32.mrb[25].mxu1 }
 0x25b   :  { %v942_v27 = vadd.f32 %v895_v6, %v7594_v60  ;;  %v944_v11 = vadd.f32 %v936_v24, %v7566_v57  ;;  %v897_v20 = vpop.f32.mrb[18].mxu0  ;;  %v938_v28 = vpop.f32.mrb[26].mxu1 }
 0x25c   :  { %v5977_v63 = vmul.f32 -1.442695, %v941_v25  ;;  %v898_v16 = vpop.f32.mrb[19].mxu0  ;;  %v939_v46 = vpop.f32.mrb[27].mxu1 }
 0x25d   :  { %v5978_v4 = vmul.f32 -1.442695, %v942_v27  ;;  %v5979_v29 = vmul.f32 -1.442695, %v944_v11  ;;  %v7753_v46 = vld [vmem:[#allocation4 + $0x4] ss:$16 sps:$4 sm:$0xff]  }
 0x25e   :  { %6877 = vpow2.f32 %v5977_v63 }
 0x25f   :  { %6879 = vpow2.f32 %v5978_v4  ;;  %v7755_v4 = vld [vmem:[#allocation4 + $0xc] ss:$16 sps:$4 sm:$0xff]  }
 0x260   :  { %6881 = vpow2.f32 %v5979_v29  ;;  %v7757_v29 = vld [vmem:[#allocation4] ss:$16 sps:$4 sm:$0xff]  }
 0x261   :  { %6883 = vtanh.f32 %v943_v26 }
 0x268   :  { %v6878_v49 = vpop.eup %6877 }
 0x269   :  { %v6880_v56 = vpop.eup %6879  ;;  %v948_v45 = vadd.f32 1.0, %v6878_v49  ;;  %v7759_v49 = vld [vmem:[#allocation4 + $0x8] ss:$16 sps:$4 sm:$0xff]  }
 0x26a   :  { %v954_v55 = vadd.f32 1.0, %v6880_v56  ;;  %v6882_v60 = vpop.eup %6881  ;;  %v7765_v56 = vld [vmem:[#allocation4 + $0x24] ss:$16 sps:$4 sm:$0xff]  }
 0x26b   :  { %6885 = vrcp.f32 %v948_v45  ;;  %v6884_v54 = vpop.eup %6883  ;;  %v961_v50 = vadd.f32 1.0, %v6882_v60  ;;  %v7767_v45 = vld [vmem:[#allocation4 + $0x2c] ss:$16 sps:$4 sm:$0xff]   ;;  %v7771_v60 = vld [vmem:[#allocation4 + $0x28] ss:$16 sps:$4 sm:$0xff]  }
 0x26c   :  { %6887 = vrcp.f32 %v954_v55  ;;  %v7769_v55 = vld [vmem:[#allocation4 + $0x20] ss:$16 sps:$4 sm:$0xff]  }
 0x26d   :  { %6889 = vrcp.f32 %v961_v50  ;;  %v7789_v50 = vld [vmem:[#allocation4 + $0x64] ss:$16 sps:$4 sm:$0xff]  }
 0x275   :  { %v6886_v57 = vpop.eup %6885 }
 0x276   :  { %v6888_v0 = vpop.eup %6887  ;;  %v965_v18 = vmul.f32 %v6886_v57, %v6884_v54  ;;  %v7777_v54 = vld [vmem:[#allocation4 + $0x44] ss:$16 sps:$4 sm:$0xff]   ;;  %v7779_v57 = vld [vmem:[#allocation4 + $0x4c] ss:$16 sps:$4 sm:$0xff]  }
 0x277   :  { %v964_v52 = vmul.f32 %v6888_v0, %v7642_v51  ;;  %v6890_v58 = vpop.eup %6889  ;;  %v7781_v0 = vld [vmem:[#allocation4 + $0x40] ss:$16 sps:$4 sm:$0xff]  }
 0x279   :  { %v7688_v53 = vadd.f32 %v965_v18, %v964_v52  ;;  %v7783_v18 = vld [vmem:[#allocation4 + $0x48] ss:$16 sps:$4 sm:$0xff]   ;;  %v7791_v52 = vld [vmem:[#allocation4 + $0x6c] ss:$16 sps:$4 sm:$0xff]  }
 0x27b   :  { %6891 = vtanh.f32 %v7688_v53 }
 0x285   :  { %v6892_v62 = vpop.eup %6891 }
 0x286   :  { %v7691_v22 = vmul.f32 %v6892_v62, %v6890_v58  ;;  %v7795_v58 = vld [vmem:[#allocation4 + $0x68] ss:$16 sps:$4 sm:$0xff]   ;;  %v7801_v62 = vld [vmem:[#allocation4 + $0x84] ss:$16 sps:$4 sm:$0xff]  }
 0x288   :  { %v974_v23 = vpack.c.bf16 %v7691_v22, %v7691_v22 }
 0x28a   :  { %1200 = vmatmul.mubr.bf16.vlgmr.msra.gmra.mrb[20].mxu0 %v974_v23  ;;  %1241 = vmatmul.mubr.bf16.vlgmr.msra.gmra.mrb[28].mxu1 %v974_v23  ;;  %v7803_v23 = vld [vmem:[#allocation4 + $0x8c] ss:$16 sps:$4 sm:$0xff]  }
 0x28b   :  { %1476 = vmatpush1.bf16.msra.mxu0 %v7381_v7  ;;  %1517 = vmatpush1.bf16.msra.mxu1 %v7461_v30  ;;  %v7721_v7 = vld [vmem:[#allocation4 + $0xa0] ss:$16 sps:$4 sm:$0xff]  }
 0x28c   :  { %1477 = vmatprep.subr.bf16.mxu0 %v7384_v8  ;;  %1518 = vmatprep.subr.bf16.mxu1 %v7464_v31  ;;  %v7723_v8 = vld [vmem:[#allocation4 + $0xa4] ss:$16 sps:$4 sm:$0xff]  }
 0x28d   :  { %1507 = vmatprep.mubr.bf16.mxu0 %v8666_v3  ;;  %1548 = vmatprep.mubr.bf16.mxu1 %v8666_v3 }
 0x28f   :  { %1478 = vmatpush1.bf16.msra.mxu0 %v7388_v9  ;;  %1519 = vmatpush1.bf16.msra.mxu1 %v7470_v32  ;;  %v7725_v9 = vld [vmem:[#allocation4 + $0xc4] ss:$16 sps:$4 sm:$0xff]  }
 0x290   :  { %1479 = vmatprep.subr.bf16.mxu0 %v7392_v10  ;;  %1520 = vmatprep.subr.bf16.mxu1 %v7475_v33  ;;  %v7729_v10 = vld [vmem:[#allocation4 + $0xc0] ss:$16 sps:$4 sm:$0xff]  }
 0x293   :  { %1480 = vmatpush1.bf16.msra.mxu0 %v7398_v12  ;;  %1521 = vmatpush1.bf16.msra.mxu1 %v7481_v34  ;;  %v7732_v12 = vld [vmem:[#allocation4 + $0xe4] ss:$16 sps:$4 sm:$0xff]   ;;  %v8667_v34 = vld [vmem:[#allocation18_spill] sm:$0xff] }
 0x294   :  { %1481 = vmatprep.subr.bf16.mxu0 %v7401_v13  ;;  %1522 = vmatprep.subr.bf16.mxu1 %v7484_v35  ;;  %v7735_v13 = vld [vmem:[#allocation4 + $0xe0] ss:$16 sps:$4 sm:$0xff]  }
 0x297   :  { %1482 = vmatpush1.bf16.msra.mxu0 %v7408_v17  ;;  %1523 = vmatpush1.bf16.msra.mxu1 %v7490_v36 }
 0x298   :  { %1483 = vmatprep.subr.bf16.mxu0 %v7413_v19  ;;  %1524 = vmatprep.subr.bf16.mxu1 %v7494_v37 }
 0x29b   :  { %1484 = vmatpush1.bf16.msra.mxu0 %v7421_v21  ;;  %1525 = vmatpush1.bf16.msra.mxu1 %v7499_v38 }
 0x29c   :  { %1526 = vmatprep.subr.bf16.mxu1 %v7502_v39  ;;  %1485 = vmatprep.subr.bf16.mxu0 %v7723_v8 }
 0x29f   :  { %1527 = vmatpush1.bf16.msra.mxu1 %v7507_v40  ;;  %1486 = vmatpush1.bf16.msra.mxu0 %v7721_v7 }
 0x2a0   :  { %1528 = vmatprep.subr.bf16.mxu1 %v7509_v41  ;;  %1487 = vmatprep.subr.bf16.mxu0 %v7725_v9 }
 0x2a3   :  { %1529 = vmatpush1.bf16.msra.mxu1 %v7513_v42  ;;  %1488 = vmatpush1.bf16.msra.mxu0 %v7729_v10 }
 0x2a4   :  { %1530 = vmatprep.subr.bf16.mxu1 %v7515_v43  ;;  %1489 = vmatprep.subr.bf16.mxu0 %v7732_v12 }
 0x2a7   :  { %1531 = vmatpush1.bf16.msra.mxu1 %v7519_v44  ;;  %1490 = vmatpush1.bf16.msra.mxu0 %v7735_v13 }
 0x2a8   :  { %1783 = vmatprep.subr.bf16.mxu0 %v7753_v46  ;;  %1824 = vmatprep.subr.bf16.mxu1 %v7755_v4 }
 0x35d   :  { %v1201_v17 = vpop.f32.mrb[20].mxu0  ;;  %v1242_v19 = vpop.f32.mrb[28].mxu1 }
 0x35e   :  { %v1249_v21 = vadd.f32 %v1201_v17, %v7602_v15  ;;  %v1251_v30 = vadd.f32 %v1242_v19, %v7569_v59  ;;  %v1203_v31 = vpop.f32.mrb[21].mxu0  ;;  %v1244_v32 = vpop.f32.mrb[29].mxu1  ;;  %v7805_v17 = vld [vmem:[#allocation4 + $0x80] ss:$16 sps:$4 sm:$0xff]   ;;  %v7807_v19 = vld [vmem:[#allocation4 + $0x88] ss:$16 sps:$4 sm:$0xff]  }
 0x35f   :  { %v1250_v33 = vadd.f32 %v1203_v31, %v7604_v47  ;;  %v1252_v35 = vadd.f32 %v1244_v32, %v8667_v34  ;;  %v1205_v36 = vpop.f32.mrb[22].mxu0  ;;  %v1246_v37 = vpop.f32.mrb[30].mxu1  ;;  %v7819_v31 = vld [vmem:[#allocation4 + $0xcc] ss:$16 sps:$4 sm:$0xff]   ;;  %v7823_v32 = vld [vmem:[#allocation4 + $0xc8] ss:$16 sps:$4 sm:$0xff]  }
 0x360   :  { %v6012_v38 = vmul.f32 -1.442695, %v1249_v21  ;;  %v1206_v39 = vpop.f32.mrb[23].mxu0  ;;  %v1247_v40 = vpop.f32.mrb[31].mxu1  ;;  %v7811_v21 = vld [vmem:[#allocation4 + $0xac] ss:$16 sps:$4 sm:$0xff]  }
 0x361   :  { %v6013_v41 = vmul.f32 -1.442695, %v1250_v33  ;;  %v6014_v42 = vmul.f32 -1.442695, %v1252_v35  ;;  %v7827_v33 = vld [vmem:[#allocation4 + $0xec] ss:$16 sps:$4 sm:$0xff]  }
 0x362   :  { %6893 = vpow2.f32 %v6012_v38  ;;  %v7831_v34 = vld [vmem:[#allocation4 + $0xe8] ss:$16 sps:$4 sm:$0xff]   ;;  %v8669_v39 = vld [vmem:[#allocation19_spill] sm:$0xff] }
 0x363   :  { %6895 = vpow2.f32 %v6013_v41  ;;  %v8668_v37 = vld [vmem:[#allocation26_spill] sm:$0xff] }
 0x364   :  { %6897 = vpow2.f32 %v6014_v42 }
 0x365   :  { %6899 = vtanh.f32 %v1251_v30  ;;  %v7815_v30 = vld [vmem:[#allocation4 + $0xa8] ss:$16 sps:$4 sm:$0xff]  }
 0x36c   :  { %v6894_v43 = vpop.eup %6893 }
 0x36d   :  { %v6896_v44 = vpop.eup %6895  ;;  %v1256_v15 = vadd.f32 1.0, %v6894_v43  ;;  %v8670_v43 = vld [vmem:[#allocation28_spill] sm:$0xff] }
 0x36e   :  { %v1262_v59 = vadd.f32 1.0, %v6896_v44  ;;  %v6898_v47 = vpop.eup %6897 }
 0x36f   :  { %6901 = vrcp.f32 %v1256_v15  ;;  %v6900_v51 = vpop.eup %6899  ;;  %v1269_v24 = vadd.f32 1.0, %v6898_v47  ;;  %v8671_v15 = vld [vmem:[#allocation20_spill] sm:$0xff] }
 0x370   :  { %6903 = vrcp.f32 %v1262_v59 }
 0x371   :  { %6905 = vrcp.f32 %v1269_v24 }
 0x379   :  { %v6902_v25 = vpop.eup %6901 }
 0x37a   :  { %v6904_v26 = vpop.eup %6903  ;;  %v1273_v6 = vmul.f32 %v6902_v25, %v6900_v51 }
 0x37b   :  { %v1272_v27 = vmul.f32 %v6904_v26, %v7688_v53  ;;  %v6906_v20 = vpop.eup %6905  ;;  %v7793_v53 = vld [vmem:[#allocation4 + $0x60] ss:$16 sps:$4 sm:$0xff]  }
 0x37d   :  { %v7744_v11 = vadd.f32 %v1273_v6, %v1272_v27 }
 0x37f   :  { %6907 = vtanh.f32 %v7744_v11 }
 0x389   :  { %v6908_v28 = vpop.eup %6907 }
 0x38a   :  { %v7747_v63 = vmul.f32 %v6908_v28, %v6906_v20 }
 0x38c   :  { %v1282_v16 = vpack.c.bf16 %v7747_v63, %v7747_v63 }
 0x38e   :  { %1508 = vmatmul.mubr.bf16.vlgmr.msra.gmra.mrb[24].mxu0 %v1282_v16  ;;  %1549 = vmatmul.mubr.bf16.vlgmr.msra.gmra.mrb[32].mxu1 %v1282_v16 }
 0x38f   :  { %1815 = vmatprep.mubr.bf16.mxu0 %v8666_v3  ;;  %1856 = vmatprep.mubr.bf16.mxu1 %v8666_v3 }
 0x390   :  { %1784 = vmatpush1.bf16.msra.mxu0 %v7757_v29  ;;  %1825 = vmatpush1.bf16.msra.mxu1 %v7759_v49 }
 0x391   :  { %1785 = vmatprep.subr.bf16.mxu0 %v7765_v56  ;;  %1826 = vmatprep.subr.bf16.mxu1 %v7767_v45 }
 0x394   :  { %1786 = vmatpush1.bf16.msra.mxu0 %v7769_v55  ;;  %1827 = vmatpush1.bf16.msra.mxu1 %v7771_v60 }
 0x395   :  { %1787 = vmatprep.subr.bf16.mxu0 %v7777_v54  ;;  %1828 = vmatprep.subr.bf16.mxu1 %v7779_v57 }
 0x398   :  { %1788 = vmatpush1.bf16.msra.mxu0 %v7781_v0  ;;  %1829 = vmatpush1.bf16.msra.mxu1 %v7783_v18 }
 0x399   :  { %1789 = vmatprep.subr.bf16.mxu0 %v7789_v50  ;;  %1830 = vmatprep.subr.bf16.mxu1 %v7791_v52 }
 0x39c   :  { %1790 = vmatpush1.bf16.msra.mxu0 %v7793_v53  ;;  %1831 = vmatpush1.bf16.msra.mxu1 %v7795_v58 }
 0x39d   :  { %1791 = vmatprep.subr.bf16.mxu0 %v7801_v62  ;;  %1832 = vmatprep.subr.bf16.mxu1 %v7803_v23 }
 0x3a0   :  { %1792 = vmatpush1.bf16.msra.mxu0 %v7805_v17  ;;  %1833 = vmatpush1.bf16.msra.mxu1 %v7807_v19 }
 0x3a1   :  { %1793 = vmatprep.subr.bf16.mxu0 %v7723_v8  ;;  %1834 = vmatprep.subr.bf16.mxu1 %v7811_v21 }
 0x3a4   :  { %1794 = vmatpush1.bf16.msra.mxu0 %v7721_v7  ;;  %1835 = vmatpush1.bf16.msra.mxu1 %v7815_v30 }
 0x3a5   :  { %1795 = vmatprep.subr.bf16.mxu0 %v7725_v9  ;;  %1836 = vmatprep.subr.bf16.mxu1 %v7819_v31 }
 0x3a8   :  { %1796 = vmatpush1.bf16.msra.mxu0 %v7729_v10  ;;  %1837 = vmatpush1.bf16.msra.mxu1 %v7823_v32 }
 0x3a9   :  { %1797 = vmatprep.subr.bf16.mxu0 %v7732_v12  ;;  %1838 = vmatprep.subr.bf16.mxu1 %v7827_v33 }
 0x3ac   :  { %1798 = vmatpush1.bf16.msra.mxu0 %v7735_v13  ;;  %1839 = vmatpush1.bf16.msra.mxu1 %v7831_v34 }
 0x3ad   :  { %2091 = vmatprep.subr.bf16.mxu0 %v7753_v46  ;;  %2132 = vmatprep.subr.bf16.mxu1 %v7755_v4 }
 0x461   :  { %v1509_v35 = vpop.f32.mrb[24].mxu0  ;;  %v1550_v36 = vpop.f32.mrb[32].mxu1 }
 0x462   :  { %v1557_v38 = vadd.f32 %v1509_v35, %v8668_v37  ;;  %v1559_v40 = vadd.f32 %v1550_v36, %v8669_v39  ;;  %v1511_v41 = vpop.f32.mrb[25].mxu0  ;;  %v1552_v42 = vpop.f32.mrb[33].mxu1 }
 0x463   :  { %v1558_v44 = vadd.f32 %v1511_v41, %v8670_v43  ;;  %v1560_v59 = vadd.f32 %v1552_v42, %v8671_v15  ;;  %v1513_v47 = vpop.f32.mrb[26].mxu0  ;;  %v1554_v51 = vpop.f32.mrb[34].mxu1 }
 0x464   :  { %v6047_v25 = vmul.f32 -1.442695, %v1557_v38  ;;  %v1514_v26 = vpop.f32.mrb[27].mxu0  ;;  %v1555_v6 = vpop.f32.mrb[35].mxu1 }
 0x465   :  { %v6048_v24 = vmul.f32 -1.442695, %v1558_v44  ;;  %v6049_v27 = vmul.f32 -1.442695, %v1560_v59  ;;  %v8673_v6 = vld [vmem:[#allocation21_spill] sm:$0xff] }
 0x466   :  { %6909 = vpow2.f32 %v6047_v25  ;;  %v8672_v25 = vld [vmem:[#allocation31_spill] sm:$0xff] }
 0x467   :  { %6911 = vpow2.f32 %v6048_v24 }
 0x468   :  { %6913 = vpow2.f32 %v6049_v27 }
 0x469   :  { %6915 = vtanh.f32 %v1559_v40 }
 0x470   :  { %v6910_v20 = vpop.eup %6909 }
 0x471   :  { %v6912_v28 = vpop.eup %6911  ;;  %v1564_v16 = vadd.f32 1.0, %v6910_v20 }
 0x472   :  { %v1570_v35 = vadd.f32 1.0, %v6912_v28  ;;  %v6914_v36 = vpop.eup %6913  ;;  %v8674_v28 = vld [vmem:[#allocation32_spill] sm:$0xff] }
 0x473   :  { %6917 = vrcp.f32 %v1564_v16  ;;  %v6916_v37 = vpop.eup %6915  ;;  %v1577_v38 = vadd.f32 1.0, %v6914_v36 }
 0x474   :  { %6919 = vrcp.f32 %v1570_v35  ;;  %v8675_v35 = vld [vmem:[#allocation22_spill] sm:$0xff] }
 0x475   :  { %6921 = vrcp.f32 %v1577_v38 }
 0x47d   :  { %v6918_v39 = vpop.eup %6917 }
 0x47e   :  { %v6920_v41 = vpop.eup %6919  ;;  %v1581_v42 = vmul.f32 %v6918_v39, %v6916_v37 }
 0x47f   :  { %v1580_v43 = vmul.f32 %v6920_v41, %v7744_v11  ;;  %v6922_v15 = vpop.eup %6921 }
 0x481   :  { %v7844_v44 = vadd.f32 %v1581_v42, %v1580_v43 }
 0x483   :  { %6923 = vtanh.f32 %v7844_v44 }
 0x48d   :  { %v6924_v59 = vpop.eup %6923 }
 0x48e   :  { %v7847_v47 = vmul.f32 %v6924_v59, %v6922_v15 }
 0x490   :  { %v1590_v40 = vpack.c.bf16 %v7847_v47, %v7847_v47 }
 0x492   :  { %1816 = vmatmul.mubr.bf16.vlgmr.msra.gmra.mrb[28].mxu0 %v1590_v40  ;;  %1857 = vmatmul.mubr.bf16.vlgmr.msra.gmra.mrb[36].mxu1 %v1590_v40 }
 0x493   :  { %2092 = vmatpush1.bf16.msra.mxu0 %v7757_v29  ;;  %2133 = vmatpush1.bf16.msra.mxu1 %v7759_v49 }
 0x494   :  { %2093 = vmatprep.subr.bf16.mxu0 %v7765_v56  ;;  %2134 = vmatprep.subr.bf16.mxu1 %v7767_v45 }
 0x495   :  { %2123 = vmatprep.mubr.bf16.mxu0 %v8666_v3  ;;  %2164 = vmatprep.mubr.bf16.mxu1 %v8666_v3 }
 0x497   :  { %2094 = vmatpush1.bf16.msra.mxu0 %v7769_v55  ;;  %2135 = vmatpush1.bf16.msra.mxu1 %v7771_v60 }
 0x498   :  { %2095 = vmatprep.subr.bf16.mxu0 %v7777_v54  ;;  %2136 = vmatprep.subr.bf16.mxu1 %v7779_v57 }
 0x49b   :  { %2096 = vmatpush1.bf16.msra.mxu0 %v7781_v0  ;;  %2137 = vmatpush1.bf16.msra.mxu1 %v7783_v18 }
 0x49c   :  { %2097 = vmatprep.subr.bf16.mxu0 %v7789_v50  ;;  %2138 = vmatprep.subr.bf16.mxu1 %v7791_v52 }
 0x49f   :  { %2098 = vmatpush1.bf16.msra.mxu0 %v7793_v53  ;;  %2139 = vmatpush1.bf16.msra.mxu1 %v7795_v58 }
 0x4a0   :  { %2099 = vmatprep.subr.bf16.mxu0 %v7801_v62  ;;  %2140 = vmatprep.subr.bf16.mxu1 %v7803_v23 }
 0x4a3   :  { %2100 = vmatpush1.bf16.msra.mxu0 %v7805_v17  ;;  %2141 = vmatpush1.bf16.msra.mxu1 %v7807_v19 }
 0x4a4   :  { %2101 = vmatprep.subr.bf16.mxu0 %v7723_v8  ;;  %2142 = vmatprep.subr.bf16.mxu1 %v7811_v21 }
 0x4a7   :  { %2102 = vmatpush1.bf16.msra.mxu0 %v7721_v7  ;;  %2143 = vmatpush1.bf16.msra.mxu1 %v7815_v30 }
 0x4a8   :  { %2103 = vmatprep.subr.bf16.mxu0 %v7725_v9  ;;  %2144 = vmatprep.subr.bf16.mxu1 %v7819_v31 }
 0x4ab   :  { %2104 = vmatpush1.bf16.msra.mxu0 %v7729_v10  ;;  %2145 = vmatpush1.bf16.msra.mxu1 %v7823_v32 }
 0x4ac   :  { %2105 = vmatprep.subr.bf16.mxu0 %v7732_v12  ;;  %2146 = vmatprep.subr.bf16.mxu1 %v7827_v33 }
 0x4af   :  { %2106 = vmatpush1.bf16.msra.mxu0 %v7735_v13  ;;  %2147 = vmatpush1.bf16.msra.mxu1 %v7831_v34 }
 0x4b0   :  { %2399 = vmatprep.subr.bf16.mxu0 %v7753_v46  ;;  %2440 = vmatprep.subr.bf16.mxu1 %v7755_v4 }
 0x565   :  { %v1817_v11 = vpop.f32.mrb[28].mxu0  ;;  %v1858_v51 = vpop.f32.mrb[36].mxu1 }
 0x566   :  { %v1865_v26 = vadd.f32 %v1817_v11, %v8672_v25  ;;  %v1867_v24 = vadd.f32 %v1858_v51, %v8673_v6  ;;  %v1819_v27 = vpop.f32.mrb[29].mxu0  ;;  %v1860_v20 = vpop.f32.mrb[37].mxu1 }
 0x567   :  { %v1866_v16 = vadd.f32 %v1819_v27, %v8674_v28  ;;  %v1868_v36 = vadd.f32 %v1860_v20, %v8675_v35  ;;  %v1821_v37 = vpop.f32.mrb[30].mxu0  ;;  %v1862_v39 = vpop.f32.mrb[38].mxu1 }
 0x568   :  { %v6082_v41 = vmul.f32 -1.442695, %v1865_v26  ;;  %v1822_v42 = vpop.f32.mrb[31].mxu0  ;;  %v1863_v38 = vpop.f32.mrb[39].mxu1 }
 0x569   :  { %v6083_v43 = vmul.f32 -1.442695, %v1866_v16  ;;  %v6084_v15 = vmul.f32 -1.442695, %v1868_v36  ;;  %v8677_v38 = vld [vmem:[#allocation24_spill] sm:$0xff] }
 0x56a   :  { %6925 = vpow2.f32 %v6082_v41 }
 0x56b   :  { %6927 = vpow2.f32 %v6083_v43 }
 0x56c   :  { %6929 = vpow2.f32 %v6084_v15 }
 0x56d   :  { %6931 = vtanh.f32 %v1867_v24 }
 0x574   :  { %v6926_v59 = vpop.eup %6925 }
 0x575   :  { %v6928_v40 = vpop.eup %6927  ;;  %v1872_v11 = vadd.f32 1.0, %v6926_v59 }
 0x576   :  { %v1878_v51 = vadd.f32 1.0, %v6928_v40  ;;  %v6930_v25 = vpop.eup %6929 }
 0x577   :  { %6933 = vrcp.f32 %v1872_v11  ;;  %v6932_v6 = vpop.eup %6931  ;;  %v1885_v26 = vadd.f32 1.0, %v6930_v25 }
 0x578   :  { %6935 = vrcp.f32 %v1878_v51 }
 0x579   :  { %6937 = vrcp.f32 %v1885_v26 }
 0x581   :  { %v6934_v27 = vpop.eup %6933 }
 0x582   :  { %v6936_v20 = vpop.eup %6935  ;;  %v1889_v28 = vmul.f32 %v6934_v27, %v6932_v6 }
 0x583   :  { %v1888_v35 = vmul.f32 %v6936_v20, %v7844_v44  ;;  %v6938_v36 = vpop.eup %6937  ;;  %v8676_v44 = vld [vmem:[#allocation23_spill] sm:$0xff] }
 0x585   :  { %v7890_v16 = vadd.f32 %v1889_v28, %v1888_v35 }
 0x587   :  { %6939 = vtanh.f32 %v7890_v16 }
 0x591   :  { %v6940_v37 = vpop.eup %6939 }
 0x592   :  { %v7893_v39 = vmul.f32 %v6940_v37, %v6938_v36 }
 0x594   :  { %v1898_v24 = vpack.c.bf16 %v7893_v39, %v7893_v39 }
 0x596   :  { %2124 = vmatmul.mubr.bf16.vlgmr.msra.gmra.mrb[32].mxu0 %v1898_v24  ;;  %2165 = vmatmul.mubr.bf16.vlgmr.msra.gmra.mrb[40].mxu1 %v1898_v24 }
 0x597   :  { %2400 = vmatpush1.bf16.msra.mxu0 %v7757_v29  ;;  %2441 = vmatpush1.bf16.msra.mxu1 %v7759_v49 }
 0x598   :  { %2401 = vmatprep.subr.bf16.mxu0 %v7765_v56  ;;  %2442 = vmatprep.subr.bf16.mxu1 %v7767_v45 }
 0x599   :  { %2431 = vmatprep.mubr.bf16.mxu0 %v8666_v3  ;;  %2472 = vmatprep.mubr.bf16.mxu1 %v8666_v3 }
 0x59b   :  { %2402 = vmatpush1.bf16.msra.mxu0 %v7769_v55  ;;  %2443 = vmatpush1.bf16.msra.mxu1 %v7771_v60 }
 0x59c   :  { %2403 = vmatprep.subr.bf16.mxu0 %v7777_v54  ;;  %2444 = vmatprep.subr.bf16.mxu1 %v7779_v57 }
 0x59f   :  { %2404 = vmatpush1.bf16.msra.mxu0 %v7781_v0  ;;  %2445 = vmatpush1.bf16.msra.mxu1 %v7783_v18 }
 0x5a0   :  { %2405 = vmatprep.subr.bf16.mxu0 %v7789_v50  ;;  %2446 = vmatprep.subr.bf16.mxu1 %v7791_v52 }
 0x5a3   :  { %2406 = vmatpush1.bf16.msra.mxu0 %v7793_v53  ;;  %2447 = vmatpush1.bf16.msra.mxu1 %v7795_v58 }
 0x5a4   :  { %2407 = vmatprep.subr.bf16.mxu0 %v7801_v62  ;;  %2448 = vmatprep.subr.bf16.mxu1 %v7803_v23 }
 0x5a7   :  { %2408 = vmatpush1.bf16.msra.mxu0 %v7805_v17  ;;  %2449 = vmatpush1.bf16.msra.mxu1 %v7807_v19 }
 0x5a8   :  { %2409 = vmatprep.subr.bf16.mxu0 %v7723_v8  ;;  %2450 = vmatprep.subr.bf16.mxu1 %v7811_v21 }
 0x5ab   :  { %2410 = vmatpush1.bf16.msra.mxu0 %v7721_v7  ;;  %2451 = vmatpush1.bf16.msra.mxu1 %v7815_v30 }
 0x5ac   :  { %2411 = vmatprep.subr.bf16.mxu0 %v7725_v9  ;;  %2452 = vmatprep.subr.bf16.mxu1 %v7819_v31 }
 0x5af   :  { %2412 = vmatpush1.bf16.msra.mxu0 %v7729_v10  ;;  %2453 = vmatpush1.bf16.msra.mxu1 %v7823_v32 }
 0x5b0   :  { %2413 = vmatprep.subr.bf16.mxu0 %v7732_v12  ;;  %2454 = vmatprep.subr.bf16.mxu1 %v7827_v33 }
 0x5b3   :  { %2414 = vmatpush1.bf16.msra.mxu0 %v7735_v13  ;;  %2455 = vmatpush1.bf16.msra.mxu1 %v7831_v34 }
 0x5b4   :  { %2707 = vmatprep.subr.bf16.mxu0 %v7753_v46  ;;  %2748 = vmatprep.subr.bf16.mxu1 %v7755_v4 }
 0x669   :  { %v2125_v7 = vpop.f32.mrb[32].mxu0  ;;  %v2166_v8 = vpop.f32.mrb[40].mxu1 }
 0x66a   :  { %v2173_v9 = vadd.f32 %v2125_v7, %v7626_v48  ;;  %v2175_v10 = vadd.f32 %v2166_v8, %v8676_v44  ;;  %v2127_v41 = vpop.f32.mrb[33].mxu0  ;;  %v2168_v42 = vpop.f32.mrb[41].mxu1 }
 0x66b   :  { %v2174_v12 = vadd.f32 %v2127_v41, %v7628_v61  ;;  %v2176_v43 = vadd.f32 %v2168_v42, %v8677_v38  ;;  %v2129_v15 = vpop.f32.mrb[34].mxu0  ;;  %v2170_v13 = vpop.f32.mrb[42].mxu1 }
 0x66c   :  { %v6117_v59 = vmul.f32 -1.442695, %v2173_v9  ;;  %v2130_v40 = vpop.f32.mrb[35].mxu0  ;;  %v2171_v11 = vpop.f32.mrb[43].mxu1 }
 0x66d   :  { %v6118_v46 = vmul.f32 -1.442695, %v2174_v12  ;;  %v6119_v4 = vmul.f32 -1.442695, %v2176_v43 }
 0x66e   :  { %6941 = vpow2.f32 %v6117_v59 }
 0x66f   :  { %6943 = vpow2.f32 %v6118_v46 }
 0x670   :  { %6945 = vpow2.f32 %v6119_v4  ;;  %v6709_v4 = vld [vmem:[#allocation7] ss:$16 sps:$4 sm:$0xff]  }
 0x671   :  { %6947 = vtanh.f32 %v2175_v10 }
 0x678   :  { %v6942_v51 = vpop.eup %6941 }
 0x679   :  { %v6944_v25 = vpop.eup %6943  ;;  %v2180_v48 = vadd.f32 1.0, %v6942_v51  ;;  %v6712_v51 = vld [vmem:[#allocation7 + $0x8] ss:$16 sps:$4 sm:$0xff]  }
 0x67a   :  { %v2186_v6 = vadd.f32 1.0, %v6944_v25  ;;  %v6946_v61 = vpop.eup %6945 }
 0x67b   :  { %6949 = vrcp.f32 %v2180_v48  ;;  %v6948_v27 = vpop.eup %6947  ;;  %v2193_v35 = vadd.f32 1.0, %v6946_v61  ;;  %v6717_v48 = vld [vmem:[#allocation7 + $0x24] ss:$16 sps:$4 sm:$0xff]   ;;  %v6715_v61 = vld [vmem:[#allocation7 + $0x20] ss:$16 sps:$4 sm:$0xff]  }
 0x67c   :  { %6951 = vrcp.f32 %v2186_v6  ;;  %v6720_v6 = vld [vmem:[#allocation7 + $0x2c] ss:$16 sps:$4 sm:$0xff]  }
 0x67d   :  { %6953 = vrcp.f32 %v2193_v35  ;;  %v6724_v35 = vld [vmem:[#allocation7 + $0x48] ss:$16 sps:$4 sm:$0xff]  }
 0x685   :  { %v6950_v20 = vpop.eup %6949 }
 0x686   :  { %v6952_v28 = vpop.eup %6951  ;;  %v2197_v26 = vmul.f32 %v6950_v20, %v6948_v27  ;;  %v6718_v27 = vld [vmem:[#allocation7 + $0x28] ss:$16 sps:$4 sm:$0xff]   ;;  %v6723_v20 = vld [vmem:[#allocation7 + $0x44] ss:$16 sps:$4 sm:$0xff]  }
 0x687   :  { %v2196_v36 = vmul.f32 %v6952_v28, %v7890_v16  ;;  %v6954_v24 = vpop.eup %6953  ;;  %v6726_v28 = vld [vmem:[#allocation7 + $0x4c] ss:$16 sps:$4 sm:$0xff]  }
 0x689   :  { %v7936_v37 = vadd.f32 %v2197_v26, %v2196_v36  ;;  %v6721_v26 = vld [vmem:[#allocation7 + $0x40] ss:$16 sps:$4 sm:$0xff]   ;;  %v6729_v36 = vld [vmem:[#allocation7 + $0x64] ss:$16 sps:$4 sm:$0xff]  }
 0x68b   :  { %6955 = vtanh.f32 %v7936_v37 }
 0x695   :  { %v6956_v7 = vpop.eup %6955 }
 0x696   :  { %v7939_v8 = vmul.f32 %v6956_v7, %v6954_v24  ;;  %v6727_v24 = vld [vmem:[#allocation7 + $0x60] ss:$16 sps:$4 sm:$0xff]   ;;  %v6730_v7 = vld [vmem:[#allocation7 + $0x68] ss:$16 sps:$4 sm:$0xff]  }
 0x698   :  { %v2206_v9 = vpack.c.bf16 %v7939_v8, %v7939_v8 }
 0x69a   :  { %2432 = vmatmul.mubr.bf16.vlgmr.msra.gmra.mrb[36].mxu0 %v2206_v9  ;;  %2473 = vmatmul.mubr.bf16.vlgmr.msra.gmra.mrb[44].mxu1 %v2206_v9  ;;  %v6735_v9 = vld [vmem:[#allocation7 + $0x84] ss:$16 sps:$4 sm:$0xff]  }
 0x69b   :  { %2708 = vmatpush1.bf16.msra.mxu0 %v7757_v29  ;;  %2749 = vmatpush1.bf16.msra.mxu1 %v7759_v49  ;;  %v6700_v29 = vld [vmem:[#allocation4 + $0xa0] ss:$16 sps:$4 sm:$0xff]   ;;  %v6702_v49 = vld [vmem:[#allocation4 + $0xa4] ss:$16 sps:$4 sm:$0xff]  }
 0x69c   :  { %2709 = vmatprep.subr.bf16.mxu0 %v7765_v56  ;;  %2750 = vmatprep.subr.bf16.mxu1 %v7767_v45  ;;  %v6705_v56 = vld [vmem:[#allocation4 + $0xc4] ss:$16 sps:$4 sm:$0xff]   ;;  %v6703_v45 = vld [vmem:[#allocation4 + $0xc0] ss:$16 sps:$4 sm:$0xff]  }
 0x69d   :  { %2739 = vmatprep.mubr.bf16.mxu0 %v8666_v3  ;;  %2780 = vmatprep.mubr.bf16.mxu1 %v8666_v3 }
 0x69f   :  { %2710 = vmatpush1.bf16.msra.mxu0 %v7769_v55  ;;  %2751 = vmatpush1.bf16.msra.mxu1 %v7771_v60  ;;  %v6714_v55 = vld [vmem:[#allocation7 + $0xc] ss:$16 sps:$4 sm:$0xff]   ;;  %v6708_v60 = vld [vmem:[#allocation4 + $0xe4] ss:$16 sps:$4 sm:$0xff]  }
 0x6a0   :  { %2711 = vmatprep.subr.bf16.mxu0 %v7777_v54  ;;  %2752 = vmatprep.subr.bf16.mxu1 %v7779_v57  ;;  %v6706_v54 = vld [vmem:[#allocation4 + $0xe0] ss:$16 sps:$4 sm:$0xff]   ;;  %v6711_v57 = vld [vmem:[#allocation7 + $0x4] ss:$16 sps:$4 sm:$0xff]  }
 0x6a3   :  { %2712 = vmatpush1.bf16.msra.mxu0 %v7781_v0  ;;  %2753 = vmatpush1.bf16.msra.mxu1 %v7783_v18 }
 0x6a4   :  { %2713 = vmatprep.subr.bf16.mxu0 %v7789_v50  ;;  %2754 = vmatprep.subr.bf16.mxu1 %v7791_v52  ;;  %v8678_v52 = vld [vmem:[#allocation25_spill] sm:$0xff] }
 0x6a7   :  { %2714 = vmatpush1.bf16.msra.mxu0 %v7793_v53  ;;  %2755 = vmatpush1.bf16.msra.mxu1 %v7795_v58 }
 0x6a8   :  { %2715 = vmatprep.subr.bf16.mxu0 %v7801_v62  ;;  %2756 = vmatprep.subr.bf16.mxu1 %v7803_v23 }
 0x6ab   :  { %2716 = vmatpush1.bf16.msra.mxu0 %v7805_v17  ;;  %2757 = vmatpush1.bf16.msra.mxu1 %v7807_v19  ;;  %v8679_v17 = vld [vmem:[#allocation27_spill] sm:$0xff] }
 0x6ac   :  { %2758 = vmatprep.subr.bf16.mxu1 %v7811_v21  ;;  %2717 = vmatprep.subr.bf16.mxu0 %v6702_v49  ;;  %v6733_v49 = vld [vmem:[#allocation7 + $0x80] ss:$16 sps:$4 sm:$0xff]  }
 0x6af   :  { %2759 = vmatpush1.bf16.msra.mxu1 %v7815_v30  ;;  %2718 = vmatpush1.bf16.msra.mxu0 %v6700_v29  ;;  %v6738_v29 = vld [vmem:[#allocation7 + $0x8c] ss:$16 sps:$4 sm:$0xff]  }
 0x6b0   :  { %2760 = vmatprep.subr.bf16.mxu1 %v7819_v31  ;;  %2719 = vmatprep.subr.bf16.mxu0 %v6705_v56  ;;  %v6736_v56 = vld [vmem:[#allocation7 + $0x88] ss:$16 sps:$4 sm:$0xff]  }
 0x6b3   :  { %2761 = vmatpush1.bf16.msra.mxu1 %v7823_v32  ;;  %2720 = vmatpush1.bf16.msra.mxu0 %v6703_v45  ;;  %v6741_v45 = vld [vmem:[#allocation7 + $0xa4] ss:$16 sps:$4 sm:$0xff]  }
 0x6b4   :  { %2762 = vmatprep.subr.bf16.mxu1 %v7827_v33  ;;  %2721 = vmatprep.subr.bf16.mxu0 %v6708_v60  ;;  %v6739_v60 = vld [vmem:[#allocation7 + $0xa0] ss:$16 sps:$4 sm:$0xff]  }
 0x6b7   :  { %2763 = vmatpush1.bf16.msra.mxu1 %v7831_v34  ;;  %2722 = vmatpush1.bf16.msra.mxu0 %v6706_v54  ;;  %v6742_v54 = vld [vmem:[#allocation7 + $0xa8] ss:$16 sps:$4 sm:$0xff]  }
 0x6b8   :  { %3117 = vmatprep.subr.bf16.mxu1 %v6714_v55  ;;  %3044 = vmatprep.subr.bf16.mxu0 %v6711_v57  ;;  %v6744_v55 = vld [vmem:[#allocation7 + $0xac] ss:$16 sps:$4 sm:$0xff]   ;;  %v6747_v57 = vld [vmem:[#allocation7 + $0xc4] ss:$16 sps:$4 sm:$0xff]  }
 0x76d   :  { %v2433_v0 = vpop.f32.mrb[36].mxu0  ;;  %v2474_v18 = vpop.f32.mrb[44].mxu1 }
 0x76e   :  { %v2481_v50 = vadd.f32 %v2433_v0, %v7630_v14  ;;  %v2483_v53 = vadd.f32 %v2474_v18, %v8678_v52  ;;  %v2435_v58 = vpop.f32.mrb[37].mxu0  ;;  %v2476_v62 = vpop.f32.mrb[45].mxu1  ;;  %v6750_v0 = vld [vmem:[#allocation7 + $0xcc] ss:$16 sps:$4 sm:$0xff]   ;;  %v6745_v18 = vld [vmem:[#allocation7 + $0xc0] ss:$16 sps:$4 sm:$0xff]  }
 0x76f   :  { %v2482_v23 = vadd.f32 %v2435_v58, %v7632_v5  ;;  %v2484_v19 = vadd.f32 %v2476_v62, %v8679_v17  ;;  %v2437_v21 = vpop.f32.mrb[38].mxu0  ;;  %v2478_v30 = vpop.f32.mrb[46].mxu1  ;;  %v6753_v52 = vld [vmem:[#allocation7 + $0xe4] ss:$16 sps:$4 sm:$0xff]   ;;  %v6751_v58 = vld [vmem:[#allocation7 + $0xe0] ss:$16 sps:$4 sm:$0xff]   ;;  %v2827_v17 = vpack.c.bf16 %v7847_v47, %v7747_v63 }
 0x770   :  { %v6152_v31 = vmul.f32 -1.442695, %v2481_v50  ;;  %v2438_v32 = vpop.f32.mrb[39].mxu0  ;;  %v2479_v33 = vpop.f32.mrb[47].mxu1  ;;  %v6748_v50 = vld [vmem:[#allocation7 + $0xc8] ss:$16 sps:$4 sm:$0xff]  }
 0x771   :  { %v6153_v34 = vmul.f32 -1.442695, %v2482_v23  ;;  %v6154_v16 = vmul.f32 -1.442695, %v2484_v19  ;;  %v6754_v62 = vld [vmem:[#allocation7 + $0xe8] ss:$16 sps:$4 sm:$0xff]   ;;  %v2826_v23 = vpack.c.bf16 %v7691_v22, %v7645_v1  ;;  %v2828_v19 = vpack.c.bf16 %v7939_v8, %v7893_v39 }
 0x772   :  { %6957 = vpow2.f32 %v6152_v31  ;;  %v7995_v1 = vld [vmem:[#allocation9 + $0x4] ss:$16 sps:$4 sm:$0xff]   ;;  %v7997_v22 = vld [vmem:[#allocation9 + $0xc] ss:$16 sps:$4 sm:$0xff]   ;;  %v7999_v63 = vld [vmem:[#allocation9] ss:$16 sps:$4 sm:$0xff]  }
 0x773   :  { %6959 = vpow2.f32 %v6153_v34  ;;  %v8001_v47 = vld [vmem:[#allocation9 + $0x8] ss:$16 sps:$4 sm:$0xff]   ;;  %v8007_v39 = vld [vmem:[#allocation9 + $0x24] ss:$16 sps:$4 sm:$0xff]   ;;  %v8009_v8 = vld [vmem:[#allocation9 + $0x2c] ss:$16 sps:$4 sm:$0xff]  }
 0x774   :  { %6961 = vpow2.f32 %v6154_v16  ;;  %v8011_v21 = vld [vmem:[#allocation9 + $0x20] ss:$16 sps:$4 sm:$0xff]   ;;  %v8013_v30 = vld [vmem:[#allocation9 + $0x28] ss:$16 sps:$4 sm:$0xff]   ;;  %v8019_v31 = vld [vmem:[#allocation9 + $0x44] ss:$16 sps:$4 sm:$0xff]  }
 0x775   :  { %6963 = vtanh.f32 %v2483_v53  ;;  %v6756_v53 = vld [vmem:[#allocation7 + $0xec] ss:$16 sps:$4 sm:$0xff]   ;;  %v8023_v33 = vld [vmem:[#allocation9 + $0x40] ss:$16 sps:$4 sm:$0xff]   ;;  %v8025_v34 = vld [vmem:[#allocation9 + $0x48] ss:$16 sps:$4 sm:$0xff]  }
 0x776   :  { %v8021_v32 = vld [vmem:[#allocation9 + $0x4c] ss:$16 sps:$4 sm:$0xff]   ;;  %v8031_v16 = vld [vmem:[#allocation9 + $0x60] ss:$16 sps:$4 sm:$0xff]  }
 0x77c   :  { %v6958_v44 = vpop.eup %6957 }
 0x77d   :  { %v6960_v10 = vpop.eup %6959  ;;  %v2488_v14 = vadd.f32 1.0, %v6958_v44  ;;  %v8033_v44 = vld [vmem:[#allocation9 + $0x64] ss:$16 sps:$4 sm:$0xff]  }
 0x77e   :  { %v2494_v41 = vadd.f32 1.0, %v6960_v10  ;;  %v6962_v5 = vpop.eup %6961  ;;  %v8035_v10 = vld [vmem:[#allocation9 + $0x68] ss:$16 sps:$4 sm:$0xff]  }
 0x77f   :  { %6965 = vrcp.f32 %v2488_v14  ;;  %v6964_v42 = vpop.eup %6963  ;;  %v2501_v15 = vadd.f32 1.0, %v6962_v5  ;;  %v8037_v14 = vld [vmem:[#allocation9 + $0x6c] ss:$16 sps:$4 sm:$0xff]  }
 0x780   :  { %6967 = vrcp.f32 %v2494_v41  ;;  %v8043_v41 = vld [vmem:[#allocation9 + $0x84] ss:$16 sps:$4 sm:$0xff]   ;;  %v8045_v5 = vld [vmem:[#allocation9 + $0x8c] ss:$16 sps:$4 sm:$0xff]  }
 0x781   :  { %6969 = vrcp.f32 %v2501_v15  ;;  %v8059_v15 = vld [vmem:[#allocation9 + $0xa8] ss:$16 sps:$4 sm:$0xff]  }
 0x789   :  { %v6966_v12 = vpop.eup %6965 }
 0x78a   :  { %v6968_v38 = vpop.eup %6967  ;;  %v2505_v43 = vmul.f32 %v6966_v12, %v6964_v42  ;;  %v8047_v42 = vld [vmem:[#allocation9 + $0x80] ss:$16 sps:$4 sm:$0xff]   ;;  %v8049_v12 = vld [vmem:[#allocation9 + $0x88] ss:$16 sps:$4 sm:$0xff]  }
 0x78b   :  { %v2504_v13 = vmul.f32 %v6968_v38, %v7936_v37  ;;  %v6970_v40 = vpop.eup %6969  ;;  %v6732_v37 = vld [vmem:[#allocation7 + $0x6c] ss:$16 sps:$4 sm:$0xff]   ;;  %v8055_v38 = vld [vmem:[#allocation9 + $0xa0] ss:$16 sps:$4 sm:$0xff]  }
 0x78d   :  { %v7974_v59 = vadd.f32 %v2505_v43, %v2504_v13  ;;  %v8057_v43 = vld [vmem:[#allocation9 + $0xa4] ss:$16 sps:$4 sm:$0xff]   ;;  %v8061_v13 = vld [vmem:[#allocation9 + $0xac] ss:$16 sps:$4 sm:$0xff]  }
 0x78f   :  { %6971 = vtanh.f32 %v7974_v59 }
 0x799   :  { %v6972_v11 = vpop.eup %6971 }
 0x79a   :  { %v7977_v46 = vmul.f32 %v6972_v11, %v6970_v40  ;;  %v8067_v40 = vld [vmem:[#allocation9 + $0xc4] ss:$16 sps:$4 sm:$0xff]   ;;  %v8069_v11 = vld [vmem:[#allocation9 + $0xcc] ss:$16 sps:$4 sm:$0xff]  }
 0x79c   :  { %v2514_v25 = vpack.c.bf16 %v7977_v46, %v7977_v46 }
 0x79e   :  { %2740 = vmatmul.mubr.bf16.vlgmr.msra.gmra.mrb[40].mxu0 %v2514_v25  ;;  %2781 = vmatmul.mubr.bf16.vlgmr.msra.gmra.mrb[48].mxu1 %v2514_v25  ;;  %v8079_v25 = vld [vmem:[#allocation9 + $0xe0] ss:$16 sps:$4 sm:$0xff]  }
 0x79f   :  { %3045 = vmatpush1.bf16.msra.mxu0 %v6709_v4  ;;  %3118 = vmatpush1.bf16.msra.mxu1 %v6712_v51  ;;  %v8071_v4 = vld [vmem:[#allocation9 + $0xc0] ss:$16 sps:$4 sm:$0xff]   ;;  %v8073_v51 = vld [vmem:[#allocation9 + $0xc8] ss:$16 sps:$4 sm:$0xff]  }
 0x7a0   :  { %3046 = vmatprep.subr.bf16.mxu0 %v6717_v48  ;;  %3119 = vmatprep.subr.bf16.mxu1 %v6720_v6  ;;  %v8081_v48 = vld [vmem:[#allocation9 + $0xe4] ss:$16 sps:$4 sm:$0xff]   ;;  %v8083_v6 = vld [vmem:[#allocation9 + $0xe8] ss:$16 sps:$4 sm:$0xff]  }
 0x7a1   :  { %3076 = vmatprep.mubr.bf16.mxu0 %v8666_v3  ;;  %3149 = vmatprep.mubr.bf16.mxu1 %v8666_v3 }
 0x7a3   :  { %3047 = vmatpush1.bf16.msra.mxu0 %v6715_v61  ;;  %3120 = vmatpush1.bf16.msra.mxu1 %v6718_v27  ;;  %v8085_v61 = vld [vmem:[#allocation9 + $0xec] ss:$16 sps:$4 sm:$0xff]  }
 0x7a4   :  { %3048 = vmatprep.subr.bf16.mxu0 %v6723_v20  ;;  %3121 = vmatprep.subr.bf16.mxu1 %v6726_v28 }
 0x7a7   :  { %3049 = vmatpush1.bf16.msra.mxu0 %v6721_v26  ;;  %3122 = vmatpush1.bf16.msra.mxu1 %v6724_v35  ;;  %v8680_v26 = vld [vmem:[#allocation29_spill] sm:$0xff] }
 0x7a8   :  { %3050 = vmatprep.subr.bf16.mxu0 %v6729_v36  ;;  %3123 = vmatprep.subr.bf16.mxu1 %v6732_v37 }
 0x7ab   :  { %3051 = vmatpush1.bf16.msra.mxu0 %v6727_v24  ;;  %3124 = vmatpush1.bf16.msra.mxu1 %v6730_v7  ;;  %v8681_v24 = vld [vmem:[#allocation33_spill] sm:$0xff] }
 0x7ac   :  { %3052 = vmatprep.subr.bf16.mxu0 %v6735_v9  ;;  %3125 = vmatprep.subr.bf16.mxu1 %v6738_v29  ;;  %v8682_v9 = vld [vmem:[#allocation30_spill] sm:$0xff] }
 0x7af   :  { %3053 = vmatpush1.bf16.msra.mxu0 %v6733_v49  ;;  %3126 = vmatpush1.bf16.msra.mxu1 %v6736_v56 }
 0x7b0   :  { %3054 = vmatprep.subr.bf16.mxu0 %v6741_v45  ;;  %3127 = vmatprep.subr.bf16.mxu1 %v6744_v55 }
 0x7b3   :  { %3055 = vmatpush1.bf16.msra.mxu0 %v6739_v60  ;;  %3128 = vmatpush1.bf16.msra.mxu1 %v6742_v54 }
 0x7b4   :  { %3056 = vmatprep.subr.bf16.mxu0 %v6747_v57  ;;  %3129 = vmatprep.subr.bf16.mxu1 %v6750_v0 }
 0x7b7   :  { %3057 = vmatpush1.bf16.msra.mxu0 %v6745_v18  ;;  %3130 = vmatpush1.bf16.msra.mxu1 %v6748_v50 }
 0x7b8   :  { %3058 = vmatprep.subr.bf16.mxu0 %v6753_v52  ;;  %3131 = vmatprep.subr.bf16.mxu1 %v6756_v53 }
 0x7bb   :  { %3059 = vmatpush1.bf16.msra.mxu0 %v6751_v58  ;;  %3132 = vmatpush1.bf16.msra.mxu1 %v6754_v62 }
 0x7bc   :  { %3418 = vmatprep.subr.bf16.mxu0 %v7995_v1  ;;  %3459 = vmatprep.subr.bf16.mxu1 %v7997_v22 }
 0x7be   :  { %3077 = vmatmul.mubr.bf16.vlgmr.msra.gmra.mrb[44].mxu0 %v2826_v23  ;;  %3150 = vmatmul.mubr.bf16.vlgmr.msra.gmra.mrb[52].mxu1 %v2826_v23 }
 0x7bf   :  { %3086 = vmatprep.mubr.bf16.mxu0 %v8666_v3  ;;  %3159 = vmatprep.mubr.bf16.mxu1 %v8666_v3 }
 0x7c0   :  { %3419 = vmatpush1.bf16.msra.mxu0 %v7999_v63  ;;  %3460 = vmatpush1.bf16.msra.mxu1 %v8001_v47 }
 0x7c1   :  { %3420 = vmatprep.subr.bf16.mxu0 %v8007_v39  ;;  %3461 = vmatprep.subr.bf16.mxu1 %v8009_v8 }
 0x7c4   :  { %3421 = vmatpush1.bf16.msra.mxu0 %v8011_v21  ;;  %3462 = vmatpush1.bf16.msra.mxu1 %v8013_v30 }
 0x7c5   :  { %3422 = vmatprep.subr.bf16.mxu0 %v8019_v31  ;;  %3463 = vmatprep.subr.bf16.mxu1 %v8021_v32 }
 0x7c6   :  { %3087 = vmatmul.mubr.bf16.gmra.mrb[48].mxu0 %v2827_v17  ;;  %3160 = vmatmul.mubr.bf16.gmra.mrb[56].mxu1 %v2827_v17 }
 0x7c7   :  { %3096 = vmatprep.mubr.bf16.mxu0 %v8666_v3  ;;  %3169 = vmatprep.mubr.bf16.mxu1 %v8666_v3 }
 0x7c8   :  { %3423 = vmatpush1.bf16.msra.mxu0 %v8023_v33  ;;  %3464 = vmatpush1.bf16.msra.mxu1 %v8025_v34 }
 0x7c9   :  { %3424 = vmatprep.subr.bf16.mxu0 %v8033_v44  ;;  %3465 = vmatprep.subr.bf16.mxu1 %v8037_v14 }
 0x7cc   :  { %3425 = vmatpush1.bf16.msra.mxu0 %v8031_v16  ;;  %3466 = vmatpush1.bf16.msra.mxu1 %v8035_v10 }
 0x7cd   :  { %3426 = vmatprep.subr.bf16.mxu0 %v8043_v41  ;;  %3467 = vmatprep.subr.bf16.mxu1 %v8045_v5 }
 0x7ce   :  { %3097 = vmatmul.mubr.bf16.gmra.mrb[52].mxu0 %v2828_v19  ;;  %3170 = vmatmul.mubr.bf16.gmra.mrb[60].mxu1 %v2828_v19 }
 0x7cf   :  { %3106 = vmatprep.mubr.bf16.mxu0 %v8666_v3  ;;  %3179 = vmatprep.mubr.bf16.mxu1 %v8666_v3 }
 0x7d0   :  { %3427 = vmatpush1.bf16.msra.mxu0 %v8047_v42  ;;  %3468 = vmatpush1.bf16.msra.mxu1 %v8049_v12 }
 0x7d1   :  { %3428 = vmatprep.subr.bf16.mxu0 %v8057_v43  ;;  %3469 = vmatprep.subr.bf16.mxu1 %v8061_v13 }
 0x7d4   :  { %3429 = vmatpush1.bf16.msra.mxu0 %v8055_v38  ;;  %3470 = vmatpush1.bf16.msra.mxu1 %v8059_v15 }
 0x7d5   :  { %3430 = vmatprep.subr.bf16.mxu0 %v8067_v40  ;;  %3471 = vmatprep.subr.bf16.mxu1 %v8069_v11 }
 0x7d8   :  { %3431 = vmatpush1.bf16.msra.mxu0 %v8071_v4  ;;  %3472 = vmatpush1.bf16.msra.mxu1 %v8073_v51 }
 0x7d9   :  { %3432 = vmatprep.subr.bf16.mxu0 %v8081_v48  ;;  %3473 = vmatprep.subr.bf16.mxu1 %v8085_v61 }
 0x7dc   :  { %3433 = vmatpush1.bf16.msra.mxu0 %v8079_v25  ;;  %3474 = vmatpush1.bf16.msra.mxu1 %v8083_v6 }
 0x7dd   :  { %3726 = vmatprep.subr.bf16.mxu0 %v7995_v1  ;;  %3767 = vmatprep.subr.bf16.mxu1 %v7997_v22 }
 0x871   :  { %v2741_v27 = vpop.f32.mrb[40].mxu0  ;;  %v2782_v20 = vpop.f32.mrb[48].mxu1 }
 0x872   :  { %v2789_v28 = vadd.f32 %v2741_v27, %v7634_v2  ;;  %v2791_v35 = vadd.f32 %v2782_v20, %v8680_v26  ;;  %v2743_v36 = vpop.f32.mrb[41].mxu0  ;;  %v2784_v37 = vpop.f32.mrb[49].mxu1 }
 0x873   :  { %v2790_v7 = vadd.f32 %v2743_v36, %v8681_v24  ;;  %v2792_v29 = vadd.f32 %v2784_v37, %v8682_v9  ;;  %v2745_v49 = vpop.f32.mrb[42].mxu0  ;;  %v2786_v56 = vpop.f32.mrb[50].mxu1 }
 0x874   :  { %v6187_v45 = vmul.f32 -1.442695, %v2789_v28  ;;  %v2746_v55 = vpop.f32.mrb[43].mxu0  ;;  %v2787_v60 = vpop.f32.mrb[51].mxu1 }
 0x875   :  { %v6188_v54 = vmul.f32 -1.442695, %v2790_v7  ;;  %v6189_v57 = vmul.f32 -1.442695, %v2792_v29 }
 0x876   :  { %6973 = vpow2.f32 %v6187_v45 }
 0x877   :  { %6975 = vpow2.f32 %v6188_v54 }
 0x878   :  { %6977 = vpow2.f32 %v6189_v57 }
 0x879   :  { %6979 = vtanh.f32 %v2791_v35 }
 0x880   :  { %v6974_v0 = vpop.eup %6973 }
 0x881   :  { %v6976_v18 = vpop.eup %6975  ;;  %v2796_v2 = vadd.f32 1.0, %v6974_v0 }
 0x882   :  { %v2802_v50 = vadd.f32 1.0, %v6976_v18  ;;  %v6978_v52 = vpop.eup %6977 }
 0x883   :  { %6981 = vrcp.f32 %v2796_v2  ;;  %v6980_v53 = vpop.eup %6979  ;;  %v2809_v17 = vadd.f32 1.0, %v6978_v52 }
 0x884   :  { %6983 = vrcp.f32 %v2802_v50 }
 0x885   :  { %6985 = vrcp.f32 %v2809_v17  ;;  %v2862_v17 = vld [vmem:[%s8637_s6] sm:$0xf] }
 0x88d   :  { %v6982_v58 = vpop.eup %6981 }
 0x88e   :  { %v6984_v62 = vpop.eup %6983  ;;  %v2813_v23 = vmul.f32 %v6982_v58, %v6980_v53 }
 0x88f   :  { %v2812_v19 = vmul.f32 %v6984_v62, %v7974_v59  ;;  %v6986_v55 = vpop.eup %6985 }
 0x891   :  { %v8098_v27 = vpop.f32.mrb[44].mxu0  ;;  %v8100_v20 = vpop.f32.mrb[52].mxu1  ;;  %v2814_v28 = vadd.f32 %v2813_v23, %v2812_v19 }
 0x892   :  { %v8102_v26 = vpop.f32.mrb[45].mxu0  ;;  %v8104_v35 = vpop.f32.mrb[53].mxu1 }
 0x893   :  { %v8106_v36 = vpop.f32.mrb[46].mxu0  ;;  %v8108_v37 = vpop.f32.mrb[54].mxu1  ;;  %6987 = vtanh.f32 %v2814_v28 }
 0x894   :  { %v8110_v24 = vpop.f32.mrb[47].mxu0  ;;  %v8112_v7 = vpop.f32.mrb[55].mxu1 }
 0x899   :  { %v8114_v59 = vpop.f32.mrb[48].mxu0  ;;  %v8116_v9 = vpop.f32.mrb[56].mxu1 }
 0x89a   :  { %8683 = vst [vmem:[#allocation18_spill] sm:$0xff] %v8116_v9  ;;  %v8118_v29 = vpop.f32.mrb[49].mxu0  ;;  %v8120_v49 = vpop.f32.mrb[57].mxu1 }
 0x89b   :  { %8684 = vst [vmem:[#allocation26_spill] sm:$0xff] %v8118_v29  ;;  %8685 = vst [vmem:[#allocation19_spill] sm:$0xff] %v8120_v49  ;;  %v8122_v56 = vpop.f32.mrb[50].mxu0  ;;  %v8124_v45 = vpop.f32.mrb[58].mxu1 }
 0x89c   :  { %8686 = vst [vmem:[#allocation28_spill] sm:$0xff] %v8122_v56  ;;  %8687 = vst [vmem:[#allocation20_spill] sm:$0xff] %v8124_v45  ;;  %v8126_v60 = vpop.f32.mrb[51].mxu0  ;;  %v8128_v54 = vpop.f32.mrb[59].mxu1 }
 0x89d   :  { %8688 = vst [vmem:[#allocation31_spill] sm:$0xff] %v8126_v60  ;;  %8689 = vst [vmem:[#allocation21_spill] sm:$0xff] %v8128_v54  ;;  %v6988_v57 = vpop.eup %6987 }
 0x89e   :  { %v2816_v0 = vmul.f32 %v6988_v57, %v6986_v55 }
 0x8a0   :  { %v2829_v18 = vpack.c.bf16 %v2816_v0, %v7977_v46 }
 0x8a1   :  { %v8131_v2 = vpop.f32.mrb[52].mxu0  ;;  %v8133_v50 = vpop.f32.mrb[60].mxu1 }
 0x8a2   :  { %8690 = vst [vmem:[#allocation32_spill] sm:$0xff] %v8131_v2  ;;  %8691 = vst [vmem:[#allocation22_spill] sm:$0xff] %v8133_v50  ;;  %v8135_v52 = vpop.f32.mrb[53].mxu0  ;;  %v8137_v53 = vpop.f32.mrb[61].mxu1  ;;  %3107 = vmatmul.mubr.bf16.gmra.mrb[56].mxu0 %v2829_v18  ;;  %3180 = vmatmul.mubr.bf16.gmra.mrb[64].mxu1 %v2829_v18 }
 0x8a3   :  { %8692 = vst [vmem:[#allocation23_spill] sm:$0xff] %v8135_v52  ;;  %8693 = vst [vmem:[#allocation24_spill] sm:$0xff] %v8137_v53  ;;  %v8139_v58 = vpop.f32.mrb[54].mxu0  ;;  %v8141_v62 = vpop.f32.mrb[62].mxu1  ;;  %3450 = vmatprep.mubr.bf16.mxu0 %v8666_v3  ;;  %3491 = vmatprep.mubr.bf16.mxu1 %v8666_v3 }
 0x8a4   :  { %8694 = vst [vmem:[#allocation25_spill] sm:$0xff] %v8139_v58  ;;  %8695 = vst [vmem:[#allocation27_spill] sm:$0xff] %v8141_v62  ;;  %v8145_v23 = vpop.f32.mrb[55].mxu0  ;;  %v8147_v46 = vpop.f32.mrb[63].mxu1 }
 0x8a5   :  { %8696 = vst [vmem:[#allocation29_spill] sm:$0xff] %v8145_v23  ;;  %8697 = vst [vmem:[#allocation33_spill] sm:$0xff] %v8147_v46  ;;  %v8704_v46 = vld [vmem:[#allocation17_spill] sm:$0xff] }
 0x8a6   :  { %v8705_v23 = vsub.s32 0, %v8704_v46  ;;  %v8706_v58 = vsub.s32 2, %v8704_v46 }
 0x8a8   :  { %v8202_v62 = vrot.slane %v2862_v17, %v8705_v23  ;;  %v8206_v53 = vrot.slane %v2862_v17, %v8706_v58 }
 0x8aa   :  { %3451 = vmatmul.mubr.bf16.vlgmr.msra.gmra.mrb[60].mxu0 %v8666_v3  ;;  %3492 = vmatmul.mubr.bf16.vlgmr.msra.gmra.mrb[68].mxu1 %v8666_v3  ;;  %v3079_v23 = vadd.f32 %v8098_v27, %v8202_v62 }
 0x8ab   :  { %3727 = vmatpush1.bf16.msra.mxu0 %v7999_v63  ;;  %3768 = vmatpush1.bf16.msra.mxu1 %v8001_v47 }
 0x8ac   :  { %3728 = vmatprep.subr.bf16.mxu0 %v8007_v39  ;;  %3769 = vmatprep.subr.bf16.mxu1 %v8009_v8 }
 0x8ad   :  { %3758 = vmatprep.mubr.bf16.mxu0 %v8666_v3  ;;  %3799 = vmatprep.mubr.bf16.mxu1 %v8666_v3 }
 0x8af   :  { %3729 = vmatpush1.bf16.msra.mxu0 %v8011_v21  ;;  %3770 = vmatpush1.bf16.msra.mxu1 %v8013_v30 }
 0x8b0   :  { %3730 = vmatprep.subr.bf16.mxu0 %v8019_v31  ;;  %3771 = vmatprep.subr.bf16.mxu1 %v8021_v32 }
 0x8b3   :  { %3731 = vmatpush1.bf16.msra.mxu0 %v8023_v33  ;;  %3772 = vmatpush1.bf16.msra.mxu1 %v8025_v34 }
 0x8b4   :  { %3732 = vmatprep.subr.bf16.mxu0 %v8033_v44  ;;  %3773 = vmatprep.subr.bf16.mxu1 %v8037_v14 }
 0x8b7   :  { %3733 = vmatpush1.bf16.msra.mxu0 %v8031_v16  ;;  %3774 = vmatpush1.bf16.msra.mxu1 %v8035_v10 }
 0x8b8   :  { %3734 = vmatprep.subr.bf16.mxu0 %v8043_v41  ;;  %3775 = vmatprep.subr.bf16.mxu1 %v8045_v5 }
 0x8bb   :  { %3735 = vmatpush1.bf16.msra.mxu0 %v8047_v42  ;;  %3776 = vmatpush1.bf16.msra.mxu1 %v8049_v12 }
 0x8bc   :  { %3736 = vmatprep.subr.bf16.mxu0 %v8057_v43  ;;  %3777 = vmatprep.subr.bf16.mxu1 %v8061_v13 }
 0x8bf   :  { %3737 = vmatpush1.bf16.msra.mxu0 %v8055_v38  ;;  %3778 = vmatpush1.bf16.msra.mxu1 %v8059_v15 }
 0x8c0   :  { %3738 = vmatprep.subr.bf16.mxu0 %v8067_v40  ;;  %3779 = vmatprep.subr.bf16.mxu1 %v8069_v11 }
 0x8c3   :  { %3739 = vmatpush1.bf16.msra.mxu0 %v8071_v4  ;;  %3780 = vmatpush1.bf16.msra.mxu1 %v8073_v51 }
 0x8c4   :  { %3740 = vmatprep.subr.bf16.mxu0 %v8081_v48  ;;  %3781 = vmatprep.subr.bf16.mxu1 %v8085_v61 }
 0x8c7   :  { %3741 = vmatpush1.bf16.msra.mxu0 %v8079_v25  ;;  %3782 = vmatpush1.bf16.msra.mxu1 %v8083_v6 }
 0x8c8   :  { %4034 = vmatprep.subr.bf16.mxu0 %v7995_v1  ;;  %4075 = vmatprep.subr.bf16.mxu1 %v7997_v22 }
 0x975   :  { %v8188_v19 = vpop.f32.mrb[56].mxu0  ;;  %v8190_v28 = vpop.f32.mrb[64].mxu1 }
 0x976   :  { %8698 = vst [vmem:[#allocation30_spill] sm:$0xff] %v8188_v19  ;;  %8699 = vst [vmem:[#allocation34_spill] sm:$0xff] %v8190_v28  ;;  %v8192_v55 = vpop.f32.mrb[57].mxu0  ;;  %v8194_v57 = vpop.f32.mrb[65].mxu1 }
 0x977   :  { %8700 = vst [vmem:[#allocation35_spill] sm:$0xff] %v8192_v55  ;;  %8701 = vst [vmem:[#allocation36_spill] sm:$0xff] %v8194_v57  ;;  %v8196_v0 = vpop.f32.mrb[58].mxu0  ;;  %v8198_v18 = vpop.f32.mrb[66].mxu1  ;;  %v8709_v55 = vsub.s32 1, %v8704_v46 }
 0x978   :  { %8702 = vst [vmem:[#allocation37_spill] sm:$0xff] %v8196_v0  ;;  %8703 = vst [vmem:[#allocation38_spill] sm:$0xff] %v8198_v18  ;;  %v8208_v52 = vpop.f32.mrb[59].mxu0  ;;  %v8210_v19 = vpop.f32.mrb[67].mxu1  ;;  %v8710_v0 = vsub.s32 3, %v8704_v46  ;;  %v3152_v18 = vadd.f32 %v8100_v20, %v8206_v53 }
 0x979   :  { %8707 = vst [vmem:[#allocation17_spill] sm:$0xff] %v8208_v52  ;;  %8708 = vst [vmem:[#allocation39_spill] sm:$0xff] %v8210_v19  ;;  %v8214_v28 = vrot.slane %v2862_v17, %v8709_v55 }
 0x97a   :  { %v8218_v57 = vrot.slane %v2862_v17, %v8710_v0 }
 0x97b   :  { %v3081_v58 = vadd.f32 %v8102_v26, %v8214_v28 }
 0x97c   :  { %v3154_v19 = vadd.f32 %v8104_v35, %v8218_v57 }
 0x97d   :  { %v3452_v52 = vpop.f32.mrb[60].mxu0  ;;  %v3493_v50 = vpop.f32.mrb[68].mxu1 }
 0x97e   :  { %v3500_v55 = vadd.f32 %v3452_v52, %v3079_v23  ;;  %v3502_v2 = vadd.f32 %v3493_v50, %v3152_v18  ;;  %v3454_v54 = vpop.f32.mrb[61].mxu0  ;;  %v3495_v46 = vpop.f32.mrb[69].mxu1 }
 0x97f   :  { %v3501_v17 = vadd.f32 %v3454_v54, %v3081_v58  ;;  %v3503_v0 = vadd.f32 %v3495_v46, %v3154_v19  ;;  %v3456_v60 = vpop.f32.mrb[62].mxu0  ;;  %v3497_v45 = vpop.f32.mrb[70].mxu1  ;;  %v3085_v46 = vadd.f32 %v8110_v24, %v8214_v28 }
 0x980   :  { %v6254_v27 = vmul.f32 -1.442695, %v3500_v55  ;;  %v3457_v56 = vpop.f32.mrb[63].mxu0  ;;  %v3498_v49 = vpop.f32.mrb[71].mxu1  ;;  %v3156_v55 = vadd.f32 %v8108_v37, %v8206_v53 }
 0x981   :  { %v6255_v20 = vmul.f32 -1.442695, %v3501_v17  ;;  %v6256_v26 = vmul.f32 -1.442695, %v3503_v0  ;;  %v3158_v17 = vadd.f32 %v8112_v7, %v8218_v57 }
 0x982   :  { %6989 = vpow2.f32 %v6254_v27 }
 0x983   :  { %6991 = vpow2.f32 %v6255_v20 }
 0x984   :  { %6993 = vpow2.f32 %v6256_v26 }
 0x985   :  { %6995 = vtanh.f32 %v3502_v2  ;;  %v3083_v2 = vadd.f32 %v8106_v36, %v8202_v62 }
 0x98c   :  { %v6990_v29 = vpop.eup %6989 }
 0x98d   :  { %v6992_v9 = vpop.eup %6991  ;;  %v3507_v35 = vadd.f32 1.0, %v6990_v29 }
 0x98e   :  { %v3513_v52 = vadd.f32 1.0, %v6992_v9  ;;  %v6994_v50 = vpop.eup %6993 }
 0x98f   :  { %6997 = vrcp.f32 %v3507_v35  ;;  %v6996_v54 = vpop.eup %6995  ;;  %v3520_v18 = vadd.f32 1.0, %v6994_v50 }
 0x990   :  { %6999 = vrcp.f32 %v3513_v52 }
 0x991   :  { %7001 = vrcp.f32 %v3520_v18 }
 0x999   :  { %v6998_v19 = vpop.eup %6997 }
 0x99a   :  { %v7000_v60 = vpop.eup %6999  ;;  %v3524_v45 = vmul.f32 %v6998_v19, %v6996_v54 }
 0x99b   :  { %v3523_v56 = vmul.f32 0.0, %v7000_v60  ;;  %v7002_v23 = vpop.eup %7001 }
 0x99d   :  { %v8228_v49 = vadd.f32 %v3524_v45, %v3523_v56 }
 0x99f   :  { %7003 = vtanh.f32 %v8228_v49 }
 0x9a9   :  { %v7004_v58 = vpop.eup %7003 }
 0x9aa   :  { %v8231_v29 = vmul.f32 %v7004_v58, %v7002_v23 }
 0x9ac   :  { %v3533_v9 = vpack.c.bf16 %v8231_v29, %v8231_v29 }
 0x9ae   :  { %3759 = vmatmul.mubr.bf16.vlgmr.msra.gmra.mrb[64].mxu0 %v3533_v9  ;;  %3800 = vmatmul.mubr.bf16.vlgmr.msra.gmra.mrb[72].mxu1 %v3533_v9 }
 0x9af   :  { %4035 = vmatpush1.bf16.msra.mxu0 %v7999_v63  ;;  %4076 = vmatpush1.bf16.msra.mxu1 %v8001_v47 }
 0x9b0   :  { %4036 = vmatprep.subr.bf16.mxu0 %v8007_v39  ;;  %4077 = vmatprep.subr.bf16.mxu1 %v8009_v8 }
 0x9b1   :  { %4066 = vmatprep.mubr.bf16.mxu0 %v8666_v3  ;;  %4107 = vmatprep.mubr.bf16.mxu1 %v8666_v3 }
 0x9b3   :  { %4037 = vmatpush1.bf16.msra.mxu0 %v8011_v21  ;;  %4078 = vmatpush1.bf16.msra.mxu1 %v8013_v30 }
 0x9b4   :  { %4038 = vmatprep.subr.bf16.mxu0 %v8019_v31  ;;  %4079 = vmatprep.subr.bf16.mxu1 %v8021_v32 }
 0x9b7   :  { %4039 = vmatpush1.bf16.msra.mxu0 %v8023_v33  ;;  %4080 = vmatpush1.bf16.msra.mxu1 %v8025_v34 }
 0x9b8   :  { %4040 = vmatprep.subr.bf16.mxu0 %v8033_v44  ;;  %4081 = vmatprep.subr.bf16.mxu1 %v8037_v14 }
 0x9bb   :  { %4041 = vmatpush1.bf16.msra.mxu0 %v8031_v16  ;;  %4082 = vmatpush1.bf16.msra.mxu1 %v8035_v10 }
 0x9bc   :  { %4042 = vmatprep.subr.bf16.mxu0 %v8043_v41  ;;  %4083 = vmatprep.subr.bf16.mxu1 %v8045_v5 }
 0x9bf   :  { %4043 = vmatpush1.bf16.msra.mxu0 %v8047_v42  ;;  %4084 = vmatpush1.bf16.msra.mxu1 %v8049_v12 }
 0x9c0   :  { %4044 = vmatprep.subr.bf16.mxu0 %v8057_v43  ;;  %4085 = vmatprep.subr.bf16.mxu1 %v8061_v13 }
 0x9c3   :  { %4045 = vmatpush1.bf16.msra.mxu0 %v8055_v38  ;;  %4086 = vmatpush1.bf16.msra.mxu1 %v8059_v15 }
 0x9c4   :  { %4046 = vmatprep.subr.bf16.mxu0 %v8067_v40  ;;  %4087 = vmatprep.subr.bf16.mxu1 %v8069_v11 }
 0x9c7   :  { %4047 = vmatpush1.bf16.msra.mxu0 %v8071_v4  ;;  %4088 = vmatpush1.bf16.msra.mxu1 %v8073_v51 }
 0x9c8   :  { %4048 = vmatprep.subr.bf16.mxu0 %v8081_v48  ;;  %4089 = vmatprep.subr.bf16.mxu1 %v8085_v61 }
 0x9cb   :  { %4049 = vmatpush1.bf16.msra.mxu0 %v8079_v25  ;;  %4090 = vmatpush1.bf16.msra.mxu1 %v8083_v6 }
 0x9cc   :  { %4342 = vmatprep.subr.bf16.mxu0 %v7995_v1  ;;  %4383 = vmatprep.subr.bf16.mxu1 %v7997_v22 }
 0xa81   :  { %v3760_v0 = vpop.f32.mrb[64].mxu0  ;;  %v3801_v27 = vpop.f32.mrb[72].mxu1 }
 0xa82   :  { %v3808_v20 = vadd.f32 %v3760_v0, %v3083_v2  ;;  %v3810_v26 = vadd.f32 %v3801_v27, %v3156_v55  ;;  %v3762_v35 = vpop.f32.mrb[65].mxu0  ;;  %v3803_v1 = vpop.f32.mrb[73].mxu1 }
 0xa83   :  { %v3809_v52 = vadd.f32 %v3762_v35, %v3085_v46  ;;  %v3811_v22 = vadd.f32 %v3803_v1, %v3158_v17  ;;  %v3764_v50 = vpop.f32.mrb[66].mxu0  ;;  %v3805_v54 = vpop.f32.mrb[74].mxu1 }
 0xa84   :  { %v6289_v36 = vmul.f32 -1.442695, %v3808_v20  ;;  %v3765_v19 = vpop.f32.mrb[67].mxu0  ;;  %v3806_v60 = vpop.f32.mrb[75].mxu1 }
 0xa85   :  { %v6290_v37 = vmul.f32 -1.442695, %v3809_v52  ;;  %v6291_v24 = vmul.f32 -1.442695, %v3811_v22  ;;  %v8335_v19 = vld [vmem:[#allocation9 + $0x4] ss:$16 sps:$4 sm:$0xff]  }
 0xa86   :  { %7005 = vpow2.f32 %v6289_v36  ;;  %v8337_v60 = vld [vmem:[#allocation9 + $0xc] ss:$16 sps:$4 sm:$0xff]  }
 0xa87   :  { %7007 = vpow2.f32 %v6290_v37  ;;  %v8339_v37 = vld [vmem:[#allocation9] ss:$16 sps:$4 sm:$0xff]  }
 0xa88   :  { %7009 = vpow2.f32 %v6291_v24  ;;  %v8341_v24 = vld [vmem:[#allocation9 + $0x8] ss:$16 sps:$4 sm:$0xff]  }
 0xa89   :  { %7011 = vtanh.f32 %v3810_v26 }
 0xa90   :  { %v7006_v45 = vpop.eup %7005 }
 0xa91   :  { %v7008_v18 = vpop.eup %7007  ;;  %v3815_v7 = vadd.f32 1.0, %v7006_v45  ;;  %v8347_v45 = vld [vmem:[#allocation9 + $0x24] ss:$16 sps:$4 sm:$0xff]  }
 0xa92   :  { %v3821_v56 = vadd.f32 1.0, %v7008_v18  ;;  %v7010_v23 = vpop.eup %7009  ;;  %v8349_v18 = vld [vmem:[#allocation9 + $0x2c] ss:$16 sps:$4 sm:$0xff]  }
 0xa93   :  { %7013 = vrcp.f32 %v3815_v7  ;;  %v7012_v58 = vpop.eup %7011  ;;  %v3828_v46 = vadd.f32 1.0, %v7010_v23  ;;  %v8351_v7 = vld [vmem:[#allocation9 + $0x20] ss:$16 sps:$4 sm:$0xff]   ;;  %v8359_v23 = vld [vmem:[#allocation9 + $0x44] ss:$16 sps:$4 sm:$0xff]  }
 0xa94   :  { %7015 = vrcp.f32 %v3821_v56  ;;  %v8353_v56 = vld [vmem:[#allocation9 + $0x28] ss:$16 sps:$4 sm:$0xff]  }
 0xa95   :  { %7017 = vrcp.f32 %v3828_v46  ;;  %v8373_v46 = vld [vmem:[#allocation9 + $0x6c] ss:$16 sps:$4 sm:$0xff]  }
 0xa9d   :  { %v7014_v9 = vpop.eup %7013 }
 0xa9e   :  { %v7016_v2 = vpop.eup %7015  ;;  %v3832_v55 = vmul.f32 %v7014_v9, %v7012_v58  ;;  %v8361_v58 = vld [vmem:[#allocation9 + $0x4c] ss:$16 sps:$4 sm:$0xff]   ;;  %v8363_v9 = vld [vmem:[#allocation9 + $0x40] ss:$16 sps:$4 sm:$0xff]  }
 0xa9f   :  { %v3831_v17 = vmul.f32 %v7016_v2, %v8228_v49  ;;  %v7018_v27 = vpop.eup %7017  ;;  %v8365_v2 = vld [vmem:[#allocation9 + $0x48] ss:$16 sps:$4 sm:$0xff]  }
 0xaa1   :  { %v8278_v0 = vadd.f32 %v3832_v55, %v3831_v17  ;;  %v8371_v55 = vld [vmem:[#allocation9 + $0x64] ss:$16 sps:$4 sm:$0xff]   ;;  %v8375_v17 = vld [vmem:[#allocation9 + $0x60] ss:$16 sps:$4 sm:$0xff]  }
 0xaa3   :  { %7019 = vtanh.f32 %v8278_v0 }
 0xaad   :  { %v7020_v20 = vpop.eup %7019 }
 0xaae   :  { %v8281_v35 = vmul.f32 %v7020_v20, %v7018_v27  ;;  %v8383_v27 = vld [vmem:[#allocation9 + $0x84] ss:$16 sps:$4 sm:$0xff]   ;;  %v8385_v20 = vld [vmem:[#allocation9 + $0x8c] ss:$16 sps:$4 sm:$0xff]  }
 0xab0   :  { %v3841_v26 = vpack.c.bf16 %v8281_v35, %v8281_v35 }
 0xab2   :  { %4067 = vmatmul.mubr.bf16.vlgmr.msra.gmra.mrb[68].mxu0 %v3841_v26  ;;  %4108 = vmatmul.mubr.bf16.vlgmr.msra.gmra.mrb[76].mxu1 %v3841_v26  ;;  %v8387_v26 = vld [vmem:[#allocation9 + $0x80] ss:$16 sps:$4 sm:$0xff]  }
 0xab3   :  { %4343 = vmatpush1.bf16.msra.mxu0 %v7999_v63  ;;  %4384 = vmatpush1.bf16.msra.mxu1 %v8001_v47  ;;  %v3089_v63 = vadd.f32 %v8114_v59, %v8202_v62  ;;  %v8711_v47 = vld [vmem:[#allocation18_spill] sm:$0xff] }
 0xab4   :  { %4344 = vmatprep.subr.bf16.mxu0 %v8007_v39  ;;  %4385 = vmatprep.subr.bf16.mxu1 %v8009_v8  ;;  %v3162_v39 = vadd.f32 %v8711_v47, %v8206_v53  ;;  %v8712_v8 = vld [vmem:[#allocation26_spill] sm:$0xff]  ;;  %v8393_v47 = vld [vmem:[#allocation9 + $0xa4] ss:$16 sps:$4 sm:$0xff]  }
 0xab5   :  { %4374 = vmatprep.mubr.bf16.mxu0 %v8666_v3  ;;  %4415 = vmatprep.mubr.bf16.mxu1 %v8666_v3 }
 0xab7   :  { %4345 = vmatpush1.bf16.msra.mxu0 %v8011_v21  ;;  %4386 = vmatpush1.bf16.msra.mxu1 %v8013_v30  ;;  %v3091_v21 = vadd.f32 %v8712_v8, %v8214_v28  ;;  %v8713_v30 = vld [vmem:[#allocation19_spill] sm:$0xff]  ;;  %v8399_v8 = vld [vmem:[#allocation9 + $0xa8] ss:$16 sps:$4 sm:$0xff]  }
 0xab8   :  { %4346 = vmatprep.subr.bf16.mxu0 %v8019_v31  ;;  %4387 = vmatprep.subr.bf16.mxu1 %v8021_v32  ;;  %v3164_v31 = vadd.f32 %v8713_v30, %v8218_v57  ;;  %v8404_v30 = vld [vmem:[#allocation9 + $0xc4] ss:$16 sps:$4 sm:$0xff]  }
 0xabb   :  { %4347 = vmatpush1.bf16.msra.mxu0 %v8023_v33  ;;  %4388 = vmatpush1.bf16.msra.mxu1 %v8025_v34 }
 0xabc   :  { %4348 = vmatprep.subr.bf16.mxu0 %v8033_v44  ;;  %4389 = vmatprep.subr.bf16.mxu1 %v8037_v14 }
 0xabf   :  { %4349 = vmatpush1.bf16.msra.mxu0 %v8031_v16  ;;  %4390 = vmatpush1.bf16.msra.mxu1 %v8035_v10 }
 0xac0   :  { %4350 = vmatprep.subr.bf16.mxu0 %v8043_v41  ;;  %4391 = vmatprep.subr.bf16.mxu1 %v8045_v5 }
 0xac3   :  { %4351 = vmatpush1.bf16.msra.mxu0 %v8047_v42  ;;  %4392 = vmatpush1.bf16.msra.mxu1 %v8049_v12 }
 0xac4   :  { %4352 = vmatprep.subr.bf16.mxu0 %v8057_v43  ;;  %4393 = vmatprep.subr.bf16.mxu1 %v8061_v13 }
 0xac7   :  { %4353 = vmatpush1.bf16.msra.mxu0 %v8055_v38  ;;  %4394 = vmatpush1.bf16.msra.mxu1 %v8059_v15 }
 0xac8   :  { %4354 = vmatprep.subr.bf16.mxu0 %v8067_v40  ;;  %4395 = vmatprep.subr.bf16.mxu1 %v8069_v11 }
 0xacb   :  { %4355 = vmatpush1.bf16.msra.mxu0 %v8071_v4  ;;  %4396 = vmatpush1.bf16.msra.mxu1 %v8073_v51 }
 0xacc   :  { %4356 = vmatprep.subr.bf16.mxu0 %v8081_v48  ;;  %4397 = vmatprep.subr.bf16.mxu1 %v8085_v61 }
 0xacf   :  { %4357 = vmatpush1.bf16.msra.mxu0 %v8079_v25  ;;  %4398 = vmatpush1.bf16.msra.mxu1 %v8083_v6 }
 0xad0   :  { %4650 = vmatprep.subr.bf16.mxu0 %v8335_v19  ;;  %4691 = vmatprep.subr.bf16.mxu1 %v8337_v60 }
 0xb85   :  { %v4068_v32 = vpop.f32.mrb[68].mxu0  ;;  %v4109_v33 = vpop.f32.mrb[76].mxu1 }
 0xb86   :  { %v4116_v34 = vadd.f32 %v4068_v32, %v3089_v63  ;;  %v4118_v16 = vadd.f32 %v4109_v33, %v3162_v39  ;;  %v4070_v44 = vpop.f32.mrb[69].mxu0  ;;  %v4111_v10 = vpop.f32.mrb[77].mxu1  ;;  %v8389_v63 = vld [vmem:[#allocation9 + $0x88] ss:$16 sps:$4 sm:$0xff]   ;;  %v8397_v39 = vld [vmem:[#allocation9 + $0xa0] ss:$16 sps:$4 sm:$0xff]  }
 0xb87   :  { %v4117_v14 = vadd.f32 %v4070_v44, %v3091_v21  ;;  %v4119_v41 = vadd.f32 %v4111_v10, %v3164_v31  ;;  %v4072_v5 = vpop.f32.mrb[70].mxu0  ;;  %v4113_v42 = vpop.f32.mrb[78].mxu1  ;;  %v8401_v21 = vld [vmem:[#allocation9 + $0xac] ss:$16 sps:$4 sm:$0xff]   ;;  %v8411_v32 = vld [vmem:[#allocation9 + $0xc0] ss:$16 sps:$4 sm:$0xff]  }
 0xb88   :  { %v6324_v12 = vmul.f32 -1.442695, %v4116_v34  ;;  %v4073_v38 = vpop.f32.mrb[71].mxu0  ;;  %v4114_v43 = vpop.f32.mrb[79].mxu1  ;;  %v8406_v31 = vld [vmem:[#allocation9 + $0xcc] ss:$16 sps:$4 sm:$0xff]  }
 0xb89   :  { %v6325_v15 = vmul.f32 -1.442695, %v4117_v14  ;;  %v6326_v13 = vmul.f32 -1.442695, %v4119_v41  ;;  %v8413_v33 = vld [vmem:[#allocation9 + $0xc8] ss:$16 sps:$4 sm:$0xff]  }
 0xb8a   :  { %7021 = vpow2.f32 %v6324_v12  ;;  %v8417_v34 = vld [vmem:[#allocation9 + $0xe4] ss:$16 sps:$4 sm:$0xff]   ;;  %v8423_v44 = vld [vmem:[#allocation9 + $0xe0] ss:$16 sps:$4 sm:$0xff]   ;;  %v8425_v10 = vld [vmem:[#allocation9 + $0xe8] ss:$16 sps:$4 sm:$0xff]  }
 0xb8b   :  { %7023 = vpow2.f32 %v6325_v15  ;;  %v8714_v14 = vld [vmem:[#allocation28_spill] sm:$0xff]  ;;  %v8716_v12 = vld [vmem:[#allocation31_spill] sm:$0xff]  ;;  %v8717_v43 = vld [vmem:[#allocation21_spill] sm:$0xff] }
 0xb8c   :  { %7025 = vpow2.f32 %v6326_v13  ;;  %v3093_v41 = vadd.f32 %v8714_v14, %v8202_v62  ;;  %v8715_v5 = vld [vmem:[#allocation20_spill] sm:$0xff]  ;;  %v3095_v38 = vadd.f32 %v8716_v12, %v8214_v28  ;;  %v3168_v15 = vadd.f32 %v8717_v43, %v8218_v57 }
 0xb8d   :  { %7027 = vtanh.f32 %v4118_v16  ;;  %v8419_v16 = vld [vmem:[#allocation9 + $0xec] ss:$16 sps:$4 sm:$0xff]   ;;  %v3166_v42 = vadd.f32 %v8715_v5, %v8206_v53 }
 0xb94   :  { %v7022_v40 = vpop.eup %7021 }
 0xb95   :  { %v7024_v11 = vpop.eup %7023  ;;  %v4123_v4 = vadd.f32 1.0, %v7022_v40 }
 0xb96   :  { %v4129_v51 = vadd.f32 1.0, %v7024_v11  ;;  %v7026_v25 = vpop.eup %7025 }
 0xb97   :  { %7029 = vrcp.f32 %v4123_v4  ;;  %v7028_v48 = vpop.eup %7027  ;;  %v4136_v49 = vadd.f32 1.0, %v7026_v25 }
 0xb98   :  { %7031 = vrcp.f32 %v4129_v51 }
 0xb99   :  { %7033 = vrcp.f32 %v4136_v49 }
 0xba1   :  { %v7030_v6 = vpop.eup %7029 }
 0xba2   :  { %v7032_v61 = vpop.eup %7031  ;;  %v4140_v59 = vmul.f32 %v7030_v6, %v7028_v48 }
 0xba3   :  { %v4139_v1 = vmul.f32 %v7032_v61, %v8278_v0  ;;  %v7034_v22 = vpop.eup %7033  ;;  %v8377_v0 = vld [vmem:[#allocation9 + $0x68] ss:$16 sps:$4 sm:$0xff]  }
 0xba5   :  { %v8326_v52 = vadd.f32 %v4140_v59, %v4139_v1 }
 0xba7   :  { %7035 = vtanh.f32 %v8326_v52 }
 0xbb1   :  { %v7036_v50 = vpop.eup %7035 }
 0xbb2   :  { %v8329_v54 = vmul.f32 %v7036_v50, %v7034_v22 }
 0xbb4   :  { %v4149_v36 = vpack.c.bf16 %v8329_v54, %v8329_v54 }
 0xbb6   :  { %4375 = vmatmul.mubr.bf16.vlgmr.msra.gmra.mrb[72].mxu0 %v4149_v36  ;;  %4416 = vmatmul.mubr.bf16.vlgmr.msra.gmra.mrb[80].mxu1 %v4149_v36 }
 0xbb7   :  { %4682 = vmatprep.mubr.bf16.mxu0 %v8666_v3  ;;  %4723 = vmatprep.mubr.bf16.mxu1 %v8666_v3 }
 0xbb8   :  { %4651 = vmatpush1.bf16.msra.mxu0 %v8339_v37  ;;  %4692 = vmatpush1.bf16.msra.mxu1 %v8341_v24 }
 0xbb9   :  { %4652 = vmatprep.subr.bf16.mxu0 %v8347_v45  ;;  %4693 = vmatprep.subr.bf16.mxu1 %v8349_v18 }
 0xbbc   :  { %4653 = vmatpush1.bf16.msra.mxu0 %v8351_v7  ;;  %4694 = vmatpush1.bf16.msra.mxu1 %v8353_v56 }
 0xbbd   :  { %4654 = vmatprep.subr.bf16.mxu0 %v8359_v23  ;;  %4695 = vmatprep.subr.bf16.mxu1 %v8361_v58 }
 0xbc0   :  { %4655 = vmatpush1.bf16.msra.mxu0 %v8363_v9  ;;  %4696 = vmatpush1.bf16.msra.mxu1 %v8365_v2 }
 0xbc1   :  { %4656 = vmatprep.subr.bf16.mxu0 %v8371_v55  ;;  %4697 = vmatprep.subr.bf16.mxu1 %v8373_v46 }
 0xbc4   :  { %4657 = vmatpush1.bf16.msra.mxu0 %v8375_v17  ;;  %4698 = vmatpush1.bf16.msra.mxu1 %v8377_v0 }
 0xbc5   :  { %4658 = vmatprep.subr.bf16.mxu0 %v8383_v27  ;;  %4699 = vmatprep.subr.bf16.mxu1 %v8385_v20 }
 0xbc8   :  { %4659 = vmatpush1.bf16.msra.mxu0 %v8387_v26  ;;  %4700 = vmatpush1.bf16.msra.mxu1 %v8389_v63 }
 0xbc9   :  { %4660 = vmatprep.subr.bf16.mxu0 %v8393_v47  ;;  %4701 = vmatprep.subr.bf16.mxu1 %v8401_v21 }
 0xbcc   :  { %4661 = vmatpush1.bf16.msra.mxu0 %v8397_v39  ;;  %4702 = vmatpush1.bf16.msra.mxu1 %v8399_v8 }
 0xbcd   :  { %4662 = vmatprep.subr.bf16.mxu0 %v8404_v30  ;;  %4703 = vmatprep.subr.bf16.mxu1 %v8406_v31 }
 0xbd0   :  { %4663 = vmatpush1.bf16.msra.mxu0 %v8411_v32  ;;  %4704 = vmatpush1.bf16.msra.mxu1 %v8413_v33 }
 0xbd1   :  { %4664 = vmatprep.subr.bf16.mxu0 %v8417_v34  ;;  %4705 = vmatprep.subr.bf16.mxu1 %v8419_v16 }
 0xbd4   :  { %4665 = vmatpush1.bf16.msra.mxu0 %v8423_v44  ;;  %4706 = vmatpush1.bf16.msra.mxu1 %v8425_v10 }
 0xbd5   :  { %4958 = vmatprep.subr.bf16.mxu0 %v8335_v19  ;;  %4999 = vmatprep.subr.bf16.mxu1 %v8337_v60 }
 0xc89   :  { %v4376_v13 = vpop.f32.mrb[72].mxu0  ;;  %v4417_v40 = vpop.f32.mrb[80].mxu1 }
 0xc8a   :  { %v4424_v11 = vadd.f32 %v4376_v13, %v3093_v41  ;;  %v4426_v4 = vadd.f32 %v4417_v40, %v3166_v42  ;;  %v4378_v51 = vpop.f32.mrb[73].mxu0  ;;  %v4419_v25 = vpop.f32.mrb[81].mxu1 }
 0xc8b   :  { %v4425_v48 = vadd.f32 %v4378_v51, %v3095_v38  ;;  %v4427_v6 = vadd.f32 %v4419_v25, %v3168_v15  ;;  %v4380_v61 = vpop.f32.mrb[74].mxu0  ;;  %v4421_v59 = vpop.f32.mrb[82].mxu1 }
 0xc8c   :  { %v6359_v49 = vmul.f32 -1.442695, %v4424_v11  ;;  %v4381_v1 = vpop.f32.mrb[75].mxu0  ;;  %v4422_v22 = vpop.f32.mrb[83].mxu1  ;;  %v8719_v59 = vld [vmem:[#allocation22_spill] sm:$0xff] }
 0xc8d   :  { %v6360_v50 = vmul.f32 -1.442695, %v4425_v48  ;;  %v6361_v36 = vmul.f32 -1.442695, %v4427_v6  ;;  %v8720_v1 = vld [vmem:[#allocation23_spill] sm:$0xff] }
 0xc8e   :  { %7037 = vpow2.f32 %v6359_v49  ;;  %v3172_v49 = vadd.f32 %v8719_v59, %v8206_v53  ;;  %v3101_v22 = vadd.f32 %v8720_v1, %v8214_v28 }
 0xc8f   :  { %7039 = vpow2.f32 %v6360_v50  ;;  %v8721_v50 = vld [vmem:[#allocation24_spill] sm:$0xff] }
 0xc90   :  { %7041 = vpow2.f32 %v6361_v36  ;;  %v3174_v36 = vadd.f32 %v8721_v50, %v8218_v57 }
 0xc91   :  { %7043 = vtanh.f32 %v4426_v4 }
 0xc98   :  { %v7038_v14 = vpop.eup %7037 }
 0xc99   :  { %v7040_v5 = vpop.eup %7039  ;;  %v4431_v12 = vadd.f32 1.0, %v7038_v14 }
 0xc9a   :  { %v4437_v41 = vadd.f32 1.0, %v7040_v5  ;;  %v7042_v42 = vpop.eup %7041 }
 0xc9b   :  { %7045 = vrcp.f32 %v4431_v12  ;;  %v7044_v38 = vpop.eup %7043  ;;  %v4444_v40 = vadd.f32 1.0, %v7042_v42 }
 0xc9c   :  { %7047 = vrcp.f32 %v4437_v41 }
 0xc9d   :  { %7049 = vrcp.f32 %v4444_v40 }
 0xca5   :  { %v7046_v43 = vpop.eup %7045 }
 0xca6   :  { %v7048_v15 = vpop.eup %7047  ;;  %v4448_v13 = vmul.f32 %v7046_v43, %v7044_v38 }
 0xca7   :  { %v4447_v11 = vmul.f32 %v7048_v15, %v8326_v52  ;;  %v7050_v25 = vpop.eup %7049  ;;  %v8718_v52 = vld [vmem:[#allocation32_spill] sm:$0xff] }
 0xca8   :  { %v3099_v61 = vadd.f32 %v8718_v52, %v8202_v62 }
 0xca9   :  { %v8442_v51 = vadd.f32 %v4448_v13, %v4447_v11 }
 0xcab   :  { %7051 = vtanh.f32 %v8442_v51 }
 0xcb5   :  { %v7052_v48 = vpop.eup %7051 }
 0xcb6   :  { %v8445_v6 = vmul.f32 %v7052_v48, %v7050_v25 }
 0xcb8   :  { %v4457_v4 = vpack.c.bf16 %v8445_v6, %v8445_v6 }
 0xcba   :  { %4683 = vmatmul.mubr.bf16.vlgmr.msra.gmra.mrb[76].mxu0 %v4457_v4  ;;  %4724 = vmatmul.mubr.bf16.vlgmr.msra.gmra.mrb[84].mxu1 %v4457_v4 }
 0xcbb   :  { %4959 = vmatpush1.bf16.msra.mxu0 %v8339_v37  ;;  %5000 = vmatpush1.bf16.msra.mxu1 %v8341_v24 }
 0xcbc   :  { %4960 = vmatprep.subr.bf16.mxu0 %v8347_v45  ;;  %5001 = vmatprep.subr.bf16.mxu1 %v8349_v18 }
 0xcbd   :  { %4990 = vmatprep.mubr.bf16.mxu0 %v8666_v3  ;;  %5031 = vmatprep.mubr.bf16.mxu1 %v8666_v3 }
 0xcbf   :  { %4961 = vmatpush1.bf16.msra.mxu0 %v8351_v7  ;;  %5002 = vmatpush1.bf16.msra.mxu1 %v8353_v56 }
 0xcc0   :  { %4962 = vmatprep.subr.bf16.mxu0 %v8359_v23  ;;  %5003 = vmatprep.subr.bf16.mxu1 %v8361_v58 }
 0xcc3   :  { %4963 = vmatpush1.bf16.msra.mxu0 %v8363_v9  ;;  %5004 = vmatpush1.bf16.msra.mxu1 %v8365_v2 }
 0xcc4   :  { %4964 = vmatprep.subr.bf16.mxu0 %v8371_v55  ;;  %5005 = vmatprep.subr.bf16.mxu1 %v8373_v46 }
 0xcc7   :  { %4965 = vmatpush1.bf16.msra.mxu0 %v8375_v17  ;;  %5006 = vmatpush1.bf16.msra.mxu1 %v8377_v0 }
 0xcc8   :  { %4966 = vmatprep.subr.bf16.mxu0 %v8383_v27  ;;  %5007 = vmatprep.subr.bf16.mxu1 %v8385_v20 }
 0xccb   :  { %4967 = vmatpush1.bf16.msra.mxu0 %v8387_v26  ;;  %5008 = vmatpush1.bf16.msra.mxu1 %v8389_v63 }
 0xccc   :  { %4968 = vmatprep.subr.bf16.mxu0 %v8393_v47  ;;  %5009 = vmatprep.subr.bf16.mxu1 %v8401_v21 }
 0xccf   :  { %4969 = vmatpush1.bf16.msra.mxu0 %v8397_v39  ;;  %5010 = vmatpush1.bf16.msra.mxu1 %v8399_v8 }
 0xcd0   :  { %4970 = vmatprep.subr.bf16.mxu0 %v8404_v30  ;;  %5011 = vmatprep.subr.bf16.mxu1 %v8406_v31 }
 0xcd3   :  { %4971 = vmatpush1.bf16.msra.mxu0 %v8411_v32  ;;  %5012 = vmatpush1.bf16.msra.mxu1 %v8413_v33 }
 0xcd4   :  { %4972 = vmatprep.subr.bf16.mxu0 %v8417_v34  ;;  %5013 = vmatprep.subr.bf16.mxu1 %v8419_v16 }
 0xcd7   :  { %4973 = vmatpush1.bf16.msra.mxu0 %v8423_v44  ;;  %5014 = vmatpush1.bf16.msra.mxu1 %v8425_v10 }
 0xcd8   :  { %5266 = vmatprep.subr.bf16.mxu0 %v8335_v19  ;;  %5307 = vmatprep.subr.bf16.mxu1 %v8337_v60 }
 0xd8d   :  { %v4684_v14 = vpop.f32.mrb[76].mxu0  ;;  %v4725_v5 = vpop.f32.mrb[84].mxu1 }
 0xd8e   :  { %v4732_v12 = vadd.f32 %v4684_v14, %v3099_v61  ;;  %v4734_v41 = vadd.f32 %v4725_v5, %v3172_v49  ;;  %v4686_v42 = vpop.f32.mrb[77].mxu0  ;;  %v4727_v38 = vpop.f32.mrb[85].mxu1 }
 0xd8f   :  { %v4733_v43 = vadd.f32 %v4686_v42, %v3101_v22  ;;  %v4735_v15 = vadd.f32 %v4727_v38, %v3174_v36  ;;  %v4688_v13 = vpop.f32.mrb[78].mxu0  ;;  %v4729_v40 = vpop.f32.mrb[86].mxu1 }
 0xd90   :  { %v6394_v11 = vmul.f32 -1.442695, %v4732_v12  ;;  %v4689_v25 = vpop.f32.mrb[79].mxu0  ;;  %v4730_v48 = vpop.f32.mrb[87].mxu1 }
 0xd91   :  { %v6395_v4 = vmul.f32 -1.442695, %v4733_v43  ;;  %v6396_v52 = vmul.f32 -1.442695, %v4735_v15  ;;  %v8724_v48 = vld [vmem:[#allocation29_spill] sm:$0xff] }
 0xd92   :  { %7053 = vpow2.f32 %v6394_v11  ;;  %v8723_v11 = vld [vmem:[#allocation27_spill] sm:$0xff] }
 0xd93   :  { %7055 = vpow2.f32 %v6395_v4  ;;  %v3176_v25 = vadd.f32 %v8723_v11, %v8206_v53  ;;  %v3105_v4 = vadd.f32 %v8724_v48, %v8214_v28 }
 0xd94   :  { %7057 = vpow2.f32 %v6396_v52  ;;  %v8725_v52 = vld [vmem:[#allocation33_spill] sm:$0xff] }
 0xd95   :  { %7059 = vtanh.f32 %v4734_v41 }
 0xd9c   :  { %v7054_v59 = vpop.eup %7053 }
 0xd9d   :  { %v7056_v1 = vpop.eup %7055  ;;  %v4739_v50 = vadd.f32 1.0, %v7054_v59  ;;  %v3178_v59 = vadd.f32 %v8725_v52, %v8218_v57 }
 0xd9e   :  { %v4745_v61 = vadd.f32 1.0, %v7056_v1  ;;  %v7058_v49 = vpop.eup %7057 }
 0xd9f   :  { %7061 = vrcp.f32 %v4739_v50  ;;  %v7060_v22 = vpop.eup %7059  ;;  %v4752_v12 = vadd.f32 1.0, %v7058_v49 }
 0xda0   :  { %7063 = vrcp.f32 %v4745_v61 }
 0xda1   :  { %7065 = vrcp.f32 %v4752_v12 }
 0xda9   :  { %v7062_v36 = vpop.eup %7061 }
 0xdaa   :  { %v7064_v14 = vpop.eup %7063  ;;  %v4756_v5 = vmul.f32 %v7062_v36, %v7060_v22 }
 0xdab   :  { %v4755_v42 = vmul.f32 %v7064_v14, %v8442_v51  ;;  %v7066_v43 = vpop.eup %7065  ;;  %v8722_v51 = vld [vmem:[#allocation25_spill] sm:$0xff] }
 0xdac   :  { %v3103_v40 = vadd.f32 %v8722_v51, %v8202_v62 }
 0xdad   :  { %v8492_v38 = vadd.f32 %v4756_v5, %v4755_v42 }
 0xdaf   :  { %7067 = vtanh.f32 %v8492_v38 }
 0xdb9   :  { %v7068_v15 = vpop.eup %7067 }
 0xdba   :  { %v8495_v13 = vmul.f32 %v7068_v15, %v7066_v43 }
 0xdbc   :  { %v4765_v41 = vpack.c.bf16 %v8495_v13, %v8495_v13 }
 0xdbe   :  { %4991 = vmatmul.mubr.bf16.vlgmr.msra.gmra.mrb[80].mxu0 %v4765_v41  ;;  %5032 = vmatmul.mubr.bf16.vlgmr.msra.gmra.mrb[88].mxu1 %v4765_v41 }
 0xdbf   :  { %5267 = vmatpush1.bf16.msra.mxu0 %v8339_v37  ;;  %5308 = vmatpush1.bf16.msra.mxu1 %v8341_v24 }
 0xdc0   :  { %5268 = vmatprep.subr.bf16.mxu0 %v8347_v45  ;;  %5309 = vmatprep.subr.bf16.mxu1 %v8349_v18 }
 0xdc1   :  { %5298 = vmatprep.mubr.bf16.mxu0 %v8666_v3  ;;  %5339 = vmatprep.mubr.bf16.mxu1 %v8666_v3 }
 0xdc3   :  { %5269 = vmatpush1.bf16.msra.mxu0 %v8351_v7  ;;  %5310 = vmatpush1.bf16.msra.mxu1 %v8353_v56 }
 0xdc4   :  { %5270 = vmatprep.subr.bf16.mxu0 %v8359_v23  ;;  %5311 = vmatprep.subr.bf16.mxu1 %v8361_v58 }
 0xdc7   :  { %5271 = vmatpush1.bf16.msra.mxu0 %v8363_v9  ;;  %5312 = vmatpush1.bf16.msra.mxu1 %v8365_v2 }
 0xdc8   :  { %5272 = vmatprep.subr.bf16.mxu0 %v8371_v55  ;;  %5313 = vmatprep.subr.bf16.mxu1 %v8373_v46 }
 0xdcb   :  { %5273 = vmatpush1.bf16.msra.mxu0 %v8375_v17  ;;  %5314 = vmatpush1.bf16.msra.mxu1 %v8377_v0 }
 0xdcc   :  { %5274 = vmatprep.subr.bf16.mxu0 %v8383_v27  ;;  %5315 = vmatprep.subr.bf16.mxu1 %v8385_v20 }
 0xdcf   :  { %5275 = vmatpush1.bf16.msra.mxu0 %v8387_v26  ;;  %5316 = vmatpush1.bf16.msra.mxu1 %v8389_v63 }
 0xdd0   :  { %5276 = vmatprep.subr.bf16.mxu0 %v8393_v47  ;;  %5317 = vmatprep.subr.bf16.mxu1 %v8401_v21 }
 0xdd3   :  { %5277 = vmatpush1.bf16.msra.mxu0 %v8397_v39  ;;  %5318 = vmatpush1.bf16.msra.mxu1 %v8399_v8 }
 0xdd4   :  { %5278 = vmatprep.subr.bf16.mxu0 %v8404_v30  ;;  %5319 = vmatprep.subr.bf16.mxu1 %v8406_v31 }
 0xdd7   :  { %5279 = vmatpush1.bf16.msra.mxu0 %v8411_v32  ;;  %5320 = vmatpush1.bf16.msra.mxu1 %v8413_v33 }
 0xdd8   :  { %5280 = vmatprep.subr.bf16.mxu0 %v8417_v34  ;;  %5321 = vmatprep.subr.bf16.mxu1 %v8419_v16 }
 0xddb   :  { %5281 = vmatpush1.bf16.msra.mxu0 %v8423_v44  ;;  %5322 = vmatpush1.bf16.msra.mxu1 %v8425_v10 }
 0xddc   :  { %5574 = vmatprep.subr.bf16.mxu0 %v8335_v19  ;;  %5615 = vmatprep.subr.bf16.mxu1 %v8337_v60 }
 0xe91   :  { %v4992_v1 = vpop.f32.mrb[80].mxu0  ;;  %v5033_v50 = vpop.f32.mrb[88].mxu1 }
 0xe92   :  { %v5040_v61 = vadd.f32 %v4992_v1, %v3103_v40  ;;  %v5042_v49 = vadd.f32 %v5033_v50, %v3176_v25  ;;  %v4994_v22 = vpop.f32.mrb[81].mxu0  ;;  %v5035_v19 = vpop.f32.mrb[89].mxu1 }
 0xe93   :  { %v5041_v36 = vadd.f32 %v4994_v22, %v3105_v4  ;;  %v5043_v60 = vadd.f32 %v5035_v19, %v3178_v59  ;;  %v4996_v14 = vpop.f32.mrb[82].mxu0  ;;  %v5037_v5 = vpop.f32.mrb[90].mxu1 }
 0xe94   :  { %v6429_v12 = vmul.f32 -1.442695, %v5040_v61  ;;  %v4997_v42 = vpop.f32.mrb[83].mxu0  ;;  %v5038_v43 = vpop.f32.mrb[91].mxu1 }
 0xe95   :  { %v6430_v15 = vmul.f32 -1.442695, %v5041_v36  ;;  %v6431_v41 = vmul.f32 -1.442695, %v5043_v60 }
 0xe96   :  { %7069 = vpow2.f32 %v6429_v12 }
 0xe97   :  { %7071 = vpow2.f32 %v6430_v15 }
 0xe98   :  { %7073 = vpow2.f32 %v6431_v41 }
 0xe99   :  { %7075 = vtanh.f32 %v5042_v49 }
 0xea0   :  { %v7070_v51 = vpop.eup %7069 }
 0xea1   :  { %v7072_v11 = vpop.eup %7071  ;;  %v5047_v48 = vadd.f32 1.0, %v7070_v51 }
 0xea2   :  { %v5053_v40 = vadd.f32 1.0, %v7072_v11  ;;  %v7074_v25 = vpop.eup %7073  ;;  %v6854_v11 = vld [vmem:[#allocation10 + $0x8] sm:$0xff]  }
 0xea3   :  { %7077 = vrcp.f32 %v5047_v48  ;;  %v7076_v4 = vpop.eup %7075  ;;  %v5060_v50 = vadd.f32 1.0, %v7074_v25  ;;  %v5693_v48 = vpack.c.bf16 %v8281_v35, %v8231_v29  ;;  %v6856_v25 = vld [vmem:[#allocation10 + $0x18] sm:$0xff]   ;;  %v5694_v35 = vpack.c.bf16 %v8445_v6, %v8329_v54 }
 0xea4   :  { %7079 = vrcp.f32 %v5053_v40  ;;  %v6855_v40 = vld [vmem:[#allocation10 + $0x10] sm:$0xff]   ;;  %v6860_v29 = vld [vmem:[#allocation10 + $0x38] sm:$0xff]  }
 0xea5   :  { %7081 = vrcp.f32 %v5060_v50  ;;  %v8730_v50 = vld [vmem:[#allocation37_spill] sm:$0xff] }
 0xead   :  { %v7078_v52 = vpop.eup %7077 }
 0xeae   :  { %v7080_v59 = vpop.eup %7079  ;;  %v5064_v1 = vmul.f32 %v7078_v52, %v7076_v4  ;;  %v6857_v4 = vld [vmem:[#allocation10 + $0x20] sm:$0xff]   ;;  %v6858_v52 = vld [vmem:[#allocation10 + $0x28] sm:$0xff]  }
 0xeaf   :  { %v5063_v61 = vmul.f32 %v7080_v59, %v8492_v38  ;;  %v7082_v19 = vpop.eup %7081  ;;  %v6859_v59 = vld [vmem:[#allocation10 + $0x30] sm:$0xff]  }
 0xeb1   :  { %v8542_v22 = vadd.f32 %v5064_v1, %v5063_v61  ;;  %v3113_v61 = vadd.f32 %v8730_v50, %v8202_v62 }
 0xeb3   :  { %7083 = vtanh.f32 %v8542_v22 }
 0xebd   :  { %v7084_v36 = vpop.eup %7083 }
 0xebe   :  { %v8545_v60 = vmul.f32 %v7084_v36, %v7082_v19  ;;  %v8732_v36 = vld [vmem:[#allocation17_spill] sm:$0xff] }
 0xec0   :  { %v5073_v49 = vpack.c.bf16 %v8545_v60, %v8545_v60  ;;  %v5695_v1 = vpack.c.bf16 %v8545_v60, %v8495_v13 }
 0xec2   :  { %5299 = vmatmul.mubr.bf16.vlgmr.msra.gmra.mrb[84].mxu0 %v5073_v49  ;;  %5340 = vmatmul.mubr.bf16.vlgmr.msra.gmra.mrb[92].mxu1 %v5073_v49  ;;  %v3115_v49 = vadd.f32 %v8732_v36, %v8214_v28 }
 0xec3   :  { %5575 = vmatpush1.bf16.msra.mxu0 %v8339_v37  ;;  %5616 = vmatpush1.bf16.msra.mxu1 %v8341_v24  ;;  %v8726_v37 = vld [vmem:[#allocation30_spill] sm:$0xff] }
 0xec4   :  { %5576 = vmatprep.subr.bf16.mxu0 %v8347_v45  ;;  %5617 = vmatprep.subr.bf16.mxu1 %v8349_v18  ;;  %v3109_v24 = vadd.f32 %v8726_v37, %v8202_v62  ;;  %v8727_v45 = vld [vmem:[#allocation34_spill] sm:$0xff] }
 0xec5   :  { %5606 = vmatprep.mubr.bf16.mxu0 %v8666_v3  ;;  %5647 = vmatprep.mubr.bf16.mxu1 %v8666_v3  ;;  %v6853_v3 = vld [vmem:[#allocation10] sm:$0xff]   ;;  %v3182_v18 = vadd.f32 %v8727_v45, %v8206_v53 }
 0xec7   :  { %5577 = vmatpush1.bf16.msra.mxu0 %v8351_v7  ;;  %5618 = vmatpush1.bf16.msra.mxu1 %v8353_v56  ;;  %v8728_v7 = vld [vmem:[#allocation35_spill] sm:$0xff] }
 0xec8   :  { %5578 = vmatprep.subr.bf16.mxu0 %v8359_v23  ;;  %5619 = vmatprep.subr.bf16.mxu1 %v8361_v58  ;;  %v3111_v56 = vadd.f32 %v8728_v7, %v8214_v28  ;;  %v8729_v23 = vld [vmem:[#allocation36_spill] sm:$0xff] }
 0xec9   :  { %v3184_v58 = vadd.f32 %v8729_v23, %v8218_v57 }
 0xecb   :  { %5579 = vmatpush1.bf16.msra.mxu0 %v8363_v9  ;;  %5620 = vmatpush1.bf16.msra.mxu1 %v8365_v2 }
 0xecc   :  { %5580 = vmatprep.subr.bf16.mxu0 %v8371_v55  ;;  %5621 = vmatprep.subr.bf16.mxu1 %v8373_v46 }
 0xecf   :  { %5581 = vmatpush1.bf16.msra.mxu0 %v8375_v17  ;;  %5622 = vmatpush1.bf16.msra.mxu1 %v8377_v0 }
 0xed0   :  { %5582 = vmatprep.subr.bf16.mxu0 %v8383_v27  ;;  %5623 = vmatprep.subr.bf16.mxu1 %v8385_v20 }
 0xed3   :  { %5583 = vmatpush1.bf16.msra.mxu0 %v8387_v26  ;;  %5624 = vmatpush1.bf16.msra.mxu1 %v8389_v63 }
 0xed4   :  { %5584 = vmatprep.subr.bf16.mxu0 %v8393_v47  ;;  %5625 = vmatprep.subr.bf16.mxu1 %v8401_v21 }
 0xed7   :  { %5585 = vmatpush1.bf16.msra.mxu0 %v8397_v39  ;;  %5626 = vmatpush1.bf16.msra.mxu1 %v8399_v8 }
 0xed8   :  { %5586 = vmatprep.subr.bf16.mxu0 %v8404_v30  ;;  %5627 = vmatprep.subr.bf16.mxu1 %v8406_v31 }
 0xedb   :  { %5587 = vmatpush1.bf16.msra.mxu0 %v8411_v32  ;;  %5628 = vmatpush1.bf16.msra.mxu1 %v8413_v33 }
 0xedc   :  { %5588 = vmatprep.subr.bf16.mxu0 %v8417_v34  ;;  %5629 = vmatprep.subr.bf16.mxu1 %v8419_v16 }
 0xedf   :  { %5589 = vmatpush1.bf16.msra.mxu0 %v8423_v44  ;;  %5630 = vmatpush1.bf16.msra.mxu1 %v8425_v10 }
 0xee0   :  { %6562 = vmatprep.subr.bf16.mxu0 %v6853_v3 }
 0xf95   :  { %v5300_v9 = vpop.f32.mrb[84].mxu0  ;;  %v5341_v2 = vpop.f32.mrb[92].mxu1 }
 0xf96   :  { %v5348_v55 = vadd.f32 %v5300_v9, %v3109_v24  ;;  %v5350_v46 = vadd.f32 %v5341_v2, %v3182_v18  ;;  %v5302_v17 = vpop.f32.mrb[85].mxu0  ;;  %v5343_v0 = vpop.f32.mrb[93].mxu1 }
 0xf97   :  { %v5349_v27 = vadd.f32 %v5302_v17, %v3111_v56  ;;  %v5351_v20 = vadd.f32 %v5343_v0, %v3184_v58  ;;  %v5304_v26 = vpop.f32.mrb[86].mxu0  ;;  %v5345_v63 = vpop.f32.mrb[94].mxu1 }
 0xf98   :  { %v6464_v47 = vmul.f32 -1.442695, %v5348_v55  ;;  %v5305_v39 = vpop.f32.mrb[87].mxu0  ;;  %v5346_v8 = vpop.f32.mrb[95].mxu1 }
 0xf99   :  { %v6465_v21 = vmul.f32 -1.442695, %v5349_v27  ;;  %v6466_v30 = vmul.f32 -1.442695, %v5351_v20  ;;  %v6502_v8 = vld [vmem:[%s8639_s8] ss:$0 sm:$0xff] }
 0xf9a   :  { %7085 = vpow2.f32 %v6464_v47  ;;  %s7244_s8 = smov [#allocation12]  }
 0xf9b   :  { %7087 = vpow2.f32 %v6465_v21  ;;  %s5878_s29 = sshll.u32 %s7244_s8, 4  ;;  %s5879_s29 = int_to_ptr.vmem [resolvable:$true] %s5878_s29 }
 0xf9c   :  { %7089 = vpow2.f32 %v6466_v30  ;;  %s7205_s30 = scalar_lea.vmem %s5879_s29, 512  ;;  %p7210_p5 = scmp.lt.s32.totalorder %s5879_s29, %s5879_s29 }
 0xf9d   :  { %7091 = vtanh.f32 %v5350_v46  ;;  %p7206_p4 = scmp.ne.s32.totalorder %s5879_s29, %s7205_s30  ;;  %p7211_p6 = scmp.lt.s32.totalorder %s7205_s30, %s7205_s30 }
 0xf9f   :  { %p7212_p7 = por %p7211_p6, %p7210_p5 }
 0xfa1   :  { %p7213_p8 = pnand %p7212_p7, %p7206_p4 }
 0xfa4   :  { %v7086_v31 = vpop.eup %7085 }
 0xfa5   :  { %v7088_v32 = vpop.eup %7087  ;;  %v5355_v33 = vadd.f32 1.0, %v7086_v31 }
 0xfa6   :  { %v5361_v34 = vadd.f32 1.0, %v7088_v32  ;;  %v7090_v16 = vpop.eup %7089 }
 0xfa7   :  { %7093 = vrcp.f32 %v5355_v33  ;;  %v7092_v44 = vpop.eup %7091  ;;  %v5368_v5 = vadd.f32 1.0, %v7090_v16 }
 0xfa8   :  { %7095 = vrcp.f32 %v5361_v34 }
 0xfa9   :  { %7097 = vrcp.f32 %v5368_v5 }
 0xfb1   :  { %v7094_v10 = vpop.eup %7093 }
 0xfb2   :  { %v7096_v38 = vpop.eup %7095  ;;  %v5372_v14 = vmul.f32 %v7094_v10, %v7092_v44 }
 0xfb3   :  { %v5371_v12 = vmul.f32 %v7096_v38, %v8542_v22  ;;  %v7098_v43 = vpop.eup %7097  ;;  %v8731_v22 = vld [vmem:[#allocation38_spill] sm:$0xff] }
 0xfb4   :  { %v3186_v19 = vadd.f32 %v8731_v22, %v8206_v53 }
 0xfb5   :  { %v8590_v42 = vadd.f32 %v5372_v14, %v5371_v12 }
 0xfb7   :  { %7099 = vtanh.f32 %v8590_v42 }
 0xfc1   :  { %v7100_v15 = vpop.eup %7099 }
 0xfc2   :  { %v8593_v41 = vmul.f32 %v7100_v15, %v7098_v43 }
 0xfc4   :  { %v5381_v51 = vpack.c.bf16 %v8593_v41, %v8593_v41 }
 0xfc6   :  { %5607 = vmatmul.mubr.bf16.vlgmr.msra.gmra.mrb[88].mxu0 %v5381_v51  ;;  %5648 = vmatmul.mubr.bf16.vlgmr.msra.gmra.mrb[96].mxu1 %v5381_v51 }
 0xfc7   :  { %6563 = vmatpush3.bf16.msra.mxu0 %v6853_v3  ;;  %6578 = vmatprep.mubr.bf16.mxu0 %v5693_v48  ;;  %v8733_v3 = vld [vmem:[#allocation39_spill] sm:$0xff] }
 0xfc8   :  { %6564 = vmatprep.subr.bf16.mxu0 %v6854_v11  ;;  %v3188_v37 = vadd.f32 %v8733_v3, %v8218_v57 }
 0xfcb   :  { %6565 = vmatpush3.bf16.msra.mxu0 %v6854_v11 }
 0xfcc   :  { %6566 = vmatprep.subr.bf16.mxu0 %v6855_v40 }
 0xfcf   :  { %6567 = vmatpush3.bf16.msra.mxu0 %v6855_v40 }
 0xfd0   :  { %6568 = vmatprep.subr.bf16.mxu0 %v6856_v25 }
 0xfd3   :  { %6569 = vmatpush3.bf16.msra.mxu0 %v6856_v25 }
 0xfd4   :  { %6570 = vmatprep.subr.bf16.mxu0 %v6857_v4 }
 0xfd7   :  { %6571 = vmatpush3.bf16.msra.mxu0 %v6857_v4 }
 0xfd8   :  { %6572 = vmatprep.subr.bf16.mxu0 %v6858_v52 }
 0xfdb   :  { %6573 = vmatpush3.bf16.msra.mxu0 %v6858_v52 }
 0xfdc   :  { %6574 = vmatprep.subr.bf16.mxu0 %v6859_v59 }
 0xfdf   :  { %6575 = vmatpush3.bf16.msra.mxu0 %v6859_v59 }
 0xfe0   :  { %6576 = vmatprep.subr.bf16.mxu0 %v6860_v29 }
 0xfe3   :  { %6577 = vmatpush3.bf16.msra.mxu0 %v6860_v29 }
 0xfe6   :  { %6579 = vmatmul.mubr.bf16.vlgmr.msra.gmra.mrb[92].mxu0 %v5694_v35 }
 0xfe7   :  { %6582 = vmatprep.mubr.bf16.mxu0 %v5695_v1 }
0x1099   :  { %v5608_v24 = vpop.f32.mrb[88].mxu0  ;;  %v5649_v45 = vpop.f32.mrb[96].mxu1 }
0x109a   :  { %v5656_v54 = vadd.f32 %v5608_v24, %v3113_v61  ;;  %v5658_v6 = vadd.f32 %v5649_v45, %v3186_v19  ;;  %v5610_v18 = vpop.f32.mrb[89].mxu0  ;;  %v5651_v13 = vpop.f32.mrb[97].mxu1 }
0x109b   :  { %v5657_v60 = vadd.f32 %v5610_v18, %v3115_v49  ;;  %v5659_v7 = vadd.f32 %v5651_v13, %v3188_v37  ;;  %v5612_v56 = vpop.f32.mrb[90].mxu0  ;;  %v5653_v23 = vpop.f32.mrb[98].mxu1 }
0x109c   :  { %v6499_v62 = vmul.f32 -1.442695, %v5656_v54  ;;  %v5613_v58 = vpop.f32.mrb[91].mxu0  ;;  %v5654_v9 = vpop.f32.mrb[99].mxu1 }
0x109d   :  { %v6500_v53 = vmul.f32 -1.442695, %v5657_v60  ;;  %v6501_v28 = vmul.f32 -1.442695, %v5659_v7 }
0x109e   :  { %7101 = vpow2.f32 %v6499_v62 }
0x109f   :  { %7103 = vpow2.f32 %v6500_v53 }
0x10a0   :  { %7105 = vpow2.f32 %v6501_v28 }
0x10a1   :  { %7107 = vtanh.f32 %v5658_v6 }
0x10a8   :  { %v7102_v2 = vpop.eup %7101 }
0x10a9   :  { %v7104_v55 = vpop.eup %7103  ;;  %v5663_v57 = vadd.f32 1.0, %v7102_v2 }
0x10aa   :  { %v5669_v46 = vadd.f32 1.0, %v7104_v55  ;;  %v7106_v17 = vpop.eup %7105 }
0x10ab   :  { %7109 = vrcp.f32 %v5663_v57  ;;  %v7108_v0 = vpop.eup %7107  ;;  %v5676_v63 = vadd.f32 1.0, %v7106_v17 }
0x10ac   :  { %7111 = vrcp.f32 %v5669_v46 }
0x10ad   :  { %7113 = vrcp.f32 %v5676_v63 }
0x10b5   :  { %v7110_v27 = vpop.eup %7109 }
0x10b6   :  { %v7112_v20 = vpop.eup %7111  ;;  %v5680_v26 = vmul.f32 %v7110_v27, %v7108_v0 }
0x10b7   :  { %v5679_v47 = vmul.f32 %v7112_v20, %v8590_v42  ;;  %v7114_v14 = vpop.eup %7113 }
0x10b9   :  { %v6580_v39 = vpop.f32.mrb[92].mxu0  ;;  %v5681_v21 = vadd.f32 %v5680_v26, %v5679_v47 }
0x10ba   :  { %v5802_v30 = vpop.f32.mrb[93].mxu0  ;;  %v5811_v32 = vadd.f32 %v6580_v39, %v6502_v8 }
0x10bb   :  { %v6581_v31 = vpop.f32.mrb[94].mxu0  ;;  %7115 = vtanh.f32 %v5681_v21  ;;  %v5803_v16 = vadd.f32 %v6502_v8, %v5802_v30 }
0x10bc   :  { %v5814_v33 = vadd.f32 %v6581_v31, %v6502_v8  ;;  %v5805_v34 = vpop.f32.mrb[95].mxu0 }
0x10bd   :  { %v5806_v44 = vadd.f32 %v6502_v8, %v5805_v34 }
0x10be   :  { %v6535_v10 = vpack.c.bf16 %v5814_v33, %v5811_v32 }
0x10bf   :  { %v6530_v38 = vpack.c.bf16 %v5806_v44, %v5803_v16 }
0x10c0   :  { %6547 = vst [vmem:[#allocation12 + $0x8] sm:$0xff] %v6535_v10  }
0x10c1   :  { %6531 = vst [vmem:[#allocation12] sm:$0xff] %v6530_v38  }
0x10c5   :  { %v7116_v5 = vpop.eup %7115 }
0x10c6   :  { %v5683_v12 = vmul.f32 %v7116_v5, %v7114_v14 }
0x10c8   :  { %v5696_v42 = vpack.c.bf16 %v5683_v12, %v8593_v41 }
0x10ca   :  { %6583 = vmatmul.mubr.bf16.gmra.mrb[96].mxu0 %v5696_v42 }
0x119d   :  { %v6584_v43 = vpop.f32.mrb[96].mxu0 }
0x119e   :  { %v5818_v15 = vpop.f32.mrb[97].mxu0  ;;  %v5827_v11 = vadd.f32 %v6584_v43, %v6502_v8 }
0x119f   :  { %v6585_v51 = vpop.f32.mrb[98].mxu0  ;;  %v5819_v25 = vadd.f32 %v6502_v8, %v5818_v15 }
0x11a0   :  { %v5830_v48 = vadd.f32 %v6585_v51, %v6502_v8  ;;  %v5821_v40 = vpop.f32.mrb[99].mxu0 }
0x11a1   :  { %v5822_v4 = vadd.f32 %v6502_v8, %v5821_v40 }
0x11a2   :  { %v6545_v52 = vpack.c.bf16 %v5830_v48, %v5827_v11 }
0x11a3   :  { %v6540_v59 = vpack.c.bf16 %v5822_v4, %v5819_v25 }
0x11a4   :  { %6549 = vst [vmem:[#allocation12 + $0x18] sm:$0xff] %v6545_v52  }
0x11a5   :  { %6548 = vst [vmem:[#allocation12 + $0x10] sm:$0xff] %v6540_v59  }
0x11a6   :  { %7216 = shalt.err (!%p7213_p8)
}
0x11a7   :  { %s7217_s4 = scalar_lea.hbm %s8640_s9, 512 }
0x11a8   :  { %p7218_p9 = scmp.ne.s32.totalorder %s8640_s9, %s7217_s4  ;;  %p7221_p10 = scmp.lt.u32.totalorder %s7217_s4, %s8640_s9 }
0x11aa   :  { %p7223_p11 = pnand %p7221_p10, %p7218_p9 }
0x11ac   :  { %7226 = shalt.err (!%p7223_p11)
}
0x11ad   :  { %5884 = dma.vmem_to_hbm [thread:$0]  %s5879_s29, 512, %s8640_s9, [#allocation6], %s7241_s5, %s7241_s5, %s7242_s21  }
0x11ae   :  { %7233 = dma.done.wait [#allocation6], 512  }
0x11af   :  { %7234 = vsyncadd [#allocation6], 4294966784 }
0x11b0   :  { %5888 = vsyncpa [#allocation5], 1 }
0x11b1   :  { %5889 = vsyncpa [#allocation8], 1 }
0x11b2   :  { %5890 = vsyncpa [#allocation11], 1 }
0x11b3   :  { %5891 = vsyncpa [#allocation6], 1 }

</bundles_post_ra>
